<compile_context>
chip_gen: v7x
topology: tpu7x:2x2x1
jax: 0.10.0
libtpu: 0.0.40
codegen_flags: <defaults>
</compile_context>

<pallas_src>
import jax
import jax.numpy as jnp
import numpy as np
from jax import lax
from jax.experimental import pallas as pl
from jax.experimental.pallas import tpu as pltpu

# ---------------- static network / padding configuration ----------------
K = 5                # conv kernel size
C1 = 6               # conv1 out channels (real)
C2 = 16              # conv2 out channels (real)
F1 = 3 * K * K       # 75   conv1 im2col features (kh, kw, cin)
F2 = C1 * K * K      # 150  conv2 im2col features
F1_P = 128           # padded contraction / lane dims
F2_P = 256
C1_P = 128
C2_P = 128
H_P = 128            # padded fc widths (120 / 84 / 10 -> 128)
S2 = 25              # conv2 pooled spatial positions (5x5)
S2_P = 32            # padded so per-image slabs stay sublane(8)-aligned
BT = 8               # batch tile of the fused conv2+MLP kernel
MAX_ROW_TILE = 1024  # pool-window row-tile cap for conv1 (VMEM-sized for v7x/v5e)
NCLS = 10

_COMPILER_PARAMS = pltpu.CompilerParams(
    dimension_semantics=("parallel",),
    vmem_limit_bytes=32 * 1024 * 1024,
)


def _round_up(n, m):
    return ((n + m - 1) // m) * m


# ----------------------------- Pallas kernels -----------------------------

def conv_relu_pool_kernel(x_ref, w_ref, b_ref, o_ref):
    """conv (as im2col matmul) + bias + ReLU + 2x2 max-pool.

    x_ref: (4*T, F) patch rows; rows [j*T:(j+1)*T] are pool-window offset j.
    w_ref: (F, C) zero-padded conv weights, b_ref: (1, C), o_ref: (T, C).
    """
    t = o_ref.shape[0]
    z = jnp.dot(x_ref[...], w_ref[...], preferred_element_type=jnp.float32)   # (4T, C)
    m = jnp.maximum(jnp.maximum(z[0:t, :], z[t:2 * t, :]),
                    jnp.maximum(z[2 * t:3 * t, :], z[3 * t:4 * t, :]))
    o_ref[...] = jnp.maximum(m + b_ref[...], 0.0).astype(o_ref.dtype)


def conv2_mlp_kernel(x_ref, w2_ref, b2_ref, fw1_ref, fb1_ref,
                     fw2_ref, fb2_ref, fw3_ref, fb3_ref, o_ref):
    """Fused conv2 + ReLU + 2x2 max-pool + flatten + fc1/ReLU + fc2/ReLU + fc3.

    x_ref:   (4*S2_P*BT, F2_P) conv2 patch rows for BT images
             (pool-offset major, then spatial-position, then image-in-tile).
    fw1_ref: (S2_P, C2_P, H_P) fc1 weights with the torch flatten permutation folded in.
    o_ref:   (BT, H_P) padded logits (cols >= 10 are zero).
    """
    s_p = fw1_ref.shape[0]
    bt = o_ref.shape[0]
    sb = s_p * bt

    # conv2: one MXU matmul over all 4*S*BT patch rows, then pool-max / bias / relu.
    z = jnp.dot(x_ref[...], w2_ref[...], preferred_element_type=jnp.float32)  # (4*sb, C2)
    m = jnp.maximum(jnp.maximum(z[0:sb, :], z[sb:2 * sb, :]),
                    jnp.maximum(z[2 * sb:3 * sb, :], z[3 * sb:4 * sb, :]))
    y2 = jnp.maximum(m + b2_ref[...], 0.0)                                    # (S*BT, C2)
    y2 = y2.reshape(s_p, bt, y2.shape[-1])                                    # (S, BT, C2)

    # fc1: flatten folded into fw1 -> batched matmul over spatial positions + sum.
    h1 = lax.dot_general(y2, fw1_ref[...],
                         dimension_numbers=(((2,), (1,)), ((0,), (0,))),
                         preferred_element_type=jnp.float32)                  # (S, BT, H)
    h1 = jnp.maximum(jnp.sum(h1, axis=0) + fb1_ref[...], 0.0)                 # (BT, H)

    h2 = jnp.maximum(
        jnp.dot(h1, fw2_ref[...], preferred_element_type=jnp.float32) + fb2_ref[...], 0.0)
    o = jnp.dot(h2, fw3_ref[...], preferred_element_type=jnp.float32) + fb3_ref[...]
    o_ref[...] = o.astype(o_ref.dtype)


# ----------------------------- layer wrappers -----------------------------

def _im2col(x, k):
    """x: (B, H, W, C) -> (B, H-k+1, W-k+1, k*k*C), feature order (kh, kw, c)."""
    b, h, w, c = x.shape
    ho, wo = h - k + 1, w - k + 1
    cols = [x[:, kh:kh + ho, kw:kw + wo, :] for kh in range(k) for kw in range(k)]
    p = jnp.stack(cols, axis=3)                       # (B, ho, wo, k*k, C)
    return p.reshape(b, ho, wo, k * k * c)


def conv1_layer(x_nhwc, w, b):
    """conv1 + relu + 2x2 maxpool. Returns (B, 14, 14, C1_P) (channels >= 6 are zero)."""
    p = _im2col(x_nhwc, K)                            # (B, 28, 28, 75)
    bsz, ho, wo, f = p.shape
    hp, wp = ho // 2, wo // 2
    n_rows = bsz * hp * wp                            # pool windows
    tile = min(_round_up(n_rows, 8), MAX_ROW_TILE)
    np_pad = _round_up(n_rows, tile)
    n_tiles = np_pad // tile

    # group rows by pool window; leading axis = 2x2 pool-window offset.
    p = p.reshape(bsz, hp, 2, wp, 2, f)
    p = p.transpose(2, 4, 0, 1, 3, 5)                 # (jh, jw, b, hp, wp, f)
    p = p.reshape(4, n_rows, f)
    p = jnp.pad(p, ((0, 0), (0, np_pad - n_rows), (0, F1_P - f)))
    # interleave so each grid block of 4*tile rows holds its own 4 offset slabs.
    p = p.reshape(4, n_tiles, tile, F1_P).transpose(1, 0, 2, 3)
    p = p.reshape(n_tiles * 4 * tile, F1_P)

    c = w.shape[1]
    out = pl.pallas_call(
        conv_relu_pool_kernel,
        out_shape=jax.ShapeDtypeStruct((np_pad, c), jnp.float32),
        grid=(n_tiles,),
        in_specs=[
            pl.BlockSpec((4 * tile, F1_P), lambda i: (i, 0)),
            pl.BlockSpec((F1_P, c), lambda i: (0, 0)),
            pl.BlockSpec((1, c), lambda i: (0, 0)),
        ],
        out_specs=pl.BlockSpec((tile, c), lambda i: (i, 0)),
        compiler_params=_COMPILER_PARAMS,
    )(p, w, b)
    return out[:n_rows].reshape(bsz, hp, wp, c)


def conv2_mlp_layer(y1, params):
    """Fused conv2+relu+pool+flatten+MLP. y1: (B, 14, 14, 6). Returns (B, H_P)."""
    p = _im2col(y1, K)                                # (B, 10, 10, 150)
    bsz, ho, wo, f = p.shape
    hp, wp = ho // 2, wo // 2                         # 5, 5
    n_tiles = _round_up(bsz, BT) // BT

    p = p.reshape(bsz, hp, 2, wp, 2, f)
    p = p.transpose(2, 4, 0, 1, 3, 5)                 # (jh, jw, b, hp, wp, f)
    p = p.reshape(4, bsz, hp * wp, f)                 # (4, B, 25, f)
    p = jnp.pad(p, ((0, 0), (0, n_tiles * BT - bsz),
                    (0, S2_P - hp * wp), (0, F2_P - f)))
    p = p.reshape(4, n_tiles, BT, S2_P, F2_P)
    p = p.transpose(1, 0, 3, 2, 4)                    # (tile, j, s, b_in_tile, F)
    p = p.reshape(n_tiles * 4 * S2_P * BT, F2_P)

    out = pl.pallas_call(
        conv2_mlp_kernel,
        out_shape=jax.ShapeDtypeStruct((n_tiles * BT, H_P), jnp.float32),
        grid=(n_tiles,),
        in_specs=[
            pl.BlockSpec((4 * S2_P * BT, F2_P), lambda i: (i, 0)),
            pl.BlockSpec((F2_P, C2_P), lambda i: (0, 0)),
            pl.BlockSpec((1, C2_P), lambda i: (0, 0)),
            pl.BlockSpec((S2_P, C2_P, H_P), lambda i: (0, 0, 0)),
            pl.BlockSpec((1, H_P), lambda i: (0, 0)),
            pl.BlockSpec((H_P, H_P), lambda i: (0, 0)),
            pl.BlockSpec((1, H_P), lambda i: (0, 0)),
            pl.BlockSpec((H_P, H_P), lambda i: (0, 0)),
            pl.BlockSpec((1, H_P), lambda i: (0, 0)),
        ],
        out_specs=pl.BlockSpec((BT, H_P), lambda i: (i, 0)),
        compiler_params=_COMPILER_PARAMS,
    )(p, params["w2m"], params["b2r"], params["fw1p"], params["fb1r"],
      params["fw2p"], params["fb2r"], params["fw3p"], params["fb3r"])
    return out[:bsz]


@jax.jit
def net_forward(x_nchw, params):
    # layout: input is NCHW [B, 3, 32, 32] (PyTorch convention); output is [B, 10].
    x = jnp.transpose(x_nchw, (0, 2, 3, 1))                       # NHWC
    y1 = conv1_layer(x, params["w1m"], params["b1r"])             # (B, 14, 14, 128)
    y1 = y1[..., :C1]                                             # real 6 channels
    out = conv2_mlp_layer(y1, params)                             # (B, 128)
    return out[:, :NCLS]


# ----------------------------- parameter init -----------------------------

def init_params(key):
    def uniform(k, shape, fan_in):
        bound = 1.0 / np.sqrt(fan_in)
        return jax.random.uniform(k, shape, jnp.float32, -bound, bound)

    ks = jax.random.split(key, 10)
    # raw params in PyTorch layouts
    w1 = uniform(ks[0], (6, 3, 5, 5), 3 * 25)
    b1 = uniform(ks[1], (6,), 3 * 25)
    w2 = uniform(ks[2], (16, 6, 5, 5), 6 * 25)
    b2 = uniform(ks[3], (16,), 6 * 25)
    fw1 = uniform(ks[4], (400, 120), 400)     # stored (in, out)
    fb1 = uniform(ks[5], (120,), 400)
    fw2 = uniform(ks[6], (120, 84), 120)
    fb2 = uniform(ks[7], (84,), 120)
    fw3 = uniform(ks[8], (84, 10), 84)
    fb3 = uniform(ks[9], (10,), 84)

    def pad2(a, r, c):
        return jnp.pad(a, ((0, r - a.shape[0]), (0, c - a.shape[1])))

    def pad_row(v, c):
        return jnp.pad(v.reshape(1, -1), ((0, 0), (0, c - v.shape[0])))

    # conv weights as (kh, kw, cin) x cout matrices (matches im2col feature order),
    # zero-padded to lane-dense shapes.
    w1m = pad2(jnp.transpose(w1, (2, 3, 1, 0)).reshape(F1, C1), F1_P, C1_P)
    w2m = pad2(jnp.transpose(w2, (2, 3, 1, 0)).reshape(F2, C2), F2_P, C2_P)

    # fc1 with the torch flatten (c, h, w) permutation folded in:
    #   fw1p[s, c, :] = fw1[c*25 + s, :]   (zero rows for padded s / c, zero pad cols)
    fw1p = jnp.transpose(fw1.reshape(C2, S2, 120), (1, 0, 2))     # (25, 16, 120)
    fw1p = jnp.pad(fw1p, ((0, S2_P - S2), (0, C2_P - C2), (0, H_P - 120)))

    params = {
        "w1m": w1m, "b1r": pad_row(b1, C1_P),
        "w2m": w2m, "b2r": pad_row(b2, C2_P),
        "fw1p": fw1p, "fb1r": pad_row(fb1, H_P),
        "fw2p": pad2(fw2, H_P, H_P), "fb2r": pad_row(fb2, H_P),
        "fw3p": pad2(fw3, H_P, H_P), "fb3r": pad_row(fb3, H_P),
    }
    raw = dict(w1=w1, b1=b1, w2=w2, b2=b2,
               fw1=fw1, fb1=fb1, fw2=fw2, fb2=fb2, fw3=fw3, fb3=fb3)
    return params, raw


# ----------------------------- pure-JAX reference -----------------------------

def ref_forward(x, raw):
    def conv(x, w, b):
        y = lax.conv_general_dilated(
            x, w, window_strides=(1, 1), padding="VALID",
            dimension_numbers=("NCHW", "OIHW", "NCHW"))
        return y + b[None, :, None, None]

    def pool(x):
        return lax.reduce_window(x, -jnp.inf, lax.max,
                                 (1, 1, 2, 2), (1, 1, 2, 2), "VALID")

    h = pool(jax.nn.relu(conv(x, raw["w1"], raw["b1"])))
    h = pool(jax.nn.relu(conv(h, raw["w2"], raw["b2"])))
    h = h.reshape(h.shape[0], -1)
    h = jax.nn.relu(h @ raw["fw1"] + raw["fb1"])
    h = jax.nn.relu(h @ raw["fw2"] + raw["fb2"])
    return h @ raw["fw3"] + raw["fb3"]


if __name__ == "__main__":
    key = jax.random.PRNGKey(0)
    k_x, k_p = jax.random.split(key)
    # batch=2, CIFAR-like 3x32x32 input (forced by fc1 = 16*5*5 in the module)
    x = jax.random.normal(k_x, (2, 3, 32, 32), jnp.float32)
    params, raw = init_params(k_p)

    out = jax.block_until_ready(net_forward(x, params))
    assert out.shape == (2, 10), out.shape

    ref = ref_forward(x, raw)
    np.testing.assert_allclose(np.asarray(out), np.asarray(ref), rtol=1e-4, atol=1e-4)

    print("KERNEL_OK")
</pallas_src>

<mosaic_0001>
module attributes {stable_mosaic.version = 11 : i64} {
  func.func @conv_relu_pool_kernel(%arg0: i32, %arg1: memref<1568x128xf32, #tpu.memory_space<vmem>>, %arg2: memref<128x128xf32, #tpu.memory_space<vmem>>, %arg3: memref<1x128xf32, #tpu.memory_space<vmem>>, %arg4: memref<392x128xf32, #tpu.memory_space<vmem>>) attributes {dimension_semantics = [#tpu.dimension_semantics<parallel>], iteration_bounds = array<i64: 1>, scalar_prefetch = 0 : i64, scratch_operands = 0 : i64, tpu.core_type = #tpu.core_type<tc>, window_params = [{transform_indices = @transform_0, window_bounds = array<i64: 1568, 128>}, {pipeline_mode = #tpu.pipeline_mode<synchronous>, transform_indices = @transform_1, window_bounds = array<i64: 128, 128>}, {pipeline_mode = #tpu.pipeline_mode<synchronous>, transform_indices = @transform_2, window_bounds = array<i64: 1, 128>}, {transform_indices = @transform_3, window_bounds = array<i64: 392, 128>}]} {
    %c0 = arith.constant 0 : index
    %c0_0 = arith.constant 0 : index
    %0 = vector.load %arg1[%c0, %c0_0] : memref<1568x128xf32, #tpu.memory_space<vmem>>, vector<1568x128xf32>
    %c0_1 = arith.constant 0 : index
    %c0_2 = arith.constant 0 : index
    %1 = vector.load %arg2[%c0_1, %c0_2] : memref<128x128xf32, #tpu.memory_space<vmem>>, vector<128x128xf32>
    %cst = arith.constant dense<0.000000e+00> : vector<1568x128xf32>
    %2 = tpu.matmul %0, %1, %cst {dimension_numbers = #tpu.dot_dimension_numbers<[1], [0], [0], [1], [0, 0, 1, 1], [], []>} : vector<1568x128xf32>, vector<128x128xf32>, vector<1568x128xf32> -> vector<1568x128xf32>
    %3 = vector.extract_strided_slice %2 {offsets = [0, 0], sizes = [392, 128], strides = [1, 1]} : vector<1568x128xf32> to vector<392x128xf32>
    %4 = vector.extract_strided_slice %2 {offsets = [392, 0], sizes = [392, 128], strides = [1, 1]} : vector<1568x128xf32> to vector<392x128xf32>
    %5 = arith.maximumf %3, %4 : vector<392x128xf32>
    %6 = vector.extract_strided_slice %2 {offsets = [784, 0], sizes = [392, 128], strides = [1, 1]} : vector<1568x128xf32> to vector<392x128xf32>
    %7 = vector.extract_strided_slice %2 {offsets = [1176, 0], sizes = [392, 128], strides = [1, 1]} : vector<1568x128xf32> to vector<392x128xf32>
    %8 = arith.maximumf %6, %7 : vector<392x128xf32>
    %9 = arith.maximumf %5, %8 : vector<392x128xf32>
    %c0_3 = arith.constant 0 : index
    %c0_4 = arith.constant 0 : index
    %10 = vector.load %arg3[%c0_3, %c0_4] : memref<1x128xf32, #tpu.memory_space<vmem>>, vector<1x128xf32>
    %11 = vector.broadcast %10 : vector<1x128xf32> to vector<392x128xf32>
    %12 = arith.addf %9, %11 : vector<392x128xf32>
    %cst_5 = arith.constant 0.000000e+00 : f32
    %13 = vector.broadcast %cst_5 : f32 to vector<392x128xf32>
    %14 = arith.maximumf %12, %13 : vector<392x128xf32>
    %c0_6 = arith.constant 0 : index
    %c0_7 = arith.constant 0 : index
    %15 = vector.load %arg4[%c0_6, %c0_7] : memref<392x128xf32, #tpu.memory_space<vmem>>, vector<392x128xf32>
    tpu.vector_store %arg4[%c0_6, %c0_7], %14 {strides = array<i32>} : memref<392x128xf32, #tpu.memory_space<vmem>>, vector<392x128xf32>,
    return
  }
  func.func @transform_0(%arg0: i32) -> (i32, i32) {
    %c0_i32 = arith.constant 0 : i32
    %c0_i32_0 = arith.constant 0 : i32
    return %arg0, %c0_i32 : i32, i32
  }
  func.func @transform_1(%arg0: i32) -> (i32, i32) {
    %c0_i32 = arith.constant 0 : i32
    %c0_i32_0 = arith.constant 0 : i32
    %c0_i32_1 = arith.constant 0 : i32
    return %c0_i32, %c0_i32_0 : i32, i32
  }
  func.func @transform_2(%arg0: i32) -> (i32, i32) {
    %c0_i32 = arith.constant 0 : i32
    %c0_i32_0 = arith.constant 0 : i32
    %c0_i32_1 = arith.constant 0 : i32
    return %c0_i32, %c0_i32_0 : i32, i32
  }
  func.func @transform_3(%arg0: i32) -> (i32, i32) {
    %c0_i32 = arith.constant 0 : i32
    %c0_i32_0 = arith.constant 0 : i32
    return %arg0, %c0_i32 : i32, i32
  }
}

module attributes {stable_mosaic.version = 11 : i64} {
  func.func @conv2_mlp_kernel(%arg0: i32, %arg1: memref<1024x256xf32, #tpu.memory_space<vmem>>, %arg2: memref<256x128xf32, #tpu.memory_space<vmem>>, %arg3: memref<1x128xf32, #tpu.memory_space<vmem>>, %arg4: memref<32x128x128xf32, #tpu.memory_space<vmem>>, %arg5: memref<1x128xf32, #tpu.memory_space<vmem>>, %arg6: memref<128x128xf32, #tpu.memory_space<vmem>>, %arg7: memref<1x128xf32, #tpu.memory_space<vmem>>, %arg8: memref<128x128xf32, #tpu.memory_space<vmem>>, %arg9: memref<1x128xf32, #tpu.memory_space<vmem>>, %arg10: memref<8x128xf32, #tpu.memory_space<vmem>>) attributes {dimension_semantics = [#tpu.dimension_semantics<parallel>], iteration_bounds = array<i64: 1>, scalar_prefetch = 0 : i64, scratch_operands = 0 : i64, tpu.core_type = #tpu.core_type<tc>, window_params = [{transform_indices = @transform_0, window_bounds = array<i64: 1024, 256>}, {pipeline_mode = #tpu.pipeline_mode<synchronous>, transform_indices = @transform_1, window_bounds = array<i64: 256, 128>}, {pipeline_mode = #tpu.pipeline_mode<synchronous>, transform_indices = @transform_2, window_bounds = array<i64: 1, 128>}, {pipeline_mode = #tpu.pipeline_mode<synchronous>, transform_indices = @transform_3, window_bounds = array<i64: 32, 128, 128>}, {pipeline_mode = #tpu.pipeline_mode<synchronous>, transform_indices = @transform_4, window_bounds = array<i64: 1, 128>}, {pipeline_mode = #tpu.pipeline_mode<synchronous>, transform_indices = @transform_5, window_bounds = array<i64: 128, 128>}, {pipeline_mode = #tpu.pipeline_mode<synchronous>, transform_indices = @transform_6, window_bounds = array<i64: 1, 128>}, {pipeline_mode = #tpu.pipeline_mode<synchronous>, transform_indices = @transform_7, window_bounds = array<i64: 128, 128>}, {pipeline_mode = #tpu.pipeline_mode<synchronous>, transform_indices = @transform_8, window_bounds = array<i64: 1, 128>}, {transform_indices = @transform_9, window_bounds = array<i64: 8, 128>}]} {
    %c0 = arith.constant 0 : index
    %c0_0 = arith.constant 0 : index
    %0 = vector.load %arg1[%c0, %c0_0] : memref<1024x256xf32, #tpu.memory_space<vmem>>, vector<1024x256xf32>
    %c0_1 = arith.constant 0 : index
    %c0_2 = arith.constant 0 : index
    %1 = vector.load %arg2[%c0_1, %c0_2] : memref<256x128xf32, #tpu.memory_space<vmem>>, vector<256x128xf32>
    %cst = arith.constant dense<0.000000e+00> : vector<1024x128xf32>
    %2 = tpu.matmul %0, %1, %cst {dimension_numbers = #tpu.dot_dimension_numbers<[1], [0], [0], [1], [0, 0, 1, 1], [], []>} : vector<1024x256xf32>, vector<256x128xf32>, vector<1024x128xf32> -> vector<1024x128xf32>
    %3 = vector.extract_strided_slice %2 {offsets = [0, 0], sizes = [256, 128], strides = [1, 1]} : vector<1024x128xf32> to vector<256x128xf32>
    %4 = vector.extract_strided_slice %2 {offsets = [256, 0], sizes = [256, 128], strides = [1, 1]} : vector<1024x128xf32> to vector<256x128xf32>
    %5 = arith.maximumf %3, %4 : vector<256x128xf32>
    %6 = vector.extract_strided_slice %2 {offsets = [512, 0], sizes = [256, 128], strides = [1, 1]} : vector<1024x128xf32> to vector<256x128xf32>
    %7 = vector.extract_strided_slice %2 {offsets = [768, 0], sizes = [256, 128], strides = [1, 1]} : vector<1024x128xf32> to vector<256x128xf32>
    %8 = arith.maximumf %6, %7 : vector<256x128xf32>
    %9 = arith.maximumf %5, %8 : vector<256x128xf32>
    %c0_3 = arith.constant 0 : index
    %c0_4 = arith.constant 0 : index
    %10 = vector.load %arg3[%c0_3, %c0_4] : memref<1x128xf32, #tpu.memory_space<vmem>>, vector<1x128xf32>
    %11 = vector.broadcast %10 : vector<1x128xf32> to vector<256x128xf32>
    %12 = arith.addf %9, %11 : vector<256x128xf32>
    %cst_5 = arith.constant 0.000000e+00 : f32
    %13 = vector.broadcast %cst_5 : f32 to vector<256x128xf32>
    %14 = arith.maximumf %12, %13 : vector<256x128xf32>
    %15 = vector.shape_cast %14 : vector<256x128xf32> to vector<32x8x128xf32>
    %c0_6 = arith.constant 0 : index
    %c0_7 = arith.constant 0 : index
    %c0_8 = arith.constant 0 : index
    %16 = vector.load %arg4[%c0_6, %c0_7, %c0_8] : memref<32x128x128xf32, #tpu.memory_space<vmem>>, vector<32x128x128xf32>
    %cst_9 = arith.constant dense<0.000000e+00> : vector<32x8x128xf32>
    %17 = tpu.matmul %15, %16, %cst_9 {dimension_numbers = #tpu.dot_dimension_numbers<[2], [1], [1], [2], [0, 0, 0, 1, 1, 2], [0], [0]>} : vector<32x8x128xf32>, vector<32x128x128xf32>, vector<32x8x128xf32> -> vector<32x8x128xf32>
    %cst_10 = arith.constant dense<0.000000e+00> : vector<8x128xf32>
    %18 = vector.multi_reduction <add>, %17, %cst_10 [0] : vector<32x8x128xf32> to vector<8x128xf32>
    %c0_11 = arith.constant 0 : index
    %c0_12 = arith.constant 0 : index
    %19 = vector.load %arg5[%c0_11, %c0_12] : memref<1x128xf32, #tpu.memory_space<vmem>>, vector<1x128xf32>
    %20 = vector.broadcast %19 : vector<1x128xf32> to vector<8x128xf32>
    %21 = arith.addf %18, %20 : vector<8x128xf32>
    %cst_13 = arith.constant 0.000000e+00 : f32
    %22 = vector.broadcast %cst_13 : f32 to vector<8x128xf32>
    %23 = arith.maximumf %21, %22 : vector<8x128xf32>
    %c0_14 = arith.constant 0 : index
    %c0_15 = arith.constant 0 : index
    %24 = vector.load %arg6[%c0_14, %c0_15] : memref<128x128xf32, #tpu.memory_space<vmem>>, vector<128x128xf32>
    %cst_16 = arith.constant dense<0.000000e+00> : vector<8x128xf32>
    %25 = tpu.matmul %23, %24, %cst_16 {dimension_numbers = #tpu.dot_dimension_numbers<[1], [0], [0], [1], [0, 0, 1, 1], [], []>} : vector<8x128xf32>, vector<128x128xf32>, vector<8x128xf32> -> vector<8x128xf32>
    %c0_17 = arith.constant 0 : index
    %c0_18 = arith.constant 0 : index
    %26 = vector.load %arg7[%c0_17, %c0_18] : memref<1x128xf32, #tpu.memory_space<vmem>>, vector<1x128xf32>
    %27 = vector.broadcast %26 : vector<1x128xf32> to vector<8x128xf32>
    %28 = arith.addf %25, %27 : vector<8x128xf32>
    %cst_19 = arith.constant 0.000000e+00 : f32
    %29 = vector.broadcast %cst_19 : f32 to vector<8x128xf32>
    %30 = arith.maximumf %28, %29 : vector<8x128xf32>
    %c0_20 = arith.constant 0 : index
    %c0_21 = arith.constant 0 : index
    %31 = vector.load %arg8[%c0_20, %c0_21] : memref<128x128xf32, #tpu.memory_space<vmem>>, vector<128x128xf32>
    %cst_22 = arith.constant dense<0.000000e+00> : vector<8x128xf32>
    %32 = tpu.matmul %30, %31, %cst_22 {dimension_numbers = #tpu.dot_dimension_numbers<[1], [0], [0], [1], [0, 0, 1, 1], [], []>} : vector<8x128xf32>, vector<128x128xf32>, vector<8x128xf32> -> vector<8x128xf32>
    %c0_23 = arith.constant 0 : index
    %c0_24 = arith.constant 0 : index
    %33 = vector.load %arg9[%c0_23, %c0_24] : memref<1x128xf32, #tpu.memory_space<vmem>>, vector<1x128xf32>
    %34 = vector.broadcast %33 : vector<1x128xf32> to vector<8x128xf32>
    %35 = arith.addf %32, %34 : vector<8x128xf32>
    %c0_25 = arith.constant 0 : index
    %c0_26 = arith.constant 0 : index
    %36 = vector.load %arg10[%c0_25, %c0_26] : memref<8x128xf32, #tpu.memory_space<vmem>>, vector<8x128xf32>
    tpu.vector_store %arg10[%c0_25, %c0_26], %35 {strides = array<i32>} : memref<8x128xf32, #tpu.memory_space<vmem>>, vector<8x128xf32>,
    return
  }
  func.func @transform_0(%arg0: i32) -> (i32, i32) {
    %c0_i32 = arith.constant 0 : i32
    %c0_i32_0 = arith.constant 0 : i32
    return %arg0, %c0_i32 : i32, i32
  }
  func.func @transform_1(%arg0: i32) -> (i32, i32) {
    %c0_i32 = arith.constant 0 : i32
    %c0_i32_0 = arith.constant 0 : i32
    %c0_i32_1 = arith.constant 0 : i32
    return %c0_i32, %c0_i32_0 : i32, i32
  }
  func.func @transform_2(%arg0: i32) -> (i32, i32) {
    %c0_i32 = arith.constant 0 : i32
    %c0_i32_0 = arith.constant 0 : i32
    %c0_i32_1 = arith.constant 0 : i32
    return %c0_i32, %c0_i32_0 : i32, i32
  }
  func.func @transform_3(%arg0: i32) -> (i32, i32, i32) {
    %c0_i32 = arith.constant 0 : i32
    %c0_i32_0 = arith.constant 0 : i32
    %c0_i32_1 = arith.constant 0 : i32
    %c0_i32_2 = arith.constant 0 : i32
    return %c0_i32, %c0_i32_0, %c0_i32_1 : i32, i32, i32
  }
  func.func @transform_4(%arg0: i32) -> (i32, i32) {
    %c0_i32 = arith.constant 0 : i32
    %c0_i32_0 = arith.constant 0 : i32
    %c0_i32_1 = arith.constant 0 : i32
    return %c0_i32, %c0_i32_0 : i32, i32
  }
  func.func @transform_5(%arg0: i32) -> (i32, i32) {
    %c0_i32 = arith.constant 0 : i32
    %c0_i32_0 = arith.constant 0 : i32
    %c0_i32_1 = arith.constant 0 : i32
    return %c0_i32, %c0_i32_0 : i32, i32
  }
  func.func @transform_6(%arg0: i32) -> (i32, i32) {
    %c0_i32 = arith.constant 0 : i32
    %c0_i32_0 = arith.constant 0 : i32
    %c0_i32_1 = arith.constant 0 : i32
    return %c0_i32, %c0_i32_0 : i32, i32
  }
  func.func @transform_7(%arg0: i32) -> (i32, i32) {
    %c0_i32 = arith.constant 0 : i32
    %c0_i32_0 = arith.constant 0 : i32
    %c0_i32_1 = arith.constant 0 : i32
    return %c0_i32, %c0_i32_0 : i32, i32
  }
  func.func @transform_8(%arg0: i32) -> (i32, i32) {
    %c0_i32 = arith.constant 0 : i32
    %c0_i32_0 = arith.constant 0 : i32
    %c0_i32_1 = arith.constant 0 : i32
    return %c0_i32, %c0_i32_0 : i32, i32
  }
  func.func @transform_9(%arg0: i32) -> (i32, i32) {
    %c0_i32 = arith.constant 0 : i32
    %c0_i32_0 = arith.constant 0 : i32
    return %arg0, %c0_i32 : i32, i32
  }
}

</mosaic_0001>

<bundles_post_ra>
// kernel: net_forward.2
= control target key start
LH: loop header
LB: loop body
LE: loop exit
PB: predicated region body
PF: predicated region fallthrough
CT: control target
= control target key end

     0   :  { %s3314_s1 = inlined_call_operand.vmem [shape: f32[128,128], index: 1, kind: input, shape index: {}]   ;;  %s3315_s0 = inlined_call_operand.vmem [shape: f32[1568,128], index: 0, kind: input, shape index: {}]   ;;  %s3316_s2 = inlined_call_operand.vmem [shape: f32[1,128], index: 2, kind: input, shape index: {}]   ;;  %s3317_s3 = inlined_call_operand.vmem [shape: f32[392,128], index: 3, kind: output, shape index: {}]  }
   0x1   :  { %v210_v0 = vld [vmem:[%s3314_s1] sm:$0xff]  ;;  %v211_v1 = vld [vmem:[%s3314_s1 + $0x8] sm:$0xff]  ;;  %v212_v2 = vld [vmem:[%s3314_s1 + $0x10] sm:$0xff] }
   0x2   :  { %v2115_v3 = vpack.c.bf16 %v211_v1, %v210_v0  ;;  %v213_v4 = vld [vmem:[%s3314_s1 + $0x18] sm:$0xff]  ;;  %v214_v6 = vld [vmem:[%s3314_s1 + $0x20] sm:$0xff]  ;;  %v215_v7 = vld [vmem:[%s3314_s1 + $0x28] sm:$0xff] }
   0x3   :  { %v2119_v5 = vpack.c.bf16 %v213_v4, %v212_v2  ;;  %v2123_v8 = vpack.c.bf16 %v215_v7, %v214_v6  ;;  %v14_v9 = vld [vmem:[%s3315_s0] sm:$0xff]  ;;  %v112_v10 = vld [vmem:[%s3315_s0 + $0x310] sm:$0xff]  ;;  %v217_v12 = vld [vmem:[%s3314_s1 + $0x38] sm:$0xff] }
   0x4   :  { %2116 = vmatprep.subr.bf16.mxu0 %v2115_v3  ;;  %2147 = vmatprep.subr.bf16.mxu1 %v2115_v3  ;;  %v216_v11 = vld [vmem:[%s3314_s1 + $0x30] sm:$0xff]  ;;  %v218_v14 = vld [vmem:[%s3314_s1 + $0x40] sm:$0xff]  ;;  %v219_v15 = vld [vmem:[%s3314_s1 + $0x48] sm:$0xff] }
   0x5   :  { %2118 = vmatpush3.bf16.msra.mxu0 %v2115_v3  ;;  %2155 = vmatpush3.bf16.msra.mxu1 %v2115_v3  ;;  %v2127_v13 = vpack.c.bf16 %v217_v12, %v216_v11  ;;  %v2131_v16 = vpack.c.bf16 %v219_v15, %v218_v14  ;;  %v220_v17 = vld [vmem:[%s3314_s1 + $0x50] sm:$0xff]  ;;  %v221_v18 = vld [vmem:[%s3314_s1 + $0x58] sm:$0xff]  ;;  %v222_v20 = vld [vmem:[%s3314_s1 + $0x60] sm:$0xff] }
   0x6   :  { %2120 = vmatprep.subr.bf16.mxu0 %v2119_v5  ;;  %2148 = vmatprep.subr.bf16.mxu1 %v2119_v5  ;;  %v2135_v19 = vpack.c.bf16 %v221_v18, %v220_v17  ;;  %v223_v21 = vld [vmem:[%s3314_s1 + $0x68] sm:$0xff]  ;;  %v224_v23 = vld [vmem:[%s3314_s1 + $0x70] sm:$0xff]  ;;  %v225_v24 = vld [vmem:[%s3314_s1 + $0x78] sm:$0xff] }
   0x7   :  { %1821 = vmatprep.mubr.f32.mxu0 %v14_v9  ;;  %1968 = vmatprep.mubr.f32.mxu1 %v112_v10  ;;  %v2139_v22 = vpack.c.bf16 %v223_v21, %v222_v20  ;;  %v2143_v25 = vpack.c.bf16 %v225_v24, %v224_v23  ;;  %v15_v26 = vld [vmem:[%s3315_s0 + $0x8] sm:$0xff]  ;;  %v113_v27 = vld [vmem:[%s3315_s0 + $0x318] sm:$0xff]  ;;  %v16_v28 = vld [vmem:[%s3315_s0 + $0x10] sm:$0xff] }
   0x8   :  { %v114_v29 = vld [vmem:[%s3315_s0 + $0x320] sm:$0xff]  ;;  %v17_v30 = vld [vmem:[%s3315_s0 + $0x18] sm:$0xff]  ;;  %v115_v31 = vld [vmem:[%s3315_s0 + $0x328] sm:$0xff] }
   0x9   :  { %2122 = vmatpush3.bf16.msra.mxu0 %v2119_v5  ;;  %2156 = vmatpush3.bf16.msra.mxu1 %v2119_v5  ;;  %v18_v32 = vld [vmem:[%s3315_s0 + $0x20] sm:$0xff]  ;;  %v116_v33 = vld [vmem:[%s3315_s0 + $0x330] sm:$0xff]  ;;  %v19_v34 = vld [vmem:[%s3315_s0 + $0x28] sm:$0xff] }
   0xa   :  { %2124 = vmatprep.subr.bf16.mxu0 %v2123_v8  ;;  %2149 = vmatprep.subr.bf16.mxu1 %v2123_v8  ;;  %v117_v35 = vld [vmem:[%s3315_s0 + $0x338] sm:$0xff]  ;;  %v20_v36 = vld [vmem:[%s3315_s0 + $0x30] sm:$0xff]  ;;  %v118_v37 = vld [vmem:[%s3315_s0 + $0x340] sm:$0xff] }
   0xb   :  { %v21_v38 = vld [vmem:[%s3315_s0 + $0x38] sm:$0xff]  ;;  %v119_v39 = vld [vmem:[%s3315_s0 + $0x348] sm:$0xff]  ;;  %v22_v40 = vld [vmem:[%s3315_s0 + $0x40] sm:$0xff] }
   0xc   :  { %v120_v41 = vld [vmem:[%s3315_s0 + $0x350] sm:$0xff]  ;;  %v23_v42 = vld [vmem:[%s3315_s0 + $0x48] sm:$0xff]  ;;  %v121_v43 = vld [vmem:[%s3315_s0 + $0x358] sm:$0xff] }
   0xd   :  { %2126 = vmatpush3.bf16.msra.mxu0 %v2123_v8  ;;  %2157 = vmatpush3.bf16.msra.mxu1 %v2123_v8  ;;  %v24_v44 = vld [vmem:[%s3315_s0 + $0x50] sm:$0xff]  ;;  %v122_v45 = vld [vmem:[%s3315_s0 + $0x360] sm:$0xff]  ;;  %v25_v46 = vld [vmem:[%s3315_s0 + $0x58] sm:$0xff] }
   0xe   :  { %2128 = vmatprep.subr.bf16.mxu0 %v2127_v13  ;;  %2150 = vmatprep.subr.bf16.mxu1 %v2127_v13  ;;  %v123_v47 = vld [vmem:[%s3315_s0 + $0x368] sm:$0xff]  ;;  %v26_v48 = vld [vmem:[%s3315_s0 + $0x60] sm:$0xff]  ;;  %v124_v49 = vld [vmem:[%s3315_s0 + $0x370] sm:$0xff] }
   0xf   :  { %v27_v50 = vld [vmem:[%s3315_s0 + $0x68] sm:$0xff]  ;;  %v125_v51 = vld [vmem:[%s3315_s0 + $0x378] sm:$0xff]  ;;  %v28_v52 = vld [vmem:[%s3315_s0 + $0x70] sm:$0xff] }
  0x10   :  { %v126_v53 = vld [vmem:[%s3315_s0 + $0x380] sm:$0xff]  ;;  %v29_v54 = vld [vmem:[%s3315_s0 + $0x78] sm:$0xff]  ;;  %v127_v55 = vld [vmem:[%s3315_s0 + $0x388] sm:$0xff] }
  0x11   :  { %2130 = vmatpush3.bf16.msra.mxu0 %v2127_v13  ;;  %2158 = vmatpush3.bf16.msra.mxu1 %v2127_v13  ;;  %v30_v56 = vld [vmem:[%s3315_s0 + $0x80] sm:$0xff]  ;;  %v128_v57 = vld [vmem:[%s3315_s0 + $0x390] sm:$0xff]  ;;  %v31_v58 = vld [vmem:[%s3315_s0 + $0x88] sm:$0xff] }
  0x12   :  { %2132 = vmatprep.subr.bf16.mxu0 %v2131_v16  ;;  %2151 = vmatprep.subr.bf16.mxu1 %v2131_v16  ;;  %v129_v59 = vld [vmem:[%s3315_s0 + $0x398] sm:$0xff]  ;;  %v32_v60 = vld [vmem:[%s3315_s0 + $0x90] sm:$0xff]  ;;  %v130_v61 = vld [vmem:[%s3315_s0 + $0x3a0] sm:$0xff] }
  0x13   :  { %v33_v62 = vld [vmem:[%s3315_s0 + $0x98] sm:$0xff]  ;;  %v131_v63 = vld [vmem:[%s3315_s0 + $0x3a8] sm:$0xff]  ;;  %v34_v0 = vld [vmem:[%s3315_s0 + $0xa0] sm:$0xff] }
  0x14   :  { %v132_v1 = vld [vmem:[%s3315_s0 + $0x3b0] sm:$0xff]  ;;  %v35_v2 = vld [vmem:[%s3315_s0 + $0xa8] sm:$0xff]  ;;  %v133_v3 = vld [vmem:[%s3315_s0 + $0x3b8] sm:$0xff] }
  0x15   :  { %2134 = vmatpush3.bf16.msra.mxu0 %v2131_v16  ;;  %2159 = vmatpush3.bf16.msra.mxu1 %v2131_v16  ;;  %v36_v4 = vld [vmem:[%s3315_s0 + $0xb0] sm:$0xff]  ;;  %v134_v5 = vld [vmem:[%s3315_s0 + $0x3c0] sm:$0xff]  ;;  %v37_v6 = vld [vmem:[%s3315_s0 + $0xb8] sm:$0xff] }
  0x16   :  { %2136 = vmatprep.subr.bf16.mxu0 %v2135_v19  ;;  %2152 = vmatprep.subr.bf16.mxu1 %v2135_v19  ;;  %v135_v7 = vld [vmem:[%s3315_s0 + $0x3c8] sm:$0xff]  ;;  %v38_v8 = vld [vmem:[%s3315_s0 + $0xc0] sm:$0xff]  ;;  %v136_v9 = vld [vmem:[%s3315_s0 + $0x3d0] sm:$0xff] }
  0x17   :  { %v39_v10 = vld [vmem:[%s3315_s0 + $0xc8] sm:$0xff]  ;;  %v137_v11 = vld [vmem:[%s3315_s0 + $0x3d8] sm:$0xff]  ;;  %v40_v12 = vld [vmem:[%s3315_s0 + $0xd0] sm:$0xff] }
  0x18   :  { %v138_v13 = vld [vmem:[%s3315_s0 + $0x3e0] sm:$0xff]  ;;  %v41_v14 = vld [vmem:[%s3315_s0 + $0xd8] sm:$0xff]  ;;  %v139_v15 = vld [vmem:[%s3315_s0 + $0x3e8] sm:$0xff] }
  0x19   :  { %2138 = vmatpush3.bf16.msra.mxu0 %v2135_v19  ;;  %2160 = vmatpush3.bf16.msra.mxu1 %v2135_v19  ;;  %v42_v16 = vld [vmem:[%s3315_s0 + $0xe0] sm:$0xff]  ;;  %v140_v17 = vld [vmem:[%s3315_s0 + $0x3f0] sm:$0xff]  ;;  %v43_v18 = vld [vmem:[%s3315_s0 + $0xe8] sm:$0xff] }
  0x1a   :  { %2140 = vmatprep.subr.bf16.mxu0 %v2139_v22  ;;  %2153 = vmatprep.subr.bf16.mxu1 %v2139_v22  ;;  %v141_v19 = vld [vmem:[%s3315_s0 + $0x3f8] sm:$0xff]  ;;  %v44_v20 = vld [vmem:[%s3315_s0 + $0xf0] sm:$0xff]  ;;  %v142_v21 = vld [vmem:[%s3315_s0 + $0x400] sm:$0xff] }
  0x1b   :  { %v143_v23 = vld [vmem:[%s3315_s0 + $0x408] sm:$0xff]  ;;  %v46_v24 = vld [vmem:[%s3315_s0 + $0x100] sm:$0xff] }
  0x1d   :  { %2142 = vmatpush3.bf16.msra.mxu0 %v2139_v22  ;;  %2161 = vmatpush3.bf16.msra.mxu1 %v2139_v22  ;;  %v45_v22 = vld [vmem:[%s3315_s0 + $0xf8] sm:$0xff] }
  0x1e   :  { %2144 = vmatprep.subr.bf16.mxu0 %v2143_v25  ;;  %2154 = vmatprep.subr.bf16.mxu1 %v2143_v25 }
  0x21   :  { %2146 = vmatpush3.bf16.msra.mxu0 %v2143_v25  ;;  %2162 = vmatpush3.bf16.msra.mxu1 %v2143_v25  ;;  %v144_v25 = vld [vmem:[%s3315_s0 + $0x410] sm:$0xff] }
  0x24   :  { %1822 = vmatmul.mubr.f32.vlgmr.msra.gmra.mrb[0].mxu0 %v15_v26  ;;  %1969 = vmatmul.mubr.f32.vlgmr.msra.gmra.mrb[0].mxu1 %v113_v27  ;;  %v47_v26 = vld [vmem:[%s3315_s0 + $0x108] sm:$0xff]  ;;  %v145_v27 = vld [vmem:[%s3315_s0 + $0x418] sm:$0xff] }
  0x25   :  { %1824 = vmatprep.mubr.f32.mxu0 %v16_v28  ;;  %1971 = vmatprep.mubr.f32.mxu1 %v114_v29  ;;  %v48_v28 = vld [vmem:[%s3315_s0 + $0x110] sm:$0xff]  ;;  %v146_v29 = vld [vmem:[%s3315_s0 + $0x420] sm:$0xff] }
  0x28   :  { %1825 = vmatmul.mubr.f32.gmra.mrb[2].mxu0 %v17_v30  ;;  %1972 = vmatmul.mubr.f32.gmra.mrb[2].mxu1 %v115_v31  ;;  %v49_v30 = vld [vmem:[%s3315_s0 + $0x118] sm:$0xff]  ;;  %v147_v31 = vld [vmem:[%s3315_s0 + $0x428] sm:$0xff] }
  0x29   :  { %1827 = vmatprep.mubr.f32.mxu0 %v18_v32  ;;  %1974 = vmatprep.mubr.f32.mxu1 %v116_v33  ;;  %v50_v32 = vld [vmem:[%s3315_s0 + $0x120] sm:$0xff]  ;;  %v148_v33 = vld [vmem:[%s3315_s0 + $0x430] sm:$0xff] }
  0x2c   :  { %1828 = vmatmul.mubr.f32.gmra.mrb[4].mxu0 %v19_v34  ;;  %1975 = vmatmul.mubr.f32.gmra.mrb[4].mxu1 %v117_v35  ;;  %v51_v34 = vld [vmem:[%s3315_s0 + $0x128] sm:$0xff]  ;;  %v149_v35 = vld [vmem:[%s3315_s0 + $0x438] sm:$0xff] }
  0x2d   :  { %1830 = vmatprep.mubr.f32.mxu0 %v20_v36  ;;  %1977 = vmatprep.mubr.f32.mxu1 %v118_v37  ;;  %v52_v36 = vld [vmem:[%s3315_s0 + $0x130] sm:$0xff]  ;;  %v150_v37 = vld [vmem:[%s3315_s0 + $0x440] sm:$0xff] }
  0x30   :  { %1831 = vmatmul.mubr.f32.gmra.mrb[6].mxu0 %v21_v38  ;;  %1978 = vmatmul.mubr.f32.gmra.mrb[6].mxu1 %v119_v39  ;;  %v53_v38 = vld [vmem:[%s3315_s0 + $0x138] sm:$0xff]  ;;  %v151_v39 = vld [vmem:[%s3315_s0 + $0x448] sm:$0xff] }
  0x31   :  { %1833 = vmatprep.mubr.f32.mxu0 %v22_v40  ;;  %1980 = vmatprep.mubr.f32.mxu1 %v120_v41  ;;  %v54_v40 = vld [vmem:[%s3315_s0 + $0x140] sm:$0xff]  ;;  %v152_v41 = vld [vmem:[%s3315_s0 + $0x450] sm:$0xff] }
  0x34   :  { %1834 = vmatmul.mubr.f32.gmra.mrb[8].mxu0 %v23_v42  ;;  %1981 = vmatmul.mubr.f32.gmra.mrb[8].mxu1 %v121_v43  ;;  %v55_v42 = vld [vmem:[%s3315_s0 + $0x148] sm:$0xff]  ;;  %v153_v43 = vld [vmem:[%s3315_s0 + $0x458] sm:$0xff] }
  0x35   :  { %1836 = vmatprep.mubr.f32.mxu0 %v24_v44  ;;  %1983 = vmatprep.mubr.f32.mxu1 %v122_v45  ;;  %v56_v44 = vld [vmem:[%s3315_s0 + $0x150] sm:$0xff]  ;;  %v154_v45 = vld [vmem:[%s3315_s0 + $0x460] sm:$0xff] }
  0x38   :  { %1837 = vmatmul.mubr.f32.gmra.mrb[10].mxu0 %v25_v46  ;;  %1984 = vmatmul.mubr.f32.gmra.mrb[10].mxu1 %v123_v47  ;;  %v57_v46 = vld [vmem:[%s3315_s0 + $0x158] sm:$0xff]  ;;  %v155_v47 = vld [vmem:[%s3315_s0 + $0x468] sm:$0xff] }
  0x39   :  { %1839 = vmatprep.mubr.f32.mxu0 %v26_v48  ;;  %1986 = vmatprep.mubr.f32.mxu1 %v124_v49  ;;  %v58_v48 = vld [vmem:[%s3315_s0 + $0x160] sm:$0xff]  ;;  %v156_v49 = vld [vmem:[%s3315_s0 + $0x470] sm:$0xff] }
  0x3c   :  { %1840 = vmatmul.mubr.f32.gmra.mrb[12].mxu0 %v27_v50  ;;  %1987 = vmatmul.mubr.f32.gmra.mrb[12].mxu1 %v125_v51  ;;  %v59_v50 = vld [vmem:[%s3315_s0 + $0x168] sm:$0xff]  ;;  %v157_v51 = vld [vmem:[%s3315_s0 + $0x478] sm:$0xff] }
  0x3d   :  { %1842 = vmatprep.mubr.f32.mxu0 %v28_v52  ;;  %1989 = vmatprep.mubr.f32.mxu1 %v126_v53  ;;  %v60_v52 = vld [vmem:[%s3315_s0 + $0x170] sm:$0xff]  ;;  %v158_v53 = vld [vmem:[%s3315_s0 + $0x480] sm:$0xff] }
  0x40   :  { %1843 = vmatmul.mubr.f32.gmra.mrb[14].mxu0 %v29_v54  ;;  %1990 = vmatmul.mubr.f32.gmra.mrb[14].mxu1 %v127_v55  ;;  %v61_v54 = vld [vmem:[%s3315_s0 + $0x178] sm:$0xff]  ;;  %v159_v55 = vld [vmem:[%s3315_s0 + $0x488] sm:$0xff] }
  0x41   :  { %1845 = vmatprep.mubr.f32.mxu0 %v30_v56  ;;  %1992 = vmatprep.mubr.f32.mxu1 %v128_v57  ;;  %v62_v56 = vld [vmem:[%s3315_s0 + $0x180] sm:$0xff]  ;;  %v160_v57 = vld [vmem:[%s3315_s0 + $0x490] sm:$0xff] }
  0x44   :  { %1846 = vmatmul.mubr.f32.gmra.mrb[16].mxu0 %v31_v58  ;;  %1993 = vmatmul.mubr.f32.gmra.mrb[16].mxu1 %v129_v59  ;;  %v63_v58 = vld [vmem:[%s3315_s0 + $0x188] sm:$0xff]  ;;  %v161_v59 = vld [vmem:[%s3315_s0 + $0x498] sm:$0xff] }
  0x45   :  { %1848 = vmatprep.mubr.f32.mxu0 %v32_v60  ;;  %1995 = vmatprep.mubr.f32.mxu1 %v130_v61  ;;  %v64_v60 = vld [vmem:[%s3315_s0 + $0x190] sm:$0xff]  ;;  %v162_v61 = vld [vmem:[%s3315_s0 + $0x4a0] sm:$0xff] }
  0x48   :  { %1849 = vmatmul.mubr.f32.gmra.mrb[18].mxu0 %v33_v62  ;;  %1996 = vmatmul.mubr.f32.gmra.mrb[18].mxu1 %v131_v63  ;;  %v65_v62 = vld [vmem:[%s3315_s0 + $0x198] sm:$0xff]  ;;  %v163_v63 = vld [vmem:[%s3315_s0 + $0x4a8] sm:$0xff] }
  0x49   :  { %1851 = vmatprep.mubr.f32.mxu0 %v34_v0  ;;  %1998 = vmatprep.mubr.f32.mxu1 %v132_v1  ;;  %v66_v0 = vld [vmem:[%s3315_s0 + $0x1a0] sm:$0xff]  ;;  %v164_v1 = vld [vmem:[%s3315_s0 + $0x4b0] sm:$0xff] }
  0x4c   :  { %1852 = vmatmul.mubr.f32.gmra.mrb[20].mxu0 %v35_v2  ;;  %1999 = vmatmul.mubr.f32.gmra.mrb[20].mxu1 %v133_v3  ;;  %v67_v2 = vld [vmem:[%s3315_s0 + $0x1a8] sm:$0xff]  ;;  %v165_v3 = vld [vmem:[%s3315_s0 + $0x4b8] sm:$0xff] }
  0x4d   :  { %1854 = vmatprep.mubr.f32.mxu0 %v36_v4  ;;  %2001 = vmatprep.mubr.f32.mxu1 %v134_v5  ;;  %v68_v4 = vld [vmem:[%s3315_s0 + $0x1b0] sm:$0xff]  ;;  %v166_v5 = vld [vmem:[%s3315_s0 + $0x4c0] sm:$0xff] }
  0x50   :  { %1855 = vmatmul.mubr.f32.gmra.mrb[22].mxu0 %v37_v6  ;;  %2002 = vmatmul.mubr.f32.gmra.mrb[22].mxu1 %v135_v7  ;;  %v69_v6 = vld [vmem:[%s3315_s0 + $0x1b8] sm:$0xff]  ;;  %v167_v7 = vld [vmem:[%s3315_s0 + $0x4c8] sm:$0xff] }
  0x51   :  { %1857 = vmatprep.mubr.f32.mxu0 %v38_v8  ;;  %2004 = vmatprep.mubr.f32.mxu1 %v136_v9  ;;  %v70_v8 = vld [vmem:[%s3315_s0 + $0x1c0] sm:$0xff]  ;;  %v168_v9 = vld [vmem:[%s3315_s0 + $0x4d0] sm:$0xff] }
  0x54   :  { %1858 = vmatmul.mubr.f32.gmra.mrb[24].mxu0 %v39_v10  ;;  %2005 = vmatmul.mubr.f32.gmra.mrb[24].mxu1 %v137_v11  ;;  %v71_v10 = vld [vmem:[%s3315_s0 + $0x1c8] sm:$0xff]  ;;  %v169_v11 = vld [vmem:[%s3315_s0 + $0x4d8] sm:$0xff] }
  0x55   :  { %1860 = vmatprep.mubr.f32.mxu0 %v40_v12  ;;  %2007 = vmatprep.mubr.f32.mxu1 %v138_v13  ;;  %v72_v12 = vld [vmem:[%s3315_s0 + $0x1d0] sm:$0xff]  ;;  %v170_v13 = vld [vmem:[%s3315_s0 + $0x4e0] sm:$0xff] }
  0x58   :  { %1861 = vmatmul.mubr.f32.gmra.mrb[26].mxu0 %v41_v14  ;;  %2008 = vmatmul.mubr.f32.gmra.mrb[26].mxu1 %v139_v15  ;;  %v73_v14 = vld [vmem:[%s3315_s0 + $0x1d8] sm:$0xff]  ;;  %v171_v15 = vld [vmem:[%s3315_s0 + $0x4e8] sm:$0xff] }
  0x59   :  { %1863 = vmatprep.mubr.f32.mxu0 %v42_v16  ;;  %2010 = vmatprep.mubr.f32.mxu1 %v140_v17  ;;  %v74_v16 = vld [vmem:[%s3315_s0 + $0x1e0] sm:$0xff]  ;;  %v172_v17 = vld [vmem:[%s3315_s0 + $0x4f0] sm:$0xff] }
  0x5c   :  { %1864 = vmatmul.mubr.f32.gmra.mrb[28].mxu0 %v43_v18  ;;  %2011 = vmatmul.mubr.f32.gmra.mrb[28].mxu1 %v141_v19  ;;  %v75_v18 = vld [vmem:[%s3315_s0 + $0x1e8] sm:$0xff]  ;;  %v173_v19 = vld [vmem:[%s3315_s0 + $0x4f8] sm:$0xff] }
  0x5d   :  { %1866 = vmatprep.mubr.f32.mxu0 %v44_v20  ;;  %2013 = vmatprep.mubr.f32.mxu1 %v142_v21  ;;  %v76_v20 = vld [vmem:[%s3315_s0 + $0x1f0] sm:$0xff]  ;;  %v174_v21 = vld [vmem:[%s3315_s0 + $0x500] sm:$0xff] }
  0x60   :  { %1867 = vmatmul.mubr.f32.gmra.mrb[30].mxu0 %v45_v22  ;;  %2014 = vmatmul.mubr.f32.gmra.mrb[30].mxu1 %v143_v23  ;;  %v77_v22 = vld [vmem:[%s3315_s0 + $0x1f8] sm:$0xff]  ;;  %v175_v23 = vld [vmem:[%s3315_s0 + $0x508] sm:$0xff] }
  0x61   :  { %1869 = vmatprep.mubr.f32.mxu0 %v46_v24  ;;  %2016 = vmatprep.mubr.f32.mxu1 %v144_v25  ;;  %v78_v24 = vld [vmem:[%s3315_s0 + $0x200] sm:$0xff]  ;;  %v176_v25 = vld [vmem:[%s3315_s0 + $0x510] sm:$0xff] }
  0x64   :  { %1870 = vmatmul.mubr.f32.gmra.mrb[32].mxu0 %v47_v26  ;;  %2017 = vmatmul.mubr.f32.gmra.mrb[32].mxu1 %v145_v27  ;;  %v79_v26 = vld [vmem:[%s3315_s0 + $0x208] sm:$0xff]  ;;  %v177_v27 = vld [vmem:[%s3315_s0 + $0x518] sm:$0xff] }
  0x65   :  { %1872 = vmatprep.mubr.f32.mxu0 %v48_v28  ;;  %2019 = vmatprep.mubr.f32.mxu1 %v146_v29  ;;  %v80_v28 = vld [vmem:[%s3315_s0 + $0x210] sm:$0xff]  ;;  %v178_v29 = vld [vmem:[%s3315_s0 + $0x520] sm:$0xff] }
  0x68   :  { %1873 = vmatmul.mubr.f32.gmra.mrb[34].mxu0 %v49_v30  ;;  %2020 = vmatmul.mubr.f32.gmra.mrb[34].mxu1 %v147_v31  ;;  %v81_v30 = vld [vmem:[%s3315_s0 + $0x218] sm:$0xff]  ;;  %v179_v31 = vld [vmem:[%s3315_s0 + $0x528] sm:$0xff] }
  0x69   :  { %1875 = vmatprep.mubr.f32.mxu0 %v50_v32  ;;  %2022 = vmatprep.mubr.f32.mxu1 %v148_v33  ;;  %v82_v32 = vld [vmem:[%s3315_s0 + $0x220] sm:$0xff]  ;;  %v180_v33 = vld [vmem:[%s3315_s0 + $0x530] sm:$0xff] }
  0x6c   :  { %1876 = vmatmul.mubr.f32.gmra.mrb[36].mxu0 %v51_v34  ;;  %2023 = vmatmul.mubr.f32.gmra.mrb[36].mxu1 %v149_v35  ;;  %v83_v34 = vld [vmem:[%s3315_s0 + $0x228] sm:$0xff]  ;;  %v181_v35 = vld [vmem:[%s3315_s0 + $0x538] sm:$0xff] }
  0x6d   :  { %1878 = vmatprep.mubr.f32.mxu0 %v52_v36  ;;  %2025 = vmatprep.mubr.f32.mxu1 %v150_v37  ;;  %v84_v36 = vld [vmem:[%s3315_s0 + $0x230] sm:$0xff]  ;;  %v182_v37 = vld [vmem:[%s3315_s0 + $0x540] sm:$0xff] }
  0x70   :  { %1879 = vmatmul.mubr.f32.gmra.mrb[38].mxu0 %v53_v38  ;;  %2026 = vmatmul.mubr.f32.gmra.mrb[38].mxu1 %v151_v39  ;;  %v85_v38 = vld [vmem:[%s3315_s0 + $0x238] sm:$0xff]  ;;  %v183_v39 = vld [vmem:[%s3315_s0 + $0x548] sm:$0xff] }
  0x71   :  { %1881 = vmatprep.mubr.f32.mxu0 %v54_v40  ;;  %2028 = vmatprep.mubr.f32.mxu1 %v152_v41  ;;  %v86_v40 = vld [vmem:[%s3315_s0 + $0x240] sm:$0xff]  ;;  %v184_v41 = vld [vmem:[%s3315_s0 + $0x550] sm:$0xff] }
  0x74   :  { %1882 = vmatmul.mubr.f32.gmra.mrb[40].mxu0 %v55_v42  ;;  %2029 = vmatmul.mubr.f32.gmra.mrb[40].mxu1 %v153_v43  ;;  %v87_v42 = vld [vmem:[%s3315_s0 + $0x248] sm:$0xff]  ;;  %v185_v43 = vld [vmem:[%s3315_s0 + $0x558] sm:$0xff] }
  0x75   :  { %1884 = vmatprep.mubr.f32.mxu0 %v56_v44  ;;  %2031 = vmatprep.mubr.f32.mxu1 %v154_v45  ;;  %v88_v44 = vld [vmem:[%s3315_s0 + $0x250] sm:$0xff]  ;;  %v186_v45 = vld [vmem:[%s3315_s0 + $0x560] sm:$0xff] }
  0x78   :  { %1885 = vmatmul.mubr.f32.gmra.mrb[42].mxu0 %v57_v46  ;;  %2032 = vmatmul.mubr.f32.gmra.mrb[42].mxu1 %v155_v47  ;;  %v89_v46 = vld [vmem:[%s3315_s0 + $0x258] sm:$0xff]  ;;  %v187_v47 = vld [vmem:[%s3315_s0 + $0x568] sm:$0xff] }
  0x79   :  { %1887 = vmatprep.mubr.f32.mxu0 %v58_v48  ;;  %2034 = vmatprep.mubr.f32.mxu1 %v156_v49  ;;  %v90_v48 = vld [vmem:[%s3315_s0 + $0x260] sm:$0xff]  ;;  %v188_v49 = vld [vmem:[%s3315_s0 + $0x570] sm:$0xff] }
  0x7c   :  { %1888 = vmatmul.mubr.f32.gmra.mrb[44].mxu0 %v59_v50  ;;  %2035 = vmatmul.mubr.f32.gmra.mrb[44].mxu1 %v157_v51  ;;  %v91_v50 = vld [vmem:[%s3315_s0 + $0x268] sm:$0xff]  ;;  %v189_v51 = vld [vmem:[%s3315_s0 + $0x578] sm:$0xff] }
  0x7d   :  { %1890 = vmatprep.mubr.f32.mxu0 %v60_v52  ;;  %2037 = vmatprep.mubr.f32.mxu1 %v158_v53  ;;  %v92_v52 = vld [vmem:[%s3315_s0 + $0x270] sm:$0xff]  ;;  %v190_v53 = vld [vmem:[%s3315_s0 + $0x580] sm:$0xff] }
  0x80   :  { %1891 = vmatmul.mubr.f32.gmra.mrb[46].mxu0 %v61_v54  ;;  %2038 = vmatmul.mubr.f32.gmra.mrb[46].mxu1 %v159_v55  ;;  %v93_v54 = vld [vmem:[%s3315_s0 + $0x278] sm:$0xff]  ;;  %v191_v55 = vld [vmem:[%s3315_s0 + $0x588] sm:$0xff] }
  0x81   :  { %1893 = vmatprep.mubr.f32.mxu0 %v62_v56  ;;  %2040 = vmatprep.mubr.f32.mxu1 %v160_v57  ;;  %v94_v56 = vld [vmem:[%s3315_s0 + $0x280] sm:$0xff]  ;;  %v192_v57 = vld [vmem:[%s3315_s0 + $0x590] sm:$0xff] }
  0x84   :  { %1894 = vmatmul.mubr.f32.gmra.mrb[48].mxu0 %v63_v58  ;;  %2041 = vmatmul.mubr.f32.gmra.mrb[48].mxu1 %v161_v59  ;;  %v95_v58 = vld [vmem:[%s3315_s0 + $0x288] sm:$0xff]  ;;  %v193_v59 = vld [vmem:[%s3315_s0 + $0x598] sm:$0xff] }
  0x85   :  { %1896 = vmatprep.mubr.f32.mxu0 %v64_v60  ;;  %2043 = vmatprep.mubr.f32.mxu1 %v162_v61  ;;  %v96_v60 = vld [vmem:[%s3315_s0 + $0x290] sm:$0xff]  ;;  %v194_v61 = vld [vmem:[%s3315_s0 + $0x5a0] sm:$0xff] }
  0x88   :  { %1897 = vmatmul.mubr.f32.gmra.mrb[50].mxu0 %v65_v62  ;;  %2044 = vmatmul.mubr.f32.gmra.mrb[50].mxu1 %v163_v63  ;;  %v97_v62 = vld [vmem:[%s3315_s0 + $0x298] sm:$0xff]  ;;  %v195_v63 = vld [vmem:[%s3315_s0 + $0x5a8] sm:$0xff] }
  0x89   :  { %1899 = vmatprep.mubr.f32.mxu0 %v66_v0  ;;  %2046 = vmatprep.mubr.f32.mxu1 %v164_v1  ;;  %v98_v0 = vld [vmem:[%s3315_s0 + $0x2a0] sm:$0xff]  ;;  %v196_v1 = vld [vmem:[%s3315_s0 + $0x5b0] sm:$0xff] }
  0x8c   :  { %1900 = vmatmul.mubr.f32.gmra.mrb[52].mxu0 %v67_v2  ;;  %2047 = vmatmul.mubr.f32.gmra.mrb[52].mxu1 %v165_v3  ;;  %v99_v2 = vld [vmem:[%s3315_s0 + $0x2a8] sm:$0xff]  ;;  %v197_v3 = vld [vmem:[%s3315_s0 + $0x5b8] sm:$0xff] }
  0x8d   :  { %1902 = vmatprep.mubr.f32.mxu0 %v68_v4  ;;  %2049 = vmatprep.mubr.f32.mxu1 %v166_v5  ;;  %v100_v4 = vld [vmem:[%s3315_s0 + $0x2b0] sm:$0xff]  ;;  %v198_v5 = vld [vmem:[%s3315_s0 + $0x5c0] sm:$0xff] }
  0x90   :  { %1903 = vmatmul.mubr.f32.gmra.mrb[54].mxu0 %v69_v6  ;;  %2050 = vmatmul.mubr.f32.gmra.mrb[54].mxu1 %v167_v7  ;;  %v101_v6 = vld [vmem:[%s3315_s0 + $0x2b8] sm:$0xff]  ;;  %v199_v7 = vld [vmem:[%s3315_s0 + $0x5c8] sm:$0xff] }
  0x91   :  { %1905 = vmatprep.mubr.f32.mxu0 %v70_v8  ;;  %2052 = vmatprep.mubr.f32.mxu1 %v168_v9  ;;  %v102_v8 = vld [vmem:[%s3315_s0 + $0x2c0] sm:$0xff]  ;;  %v200_v9 = vld [vmem:[%s3315_s0 + $0x5d0] sm:$0xff] }
  0x94   :  { %1906 = vmatmul.mubr.f32.gmra.mrb[56].mxu0 %v71_v10  ;;  %2053 = vmatmul.mubr.f32.gmra.mrb[56].mxu1 %v169_v11  ;;  %v103_v10 = vld [vmem:[%s3315_s0 + $0x2c8] sm:$0xff]  ;;  %v201_v11 = vld [vmem:[%s3315_s0 + $0x5d8] sm:$0xff] }
  0x95   :  { %1908 = vmatprep.mubr.f32.mxu0 %v72_v12  ;;  %2055 = vmatprep.mubr.f32.mxu1 %v170_v13  ;;  %v104_v12 = vld [vmem:[%s3315_s0 + $0x2d0] sm:$0xff]  ;;  %v202_v13 = vld [vmem:[%s3315_s0 + $0x5e0] sm:$0xff] }
  0x98   :  { %1909 = vmatmul.mubr.f32.gmra.mrb[58].mxu0 %v73_v14  ;;  %2056 = vmatmul.mubr.f32.gmra.mrb[58].mxu1 %v171_v15  ;;  %v105_v14 = vld [vmem:[%s3315_s0 + $0x2d8] sm:$0xff]  ;;  %v203_v15 = vld [vmem:[%s3315_s0 + $0x5e8] sm:$0xff] }
  0x99   :  { %1911 = vmatprep.mubr.f32.mxu0 %v74_v16  ;;  %2058 = vmatprep.mubr.f32.mxu1 %v172_v17  ;;  %v106_v16 = vld [vmem:[%s3315_s0 + $0x2e0] sm:$0xff]  ;;  %v204_v17 = vld [vmem:[%s3315_s0 + $0x5f0] sm:$0xff] }
  0x9c   :  { %1912 = vmatmul.mubr.f32.gmra.mrb[60].mxu0 %v75_v18  ;;  %2059 = vmatmul.mubr.f32.gmra.mrb[60].mxu1 %v173_v19  ;;  %v107_v18 = vld [vmem:[%s3315_s0 + $0x2e8] sm:$0xff]  ;;  %v205_v19 = vld [vmem:[%s3315_s0 + $0x5f8] sm:$0xff] }
  0x9d   :  { %1914 = vmatprep.mubr.f32.mxu0 %v76_v20  ;;  %2061 = vmatprep.mubr.f32.mxu1 %v174_v21  ;;  %v108_v20 = vld [vmem:[%s3315_s0 + $0x2f0] sm:$0xff]  ;;  %v206_v21 = vld [vmem:[%s3315_s0 + $0x600] sm:$0xff] }
  0xa0   :  { %1915 = vmatmul.mubr.f32.gmra.mrb[62].mxu0 %v77_v22  ;;  %2062 = vmatmul.mubr.f32.gmra.mrb[62].mxu1 %v175_v23  ;;  %v109_v22 = vld [vmem:[%s3315_s0 + $0x2f8] sm:$0xff]  ;;  %v207_v23 = vld [vmem:[%s3315_s0 + $0x608] sm:$0xff] }
  0xa1   :  { %1917 = vmatprep.mubr.f32.mxu0 %v78_v24  ;;  %2064 = vmatprep.mubr.f32.mxu1 %v176_v25  ;;  %v110_v24 = vld [vmem:[%s3315_s0 + $0x300] sm:$0xff]  ;;  %v208_v25 = vld [vmem:[%s3315_s0 + $0x610] sm:$0xff] }
  0xa4   :  { %1918 = vmatmul.mubr.f32.gmra.mrb[64].mxu0 %v79_v26  ;;  %2065 = vmatmul.mubr.f32.gmra.mrb[64].mxu1 %v177_v27  ;;  %v111_v26 = vld [vmem:[%s3315_s0 + $0x308] sm:$0xff]  ;;  %v209_v27 = vld [vmem:[%s3315_s0 + $0x618] sm:$0xff] }
  0xa5   :  { %1920 = vmatprep.mubr.f32.mxu0 %v80_v28  ;;  %2067 = vmatprep.mubr.f32.mxu1 %v178_v29 }
  0xa8   :  { %1921 = vmatmul.mubr.f32.gmra.mrb[66].mxu0 %v81_v30  ;;  %2068 = vmatmul.mubr.f32.gmra.mrb[66].mxu1 %v179_v31 }
  0xa9   :  { %1923 = vmatprep.mubr.f32.mxu0 %v82_v32  ;;  %2070 = vmatprep.mubr.f32.mxu1 %v180_v33 }
  0xac   :  { %1924 = vmatmul.mubr.f32.gmra.mrb[68].mxu0 %v83_v34  ;;  %2071 = vmatmul.mubr.f32.gmra.mrb[68].mxu1 %v181_v35 }
  0xad   :  { %1926 = vmatprep.mubr.f32.mxu0 %v84_v36  ;;  %2073 = vmatprep.mubr.f32.mxu1 %v182_v37 }
  0xb0   :  { %1927 = vmatmul.mubr.f32.gmra.mrb[70].mxu0 %v85_v38  ;;  %2074 = vmatmul.mubr.f32.gmra.mrb[70].mxu1 %v183_v39 }
  0xb1   :  { %1929 = vmatprep.mubr.f32.mxu0 %v86_v40  ;;  %2076 = vmatprep.mubr.f32.mxu1 %v184_v41 }
  0xb4   :  { %1930 = vmatmul.mubr.f32.gmra.mrb[72].mxu0 %v87_v42  ;;  %2077 = vmatmul.mubr.f32.gmra.mrb[72].mxu1 %v185_v43 }
  0xb5   :  { %1932 = vmatprep.mubr.f32.mxu0 %v88_v44  ;;  %2079 = vmatprep.mubr.f32.mxu1 %v186_v45 }
  0xb8   :  { %1933 = vmatmul.mubr.f32.gmra.mrb[74].mxu0 %v89_v46  ;;  %2080 = vmatmul.mubr.f32.gmra.mrb[74].mxu1 %v187_v47 }
  0xb9   :  { %1935 = vmatprep.mubr.f32.mxu0 %v90_v48  ;;  %2082 = vmatprep.mubr.f32.mxu1 %v188_v49 }
  0xbc   :  { %1936 = vmatmul.mubr.f32.gmra.mrb[76].mxu0 %v91_v50  ;;  %2083 = vmatmul.mubr.f32.gmra.mrb[76].mxu1 %v189_v51 }
  0xbd   :  { %1938 = vmatprep.mubr.f32.mxu0 %v92_v52  ;;  %2085 = vmatprep.mubr.f32.mxu1 %v190_v53 }
  0xc0   :  { %1939 = vmatmul.mubr.f32.gmra.mrb[78].mxu0 %v93_v54  ;;  %2086 = vmatmul.mubr.f32.gmra.mrb[78].mxu1 %v191_v55 }
  0xc1   :  { %1941 = vmatprep.mubr.f32.mxu0 %v94_v56  ;;  %2088 = vmatprep.mubr.f32.mxu1 %v192_v57 }
  0xc4   :  { %1942 = vmatmul.mubr.f32.gmra.mrb[80].mxu0 %v95_v58  ;;  %2089 = vmatmul.mubr.f32.gmra.mrb[80].mxu1 %v193_v59 }
  0xc5   :  { %1944 = vmatprep.mubr.f32.mxu0 %v96_v60  ;;  %2091 = vmatprep.mubr.f32.mxu1 %v194_v61 }
  0xc8   :  { %1945 = vmatmul.mubr.f32.gmra.mrb[82].mxu0 %v97_v62  ;;  %2092 = vmatmul.mubr.f32.gmra.mrb[82].mxu1 %v195_v63 }
  0xc9   :  { %1947 = vmatprep.mubr.f32.mxu0 %v98_v0  ;;  %2094 = vmatprep.mubr.f32.mxu1 %v196_v1 }
  0xcc   :  { %1948 = vmatmul.mubr.f32.gmra.mrb[84].mxu0 %v99_v2  ;;  %2095 = vmatmul.mubr.f32.gmra.mrb[84].mxu1 %v197_v3 }
  0xcd   :  { %1950 = vmatprep.mubr.f32.mxu0 %v100_v4  ;;  %2097 = vmatprep.mubr.f32.mxu1 %v198_v5 }
  0xd0   :  { %1951 = vmatmul.mubr.f32.gmra.mrb[86].mxu0 %v101_v6  ;;  %2098 = vmatmul.mubr.f32.gmra.mrb[86].mxu1 %v199_v7 }
  0xd1   :  { %1953 = vmatprep.mubr.f32.mxu0 %v102_v8  ;;  %2100 = vmatprep.mubr.f32.mxu1 %v200_v9 }
  0xd4   :  { %1954 = vmatmul.mubr.f32.gmra.mrb[88].mxu0 %v103_v10  ;;  %2101 = vmatmul.mubr.f32.gmra.mrb[88].mxu1 %v201_v11 }
  0xd5   :  { %1956 = vmatprep.mubr.f32.mxu0 %v104_v12  ;;  %2103 = vmatprep.mubr.f32.mxu1 %v202_v13 }
  0xd8   :  { %1957 = vmatmul.mubr.f32.gmra.mrb[90].mxu0 %v105_v14  ;;  %2104 = vmatmul.mubr.f32.gmra.mrb[90].mxu1 %v203_v15 }
  0xd9   :  { %1959 = vmatprep.mubr.f32.mxu0 %v106_v16  ;;  %2106 = vmatprep.mubr.f32.mxu1 %v204_v17 }
  0xdc   :  { %1960 = vmatmul.mubr.f32.gmra.mrb[92].mxu0 %v107_v18  ;;  %2107 = vmatmul.mubr.f32.gmra.mrb[92].mxu1 %v205_v19 }
  0xdd   :  { %1962 = vmatprep.mubr.f32.mxu0 %v108_v20  ;;  %2109 = vmatprep.mubr.f32.mxu1 %v206_v21 }
  0xe0   :  { %1963 = vmatmul.mubr.f32.gmra.mrb[94].mxu0 %v109_v22  ;;  %2110 = vmatmul.mubr.f32.gmra.mrb[94].mxu1 %v207_v23 }
  0xe1   :  { %1965 = vmatprep.mubr.f32.mxu0 %v110_v24  ;;  %2112 = vmatprep.mubr.f32.mxu1 %v208_v25 }
  0xe4   :  { %1966 = vmatmul.mubr.f32.gmra.mrb[96].mxu0 %v111_v26  ;;  %2113 = vmatmul.mubr.f32.gmra.mrb[96].mxu1 %v209_v27 }
  0xf7   :  { %v2819_v28 = vpop.f32.mrb[0].mxu0  ;;  %v2821_v29 = vpop.f32.mrb[0].mxu1 }
  0xf8   :  { %v2823_v30 = vpop.f32.mrb[1].mxu0  ;;  %v2825_v31 = vpop.f32.mrb[1].mxu1 }
  0xfb   :  { %v2827_v32 = vpop.f32.mrb[2].mxu0  ;;  %v2829_v33 = vpop.f32.mrb[2].mxu1 }
  0xfc   :  { %v2831_v34 = vpop.f32.mrb[3].mxu0  ;;  %v2833_v35 = vpop.f32.mrb[3].mxu1 }
  0xff   :  { %v2835_v36 = vpop.f32.mrb[4].mxu0  ;;  %v2837_v37 = vpop.f32.mrb[4].mxu1 }
 0x100   :  { %v2839_v38 = vpop.f32.mrb[5].mxu0  ;;  %v2841_v39 = vpop.f32.mrb[5].mxu1 }
 0x103   :  { %v2843_v40 = vpop.f32.mrb[6].mxu0  ;;  %v2845_v41 = vpop.f32.mrb[6].mxu1 }
 0x104   :  { %v2847_v42 = vpop.f32.mrb[7].mxu0  ;;  %v2849_v43 = vpop.f32.mrb[7].mxu1 }
 0x107   :  { %v2851_v44 = vpop.f32.mrb[8].mxu0  ;;  %v2853_v45 = vpop.f32.mrb[8].mxu1 }
 0x108   :  { %v2855_v46 = vpop.f32.mrb[9].mxu0  ;;  %v2857_v47 = vpop.f32.mrb[9].mxu1 }
 0x10b   :  { %v2859_v48 = vpop.f32.mrb[10].mxu0  ;;  %v2861_v49 = vpop.f32.mrb[10].mxu1 }
 0x10c   :  { %v2863_v50 = vpop.f32.mrb[11].mxu0  ;;  %v2865_v51 = vpop.f32.mrb[11].mxu1 }
 0x10f   :  { %v2867_v52 = vpop.f32.mrb[12].mxu0  ;;  %v2869_v53 = vpop.f32.mrb[12].mxu1 }
 0x110   :  { %v2871_v54 = vpop.f32.mrb[13].mxu0  ;;  %v2873_v55 = vpop.f32.mrb[13].mxu1 }
 0x113   :  { %v2875_v56 = vpop.f32.mrb[14].mxu0  ;;  %v2877_v57 = vpop.f32.mrb[14].mxu1 }
 0x114   :  { %v2879_v58 = vpop.f32.mrb[15].mxu0  ;;  %v2881_v59 = vpop.f32.mrb[15].mxu1 }
 0x117   :  { %v2883_v60 = vpop.f32.mrb[16].mxu0  ;;  %v2885_v61 = vpop.f32.mrb[16].mxu1 }
 0x118   :  { %v2887_v62 = vpop.f32.mrb[17].mxu0  ;;  %v2889_v63 = vpop.f32.mrb[17].mxu1 }
 0x11b   :  { %v2891_v0 = vpop.f32.mrb[18].mxu0  ;;  %v2893_v1 = vpop.f32.mrb[18].mxu1 }
 0x11c   :  { %v2895_v2 = vpop.f32.mrb[19].mxu0  ;;  %v2897_v3 = vpop.f32.mrb[19].mxu1 }
 0x11f   :  { %v2899_v4 = vpop.f32.mrb[20].mxu0  ;;  %v2901_v5 = vpop.f32.mrb[20].mxu1 }
 0x120   :  { %v2903_v6 = vpop.f32.mrb[21].mxu0  ;;  %v2905_v7 = vpop.f32.mrb[21].mxu1 }
 0x123   :  { %v2907_v8 = vpop.f32.mrb[22].mxu0  ;;  %v2909_v9 = vpop.f32.mrb[22].mxu1 }
 0x124   :  { %3318 = vst [vmem:[#allocation2_spill] sm:$0xff] %v2907_v8  ;;  %3319 = vst [vmem:[#allocation3_spill] sm:$0xff] %v2909_v9  ;;  %v2911_v10 = vpop.f32.mrb[23].mxu0  ;;  %v2913_v11 = vpop.f32.mrb[23].mxu1 }
 0x127   :  { %v2915_v12 = vpop.f32.mrb[24].mxu0  ;;  %v2917_v13 = vpop.f32.mrb[24].mxu1 }
 0x128   :  { %3320 = vst [vmem:[#allocation4_spill] sm:$0xff] %v2915_v12  ;;  %3321 = vst [vmem:[#allocation5_spill] sm:$0xff] %v2917_v13  ;;  %v2919_v14 = vpop.f32.mrb[25].mxu0  ;;  %v2921_v15 = vpop.f32.mrb[25].mxu1 }
 0x12b   :  { %v2923_v16 = vpop.f32.mrb[26].mxu0  ;;  %v2925_v17 = vpop.f32.mrb[26].mxu1 }
 0x12c   :  { %3322 = vst [vmem:[#allocation6_spill] sm:$0xff] %v2923_v16  ;;  %3323 = vst [vmem:[#allocation7_spill] sm:$0xff] %v2925_v17  ;;  %v2927_v18 = vpop.f32.mrb[27].mxu0  ;;  %v2929_v19 = vpop.f32.mrb[27].mxu1 }
 0x12d   :  { %3324 = vst [vmem:[#allocation8_spill] sm:$0xff] %v2927_v18  ;;  %3325 = vst [vmem:[#allocation9_spill] sm:$0xff] %v2929_v19 }
 0x12f   :  { %v2931_v20 = vpop.f32.mrb[28].mxu0  ;;  %v2933_v21 = vpop.f32.mrb[28].mxu1 }
 0x130   :  { %3326 = vst [vmem:[#allocation10_spill] sm:$0xff] %v2931_v20  ;;  %3327 = vst [vmem:[#allocation11_spill] sm:$0xff] %v2933_v21  ;;  %v2935_v22 = vpop.f32.mrb[29].mxu0  ;;  %v2937_v23 = vpop.f32.mrb[29].mxu1 }
 0x131   :  { %3328 = vst [vmem:[#allocation12_spill] sm:$0xff] %v2935_v22  ;;  %3329 = vst [vmem:[#allocation13_spill] sm:$0xff] %v2937_v23 }
 0x133   :  { %v2939_v24 = vpop.f32.mrb[30].mxu0  ;;  %v2941_v25 = vpop.f32.mrb[30].mxu1 }
 0x134   :  { %3330 = vst [vmem:[#allocation14_spill] sm:$0xff] %v2939_v24  ;;  %3331 = vst [vmem:[#allocation15_spill] sm:$0xff] %v2941_v25  ;;  %v2943_v26 = vpop.f32.mrb[31].mxu0  ;;  %v2945_v27 = vpop.f32.mrb[31].mxu1 }
 0x135   :  { %3332 = vst [vmem:[#allocation16_spill] sm:$0xff] %v2943_v26  ;;  %3333 = vst [vmem:[#allocation17_spill] sm:$0xff] %v2945_v27 }
 0x137   :  { %v2947_v17 = vpop.f32.mrb[32].mxu0  ;;  %v2949_v16 = vpop.f32.mrb[32].mxu1 }
 0x138   :  { %3334 = vst [vmem:[#allocation18_spill] sm:$0xff] %v2947_v17  ;;  %3335 = vst [vmem:[#allocation19_spill] sm:$0xff] %v2949_v16  ;;  %v2951_v13 = vpop.f32.mrb[33].mxu0  ;;  %v2953_v20 = vpop.f32.mrb[33].mxu1 }
 0x139   :  { %3336 = vst [vmem:[#allocation20_spill] sm:$0xff] %v2951_v13  ;;  %3337 = vst [vmem:[#allocation21_spill] sm:$0xff] %v2953_v20 }
 0x13b   :  { %v2955_v21 = vpop.f32.mrb[34].mxu0  ;;  %v2957_v22 = vpop.f32.mrb[34].mxu1 }
 0x13c   :  { %3338 = vst [vmem:[#allocation22_spill] sm:$0xff] %v2955_v21  ;;  %3339 = vst [vmem:[#allocation23_spill] sm:$0xff] %v2957_v22  ;;  %v2959_v23 = vpop.f32.mrb[35].mxu0  ;;  %v2961_v24 = vpop.f32.mrb[35].mxu1 }
 0x13d   :  { %3340 = vst [vmem:[#allocation24_spill] sm:$0xff] %v2959_v23  ;;  %3341 = vst [vmem:[#allocation25_spill] sm:$0xff] %v2961_v24 }
 0x13f   :  { %v2963_v25 = vpop.f32.mrb[36].mxu0  ;;  %v2965_v26 = vpop.f32.mrb[36].mxu1 }
 0x140   :  { %3342 = vst [vmem:[#allocation26_spill] sm:$0xff] %v2963_v25  ;;  %3343 = vst [vmem:[#allocation27_spill] sm:$0xff] %v2965_v26  ;;  %v2967_v27 = vpop.f32.mrb[37].mxu0  ;;  %v2969_v17 = vpop.f32.mrb[37].mxu1 }
 0x141   :  { %3344 = vst [vmem:[#allocation28_spill] sm:$0xff] %v2967_v27  ;;  %3345 = vst [vmem:[#allocation29_spill] sm:$0xff] %v2969_v17 }
 0x143   :  { %v2971_v16 = vpop.f32.mrb[38].mxu0  ;;  %v2973_v13 = vpop.f32.mrb[38].mxu1 }
 0x144   :  { %3346 = vst [vmem:[#allocation30_spill] sm:$0xff] %v2971_v16  ;;  %3347 = vst [vmem:[#allocation31_spill] sm:$0xff] %v2973_v13  ;;  %v2975_v20 = vpop.f32.mrb[39].mxu0  ;;  %v2977_v21 = vpop.f32.mrb[39].mxu1 }
 0x145   :  { %3348 = vst [vmem:[#allocation32_spill] sm:$0xff] %v2975_v20  ;;  %3349 = vst [vmem:[#allocation33_spill] sm:$0xff] %v2977_v21 }
 0x147   :  { %v2979_v22 = vpop.f32.mrb[40].mxu0  ;;  %v2981_v23 = vpop.f32.mrb[40].mxu1 }
 0x148   :  { %3350 = vst [vmem:[#allocation34_spill] sm:$0xff] %v2979_v22  ;;  %3351 = vst [vmem:[#allocation35_spill] sm:$0xff] %v2981_v23  ;;  %v2983_v24 = vpop.f32.mrb[41].mxu0  ;;  %v2985_v25 = vpop.f32.mrb[41].mxu1 }
 0x149   :  { %3352 = vst [vmem:[#allocation36_spill] sm:$0xff] %v2983_v24  ;;  %3353 = vst [vmem:[#allocation37_spill] sm:$0xff] %v2985_v25 }
 0x14b   :  { %v2987_v26 = vpop.f32.mrb[42].mxu0  ;;  %v2989_v27 = vpop.f32.mrb[42].mxu1 }
 0x14c   :  { %3354 = vst [vmem:[#allocation38_spill] sm:$0xff] %v2987_v26  ;;  %3355 = vst [vmem:[#allocation39_spill] sm:$0xff] %v2989_v27  ;;  %v2991_v17 = vpop.f32.mrb[43].mxu0  ;;  %v2993_v16 = vpop.f32.mrb[43].mxu1 }
 0x14d   :  { %3356 = vst [vmem:[#allocation40_spill] sm:$0xff] %v2991_v17  ;;  %3357 = vst [vmem:[#allocation41_spill] sm:$0xff] %v2993_v16 }
 0x14f   :  { %v2995_v13 = vpop.f32.mrb[44].mxu0  ;;  %v2997_v20 = vpop.f32.mrb[44].mxu1 }
 0x150   :  { %3358 = vst [vmem:[#allocation42_spill] sm:$0xff] %v2995_v13  ;;  %3359 = vst [vmem:[#allocation43_spill] sm:$0xff] %v2997_v20  ;;  %v2999_v21 = vpop.f32.mrb[45].mxu0  ;;  %v3001_v22 = vpop.f32.mrb[45].mxu1 }
 0x151   :  { %3360 = vst [vmem:[#allocation44_spill] sm:$0xff] %v2999_v21  ;;  %3361 = vst [vmem:[#allocation45_spill] sm:$0xff] %v3001_v22 }
 0x153   :  { %v3003_v23 = vpop.f32.mrb[46].mxu0  ;;  %v3005_v24 = vpop.f32.mrb[46].mxu1 }
 0x154   :  { %3362 = vst [vmem:[#allocation46_spill] sm:$0xff] %v3003_v23  ;;  %3363 = vst [vmem:[#allocation47_spill] sm:$0xff] %v3005_v24  ;;  %v3007_v25 = vpop.f32.mrb[47].mxu0  ;;  %v3009_v26 = vpop.f32.mrb[47].mxu1  ;;  %v3020_v23 = vld [vmem:[%s3316_s2] ss:$0 sm:$0xff] }
 0x155   :  { %3364 = vst [vmem:[#allocation48_spill] sm:$0xff] %v3007_v25  ;;  %3365 = vst [vmem:[#allocation49_spill] sm:$0xff] %v3009_v26 }
 0x157   :  { %v1895_v27 = vpop.f32.mrb[48].mxu0  ;;  %v2042_v17 = vpop.f32.mrb[48].mxu1 }
 0x158   :  { %v1271_v16 = vmax.f32 %v2823_v30, %v1895_v27  ;;  %v1320_v13 = vmax.f32 %v2825_v31, %v2042_v17  ;;  %v3013_v12 = vpop.f32.mrb[49].mxu0  ;;  %v3015_v20 = vpop.f32.mrb[49].mxu1 }
 0x159   :  { %3366 = vst [vmem:[#allocation50_spill] sm:$0xff] %v3013_v12  ;;  %3367 = vst [vmem:[#allocation51_spill] sm:$0xff] %v3015_v20 }
 0x15a   :  { %v1369_v24 = vmax.f32 %v1271_v16, %v1320_v13 }
 0x15b   :  { %v1898_v22 = vpop.f32.mrb[50].mxu0  ;;  %v2045_v25 = vpop.f32.mrb[50].mxu1 }
 0x15c   :  { %v1425_v26 = vadd.f32 %v3020_v23, %v1369_v24  ;;  %v1273_v21 = vmax.f32 %v2831_v34, %v1898_v22  ;;  %v1322_v30 = vmax.f32 %v2833_v35, %v2045_v25  ;;  %v542_v27 = vpop.f32.mrb[51].mxu0  ;;  %v1032_v31 = vpop.f32.mrb[51].mxu1 }
 0x15d   :  { %v1272_v17 = vmax.f32 %v2819_v28, %v542_v27  ;;  %v1321_v20 = vmax.f32 %v2821_v29, %v1032_v31 }
 0x15e   :  { %v1474_v12 = vmax.f32 %v1425_v26, 0.0  ;;  %v1371_v19 = vmax.f32 %v1273_v21, %v1322_v30 }
 0x15f   :  { %v1370_v18 = vmax.f32 %v1272_v17, %v1321_v20  ;;  %v1901_v9 = vpop.f32.mrb[52].mxu0  ;;  %v2048_v8 = vpop.f32.mrb[52].mxu1 }
 0x160   :  { %1523 = vst [vmem:[%s3317_s3] sm:$0xff] %v1474_v12  ;;  %v1427_v13 = vadd.f32 %v3020_v23, %v1371_v19  ;;  %v1275_v34 = vmax.f32 %v2839_v38, %v1901_v9  ;;  %v1324_v35 = vmax.f32 %v2841_v39, %v2048_v8  ;;  %v552_v16 = vpop.f32.mrb[53].mxu0  ;;  %v1042_v22 = vpop.f32.mrb[53].mxu1 }
 0x161   :  { %v1426_v28 = vadd.f32 %v3020_v23, %v1370_v18  ;;  %v1274_v29 = vmax.f32 %v2827_v32, %v552_v16  ;;  %v1323_v20 = vmax.f32 %v2829_v33, %v1042_v22 }
 0x162   :  { %v1476_v21 = vmax.f32 %v1427_v13, 0.0  ;;  %v1373_v24 = vmax.f32 %v1275_v34, %v1324_v35 }
 0x163   :  { %v1475_v25 = vmax.f32 %v1426_v28, 0.0  ;;  %v1372_v26 = vmax.f32 %v1274_v29, %v1323_v20  ;;  %v1904_v30 = vpop.f32.mrb[54].mxu0  ;;  %v2051_v12 = vpop.f32.mrb[54].mxu1 }
 0x164   :  { %1525 = vst [vmem:[%s3317_s3 + $0x10] sm:$0xff] %v1476_v21  ;;  %v1429_v38 = vadd.f32 %v3020_v23, %v1373_v24  ;;  %v1277_v39 = vmax.f32 %v2847_v42, %v1904_v30  ;;  %v1326_v8 = vmax.f32 %v2849_v43, %v2051_v12  ;;  %v562_v9 = vpop.f32.mrb[55].mxu0  ;;  %v1052_v32 = vpop.f32.mrb[55].mxu1 }
 0x165   :  { %1524 = vst [vmem:[%s3317_s3 + $0x8] sm:$0xff] %v1475_v25  ;;  %v1428_v33 = vadd.f32 %v3020_v23, %v1372_v26  ;;  %v1276_v18 = vmax.f32 %v2835_v36, %v562_v9  ;;  %v1325_v19 = vmax.f32 %v2837_v37, %v1052_v32 }
 0x166   :  { %v1478_v27 = vmax.f32 %v1429_v38, 0.0  ;;  %v1375_v31 = vmax.f32 %v1277_v39, %v1326_v8 }
 0x167   :  { %v1477_v17 = vmax.f32 %v1428_v33, 0.0  ;;  %v1374_v13 = vmax.f32 %v1276_v18, %v1325_v19  ;;  %v1907_v34 = vpop.f32.mrb[56].mxu0  ;;  %v2054_v42 = vpop.f32.mrb[56].mxu1 }
 0x168   :  { %1527 = vst [vmem:[%s3317_s3 + $0x20] sm:$0xff] %v1478_v27  ;;  %v1431_v43 = vadd.f32 %v3020_v23, %v1375_v31  ;;  %v1279_v35 = vmax.f32 %v2855_v46, %v1907_v34  ;;  %v1328_v16 = vmax.f32 %v2857_v47, %v2054_v42  ;;  %v572_v22 = vpop.f32.mrb[57].mxu0  ;;  %v1062_v36 = vpop.f32.mrb[57].mxu1 }
 0x169   :  { %1526 = vst [vmem:[%s3317_s3 + $0x18] sm:$0xff] %v1477_v17  ;;  %v1430_v37 = vadd.f32 %v3020_v23, %v1374_v13  ;;  %v1278_v28 = vmax.f32 %v2843_v40, %v572_v22  ;;  %v1327_v29 = vmax.f32 %v2845_v41, %v1062_v36 }
 0x16a   :  { %v1480_v20 = vmax.f32 %v1431_v43, 0.0  ;;  %v1377_v21 = vmax.f32 %v1279_v35, %v1328_v16 }
 0x16b   :  { %v1479_v24 = vmax.f32 %v1430_v37, 0.0  ;;  %v1376_v25 = vmax.f32 %v1278_v28, %v1327_v29  ;;  %v1910_v26 = vpop.f32.mrb[58].mxu0  ;;  %v2057_v46 = vpop.f32.mrb[58].mxu1 }
 0x16c   :  { %1529 = vst [vmem:[%s3317_s3 + $0x30] sm:$0xff] %v1480_v20  ;;  %v1433_v47 = vadd.f32 %v3020_v23, %v1377_v21  ;;  %v1281_v30 = vmax.f32 %v2863_v50, %v1910_v26  ;;  %v1330_v12 = vmax.f32 %v2865_v51, %v2057_v46  ;;  %v582_v38 = vpop.f32.mrb[59].mxu0  ;;  %v1072_v40 = vpop.f32.mrb[59].mxu1 }
 0x16d   :  { %1528 = vst [vmem:[%s3317_s3 + $0x28] sm:$0xff] %v1479_v24  ;;  %v1432_v41 = vadd.f32 %v3020_v23, %v1376_v25  ;;  %v1280_v39 = vmax.f32 %v2851_v44, %v582_v38  ;;  %v1329_v8 = vmax.f32 %v2853_v45, %v1072_v40 }
 0x16e   :  { %v1482_v9 = vmax.f32 %v1433_v47, 0.0  ;;  %v1379_v32 = vmax.f32 %v1281_v30, %v1330_v12 }
 0x16f   :  { %v1481_v33 = vmax.f32 %v1432_v41, 0.0  ;;  %v1378_v18 = vmax.f32 %v1280_v39, %v1329_v8  ;;  %v1913_v19 = vpop.f32.mrb[60].mxu0  ;;  %v2060_v50 = vpop.f32.mrb[60].mxu1 }
 0x170   :  { %1531 = vst [vmem:[%s3317_s3 + $0x40] sm:$0xff] %v1482_v9  ;;  %v1435_v51 = vadd.f32 %v3020_v23, %v1379_v32  ;;  %v1283_v27 = vmax.f32 %v2871_v54, %v1913_v19  ;;  %v1332_v31 = vmax.f32 %v2873_v55, %v2060_v50  ;;  %v592_v17 = vpop.f32.mrb[61].mxu0  ;;  %v1082_v44 = vpop.f32.mrb[61].mxu1 }
 0x171   :  { %1530 = vst [vmem:[%s3317_s3 + $0x38] sm:$0xff] %v1481_v33  ;;  %v1434_v45 = vadd.f32 %v3020_v23, %v1378_v18  ;;  %v1282_v13 = vmax.f32 %v2859_v48, %v592_v17  ;;  %v1331_v34 = vmax.f32 %v2861_v49, %v1082_v44 }
 0x172   :  { %v1484_v42 = vmax.f32 %v1435_v51, 0.0  ;;  %v1381_v43 = vmax.f32 %v1283_v27, %v1332_v31 }
 0x173   :  { %v1483_v35 = vmax.f32 %v1434_v45, 0.0  ;;  %v1380_v16 = vmax.f32 %v1282_v13, %v1331_v34  ;;  %v1916_v22 = vpop.f32.mrb[62].mxu0  ;;  %v2063_v54 = vpop.f32.mrb[62].mxu1 }
 0x174   :  { %1533 = vst [vmem:[%s3317_s3 + $0x50] sm:$0xff] %v1484_v42  ;;  %v1437_v55 = vadd.f32 %v3020_v23, %v1381_v43  ;;  %v1285_v36 = vmax.f32 %v2879_v58, %v1916_v22  ;;  %v1334_v37 = vmax.f32 %v2881_v59, %v2063_v54  ;;  %v602_v28 = vpop.f32.mrb[63].mxu0  ;;  %v1092_v48 = vpop.f32.mrb[63].mxu1 }
 0x175   :  { %1532 = vst [vmem:[%s3317_s3 + $0x48] sm:$0xff] %v1483_v35  ;;  %v1436_v49 = vadd.f32 %v3020_v23, %v1380_v16  ;;  %v1284_v29 = vmax.f32 %v2867_v52, %v602_v28  ;;  %v1333_v20 = vmax.f32 %v2869_v53, %v1092_v48 }
 0x176   :  { %v1486_v21 = vmax.f32 %v1437_v55, 0.0  ;;  %v1383_v24 = vmax.f32 %v1285_v36, %v1334_v37 }
 0x177   :  { %v1485_v25 = vmax.f32 %v1436_v49, 0.0  ;;  %v1382_v26 = vmax.f32 %v1284_v29, %v1333_v20  ;;  %v1919_v46 = vpop.f32.mrb[64].mxu0  ;;  %v2066_v58 = vpop.f32.mrb[64].mxu1 }
 0x178   :  { %1535 = vst [vmem:[%s3317_s3 + $0x60] sm:$0xff] %v1486_v21  ;;  %v1439_v59 = vadd.f32 %v3020_v23, %v1383_v24  ;;  %v1287_v47 = vmax.f32 %v2887_v62, %v1919_v46  ;;  %v1336_v30 = vmax.f32 %v2889_v63, %v2066_v58  ;;  %v612_v12 = vpop.f32.mrb[65].mxu0  ;;  %v1102_v52 = vpop.f32.mrb[65].mxu1 }
 0x179   :  { %1534 = vst [vmem:[%s3317_s3 + $0x58] sm:$0xff] %v1485_v25  ;;  %v1438_v53 = vadd.f32 %v3020_v23, %v1382_v26  ;;  %v1286_v38 = vmax.f32 %v2875_v56, %v612_v12  ;;  %v1335_v40 = vmax.f32 %v2877_v57, %v1102_v52  ;;  %v3369_v12 = vld [vmem:[#allocation3_spill] sm:$0xff] }
 0x17a   :  { %v1488_v41 = vmax.f32 %v1439_v59, 0.0  ;;  %v1385_v39 = vmax.f32 %v1287_v47, %v1336_v30  ;;  %v3368_v47 = vld [vmem:[#allocation2_spill] sm:$0xff] }
 0x17b   :  { %v1487_v8 = vmax.f32 %v1438_v53, 0.0  ;;  %v1384_v9 = vmax.f32 %v1286_v38, %v1335_v40  ;;  %v1922_v32 = vpop.f32.mrb[66].mxu0  ;;  %v2069_v62 = vpop.f32.mrb[66].mxu1 }
 0x17c   :  { %1537 = vst [vmem:[%s3317_s3 + $0x70] sm:$0xff] %v1488_v41  ;;  %v1441_v63 = vadd.f32 %v3020_v23, %v1385_v39  ;;  %v1289_v33 = vmax.f32 %v2895_v2, %v1922_v32  ;;  %v1338_v18 = vmax.f32 %v2897_v3, %v2069_v62  ;;  %v622_v19 = vpop.f32.mrb[67].mxu0  ;;  %v1112_v56 = vpop.f32.mrb[67].mxu1  ;;  %v3371_v32 = vld [vmem:[#allocation9_spill] sm:$0xff] }
 0x17d   :  { %1536 = vst [vmem:[%s3317_s3 + $0x68] sm:$0xff] %v1487_v8  ;;  %v1440_v57 = vadd.f32 %v3020_v23, %v1384_v9  ;;  %v1288_v50 = vmax.f32 %v2883_v60, %v622_v19  ;;  %v1337_v51 = vmax.f32 %v2885_v61, %v1112_v56  ;;  %v3370_v8 = vld [vmem:[#allocation8_spill] sm:$0xff] }
 0x17e   :  { %v1490_v27 = vmax.f32 %v1441_v63, 0.0  ;;  %v1387_v31 = vmax.f32 %v1289_v33, %v1338_v18  ;;  %v3372_v19 = vld [vmem:[#allocation4_spill] sm:$0xff] }
 0x17f   :  { %v1489_v17 = vmax.f32 %v1440_v57, 0.0  ;;  %v1386_v44 = vmax.f32 %v1288_v50, %v1337_v51  ;;  %v1925_v45 = vpop.f32.mrb[68].mxu0  ;;  %v2072_v2 = vpop.f32.mrb[68].mxu1  ;;  %v3373_v57 = vld [vmem:[#allocation5_spill] sm:$0xff] }
 0x180   :  { %1539 = vst [vmem:[%s3317_s3 + $0x80] sm:$0xff] %v1490_v27  ;;  %v1443_v3 = vadd.f32 %v3020_v23, %v1387_v31  ;;  %v1291_v13 = vmax.f32 %v2903_v6, %v1925_v45  ;;  %v1340_v34 = vmax.f32 %v2905_v7, %v2072_v2  ;;  %v632_v42 = vpop.f32.mrb[69].mxu0  ;;  %v1122_v60 = vpop.f32.mrb[69].mxu1 }
 0x181   :  { %1538 = vst [vmem:[%s3317_s3 + $0x78] sm:$0xff] %v1489_v17  ;;  %v1442_v61 = vadd.f32 %v3020_v23, %v1386_v44  ;;  %v1290_v43 = vmax.f32 %v2891_v0, %v632_v42  ;;  %v1339_v35 = vmax.f32 %v2893_v1, %v1122_v60 }
 0x182   :  { %v1492_v16 = vmax.f32 %v1443_v3, 0.0  ;;  %v1389_v22 = vmax.f32 %v1291_v13, %v1340_v34  ;;  %v3374_v3 = vld [vmem:[#allocation12_spill] sm:$0xff]  ;;  %v3375_v34 = vld [vmem:[#allocation13_spill] sm:$0xff] }
 0x183   :  { %v1491_v54 = vmax.f32 %v1442_v61, 0.0  ;;  %v1388_v55 = vmax.f32 %v1290_v43, %v1339_v35  ;;  %v1928_v36 = vpop.f32.mrb[70].mxu0  ;;  %v2075_v6 = vpop.f32.mrb[70].mxu1  ;;  %v3376_v35 = vld [vmem:[#allocation6_spill] sm:$0xff] }
 0x184   :  { %1541 = vst [vmem:[%s3317_s3 + $0x90] sm:$0xff] %v1492_v16  ;;  %v1445_v7 = vadd.f32 %v3020_v23, %v1389_v22  ;;  %v1293_v37 = vmax.f32 %v2911_v10, %v1928_v36  ;;  %v1342_v28 = vmax.f32 %v2913_v11, %v2075_v6  ;;  %v642_v48 = vpop.f32.mrb[71].mxu0  ;;  %v1132_v0 = vpop.f32.mrb[71].mxu1  ;;  %v3377_v22 = vld [vmem:[#allocation7_spill] sm:$0xff] }
 0x185   :  { %1540 = vst [vmem:[%s3317_s3 + $0x88] sm:$0xff] %v1491_v54  ;;  %v1444_v1 = vadd.f32 %v3020_v23, %v1388_v55  ;;  %v1292_v49 = vmax.f32 %v2899_v4, %v642_v48  ;;  %v1341_v29 = vmax.f32 %v2901_v5, %v1132_v0  ;;  %v3378_v0 = vld [vmem:[#allocation16_spill] sm:$0xff] }
 0x186   :  { %v1494_v20 = vmax.f32 %v1445_v7, 0.0  ;;  %v1391_v21 = vmax.f32 %v1293_v37, %v1342_v28 }
 0x187   :  { %v1493_v24 = vmax.f32 %v1444_v1, 0.0  ;;  %v1390_v25 = vmax.f32 %v1292_v49, %v1341_v29  ;;  %v1931_v26 = vpop.f32.mrb[72].mxu0  ;;  %v2078_v10 = vpop.f32.mrb[72].mxu1  ;;  %v3379_v49 = vld [vmem:[#allocation17_spill] sm:$0xff] }
 0x188   :  { %1543 = vst [vmem:[%s3317_s3 + $0xa0] sm:$0xff] %v1494_v20  ;;  %v1447_v11 = vadd.f32 %v3020_v23, %v1391_v21  ;;  %v1295_v46 = vmax.f32 %v2919_v14, %v1931_v26  ;;  %v1344_v58 = vmax.f32 %v2921_v15, %v2078_v10  ;;  %v652_v59 = vpop.f32.mrb[73].mxu0  ;;  %v1142_v4 = vpop.f32.mrb[73].mxu1  ;;  %v3381_v10 = vld [vmem:[#allocation11_spill] sm:$0xff] }
 0x189   :  { %1542 = vst [vmem:[%s3317_s3 + $0x98] sm:$0xff] %v1493_v24  ;;  %v1446_v5 = vadd.f32 %v3020_v23, %v1390_v25  ;;  %v1294_v30 = vmax.f32 %v3368_v47, %v652_v59  ;;  %v1343_v52 = vmax.f32 %v3369_v12, %v1142_v4  ;;  %v3380_v25 = vld [vmem:[#allocation10_spill] sm:$0xff]  ;;  %v3382_v12 = vld [vmem:[#allocation20_spill] sm:$0xff] }
 0x18a   :  { %v1496_v53 = vmax.f32 %v1447_v11, 0.0  ;;  %v1393_v38 = vmax.f32 %v1295_v46, %v1344_v58 }
 0x18b   :  { %v1495_v40 = vmax.f32 %v1446_v5, 0.0  ;;  %v1392_v41 = vmax.f32 %v1294_v30, %v1343_v52  ;;  %v1934_v39 = vpop.f32.mrb[74].mxu0  ;;  %v2081_v14 = vpop.f32.mrb[74].mxu1 }
 0x18c   :  { %1545 = vst [vmem:[%s3317_s3 + $0xb0] sm:$0xff] %v1496_v53  ;;  %v1449_v15 = vadd.f32 %v3020_v23, %v1393_v38  ;;  %v1297_v9 = vmax.f32 %v3370_v8, %v1934_v39  ;;  %v1346_v62 = vmax.f32 %v3371_v32, %v2081_v14  ;;  %v662_v63 = vpop.f32.mrb[75].mxu0  ;;  %v1152_v33 = vpop.f32.mrb[75].mxu1  ;;  %v3383_v53 = vld [vmem:[#allocation21_spill] sm:$0xff]  ;;  %v3384_v14 = vld [vmem:[#allocation14_spill] sm:$0xff]  ;;  %v3385_v8 = vld [vmem:[#allocation15_spill] sm:$0xff] }
 0x18d   :  { %1544 = vst [vmem:[%s3317_s3 + $0xa8] sm:$0xff] %v1495_v40  ;;  %v1448_v18 = vadd.f32 %v3020_v23, %v1392_v41  ;;  %v1296_v56 = vmax.f32 %v3372_v19, %v662_v63  ;;  %v1345_v50 = vmax.f32 %v3373_v57, %v1152_v33  ;;  %v3386_v57 = vld [vmem:[#allocation24_spill] sm:$0xff] }
 0x18e   :  { %v1498_v51 = vmax.f32 %v1449_v15, 0.0  ;;  %v1395_v27 = vmax.f32 %v1297_v9, %v1346_v62 }
 0x18f   :  { %v1497_v31 = vmax.f32 %v1448_v18, 0.0  ;;  %v1394_v17 = vmax.f32 %v1296_v56, %v1345_v50  ;;  %v1937_v44 = vpop.f32.mrb[76].mxu0  ;;  %v2084_v45 = vpop.f32.mrb[76].mxu1 }
 0x190   :  { %1547 = vst [vmem:[%s3317_s3 + $0xc0] sm:$0xff] %v1498_v51  ;;  %v1451_v2 = vadd.f32 %v3020_v23, %v1395_v27  ;;  %v1299_v13 = vmax.f32 %v3374_v3, %v1937_v44  ;;  %v1348_v42 = vmax.f32 %v3375_v34, %v2084_v45  ;;  %v672_v60 = vpop.f32.mrb[77].mxu0  ;;  %v1162_v61 = vpop.f32.mrb[77].mxu1  ;;  %v3387_v51 = vld [vmem:[#allocation25_spill] sm:$0xff]  ;;  %v3388_v45 = vld [vmem:[#allocation18_spill] sm:$0xff]  ;;  %v3389_v3 = vld [vmem:[#allocation19_spill] sm:$0xff] }
 0x191   :  { %1546 = vst [vmem:[%s3317_s3 + $0xb8] sm:$0xff] %v1497_v31  ;;  %v1450_v43 = vadd.f32 %v3020_v23, %v1394_v17  ;;  %v1298_v16 = vmax.f32 %v3376_v35, %v672_v60  ;;  %v1347_v54 = vmax.f32 %v3377_v22, %v1162_v61  ;;  %v3390_v22 = vld [vmem:[#allocation28_spill] sm:$0xff] }
 0x192   :  { %v1500_v55 = vmax.f32 %v1451_v2, 0.0  ;;  %v1397_v36 = vmax.f32 %v1299_v13, %v1348_v42 }
 0x193   :  { %v1499_v6 = vmax.f32 %v1450_v43, 0.0  ;;  %v1396_v7 = vmax.f32 %v1298_v16, %v1347_v54  ;;  %v1940_v37 = vpop.f32.mrb[78].mxu0  ;;  %v2087_v28 = vpop.f32.mrb[78].mxu1 }
 0x194   :  { %1549 = vst [vmem:[%s3317_s3 + $0xd0] sm:$0xff] %v1500_v55  ;;  %v1453_v48 = vadd.f32 %v3020_v23, %v1397_v36  ;;  %v1301_v1 = vmax.f32 %v3378_v0, %v1940_v37  ;;  %v1350_v29 = vmax.f32 %v3379_v49, %v2087_v28  ;;  %v682_v20 = vpop.f32.mrb[79].mxu0  ;;  %v1172_v21 = vpop.f32.mrb[79].mxu1  ;;  %v3391_v55 = vld [vmem:[#allocation29_spill] sm:$0xff]  ;;  %v3392_v28 = vld [vmem:[#allocation22_spill] sm:$0xff]  ;;  %v3393_v0 = vld [vmem:[#allocation23_spill] sm:$0xff] }
 0x195   :  { %1548 = vst [vmem:[%s3317_s3 + $0xc8] sm:$0xff] %v1499_v6  ;;  %v1452_v24 = vadd.f32 %v3020_v23, %v1396_v7  ;;  %v1300_v26 = vmax.f32 %v3380_v25, %v682_v20  ;;  %v1349_v11 = vmax.f32 %v3381_v10, %v1172_v21  ;;  %v3394_v10 = vld [vmem:[#allocation32_spill] sm:$0xff] }
 0x196   :  { %v1502_v46 = vmax.f32 %v1453_v48, 0.0  ;;  %v1399_v58 = vmax.f32 %v1301_v1, %v1350_v29 }
 0x197   :  { %v1501_v59 = vmax.f32 %v1452_v24, 0.0  ;;  %v1398_v4 = vmax.f32 %v1300_v26, %v1349_v11  ;;  %v1943_v5 = vpop.f32.mrb[80].mxu0  ;;  %v2090_v47 = vpop.f32.mrb[80].mxu1 }
 0x198   :  { %1551 = vst [vmem:[%s3317_s3 + $0xe0] sm:$0xff] %v1502_v46  ;;  %v1455_v30 = vadd.f32 %v3020_v23, %v1399_v58  ;;  %v1303_v52 = vmax.f32 %v3382_v12, %v1943_v5  ;;  %v1352_v38 = vmax.f32 %v3383_v53, %v2090_v47  ;;  %v692_v40 = vpop.f32.mrb[81].mxu0  ;;  %v1182_v41 = vpop.f32.mrb[81].mxu1  ;;  %v3395_v46 = vld [vmem:[#allocation33_spill] sm:$0xff]  ;;  %v3396_v47 = vld [vmem:[#allocation26_spill] sm:$0xff]  ;;  %v3397_v12 = vld [vmem:[#allocation27_spill] sm:$0xff] }
 0x199   :  { %1550 = vst [vmem:[%s3317_s3 + $0xd8] sm:$0xff] %v1501_v59  ;;  %v1454_v39 = vadd.f32 %v3020_v23, %v1398_v4  ;;  %v1302_v15 = vmax.f32 %v3384_v14, %v692_v40  ;;  %v1351_v9 = vmax.f32 %v3385_v8, %v1182_v41  ;;  %v3398_v8 = vld [vmem:[#allocation36_spill] sm:$0xff] }
 0x19a   :  { %v1504_v32 = vmax.f32 %v1455_v30, 0.0  ;;  %v1401_v62 = vmax.f32 %v1303_v52, %v1352_v38 }
 0x19b   :  { %v1503_v63 = vmax.f32 %v1454_v39, 0.0  ;;  %v1400_v33 = vmax.f32 %v1302_v15, %v1351_v9  ;;  %v1946_v18 = vpop.f32.mrb[82].mxu0  ;;  %v2093_v19 = vpop.f32.mrb[82].mxu1 }
 0x19c   :  { %1553 = vst [vmem:[%s3317_s3 + $0xf0] sm:$0xff] %v1504_v32  ;;  %v1457_v56 = vadd.f32 %v3020_v23, %v1401_v62  ;;  %v1305_v50 = vmax.f32 %v3386_v57, %v1946_v18  ;;  %v1354_v27 = vmax.f32 %v3387_v51, %v2093_v19  ;;  %v702_v31 = vpop.f32.mrb[83].mxu0  ;;  %v1192_v17 = vpop.f32.mrb[83].mxu1  ;;  %v3399_v32 = vld [vmem:[#allocation37_spill] sm:$0xff]  ;;  %v3400_v19 = vld [vmem:[#allocation30_spill] sm:$0xff]  ;;  %v3401_v57 = vld [vmem:[#allocation31_spill] sm:$0xff] }
 0x19d   :  { %1552 = vst [vmem:[%s3317_s3 + $0xe8] sm:$0xff] %v1503_v63  ;;  %v1456_v44 = vadd.f32 %v3020_v23, %v1400_v33  ;;  %v1304_v2 = vmax.f32 %v3388_v45, %v702_v31  ;;  %v1353_v13 = vmax.f32 %v3389_v3, %v1192_v17  ;;  %v3402_v3 = vld [vmem:[#allocation40_spill] sm:$0xff] }
 0x19e   :  { %v1506_v34 = vmax.f32 %v1457_v56, 0.0  ;;  %v1403_v42 = vmax.f32 %v1305_v50, %v1354_v27 }
 0x19f   :  { %v1505_v60 = vmax.f32 %v1456_v44, 0.0  ;;  %v1402_v61 = vmax.f32 %v1304_v2, %v1353_v13  ;;  %v1949_v43 = vpop.f32.mrb[84].mxu0  ;;  %v2096_v35 = vpop.f32.mrb[84].mxu1 }
 0x1a0   :  { %1555 = vst [vmem:[%s3317_s3 + $0x100] sm:$0xff] %v1506_v34  ;;  %v1459_v16 = vadd.f32 %v3020_v23, %v1403_v42  ;;  %v1307_v54 = vmax.f32 %v3390_v22, %v1949_v43  ;;  %v1356_v36 = vmax.f32 %v3391_v55, %v2096_v35  ;;  %v712_v6 = vpop.f32.mrb[85].mxu0  ;;  %v1202_v7 = vpop.f32.mrb[85].mxu1  ;;  %v3403_v34 = vld [vmem:[#allocation41_spill] sm:$0xff]  ;;  %v3404_v35 = vld [vmem:[#allocation34_spill] sm:$0xff]  ;;  %v3405_v22 = vld [vmem:[#allocation35_spill] sm:$0xff] }
 0x1a1   :  { %1554 = vst [vmem:[%s3317_s3 + $0xf8] sm:$0xff] %v1505_v60  ;;  %v1458_v37 = vadd.f32 %v3020_v23, %v1402_v61  ;;  %v1306_v48 = vmax.f32 %v3392_v28, %v712_v6  ;;  %v1355_v1 = vmax.f32 %v3393_v0, %v1202_v7  ;;  %v3406_v0 = vld [vmem:[#allocation44_spill] sm:$0xff] }
 0x1a2   :  { %v1508_v49 = vmax.f32 %v1459_v16, 0.0  ;;  %v1405_v29 = vmax.f32 %v1307_v54, %v1356_v36 }
 0x1a3   :  { %v1507_v20 = vmax.f32 %v1458_v37, 0.0  ;;  %v1404_v21 = vmax.f32 %v1306_v48, %v1355_v1  ;;  %v1952_v24 = vpop.f32.mrb[86].mxu0  ;;  %v2099_v25 = vpop.f32.mrb[86].mxu1 }
 0x1a4   :  { %1557 = vst [vmem:[%s3317_s3 + $0x110] sm:$0xff] %v1508_v49  ;;  %v1461_v26 = vadd.f32 %v3020_v23, %v1405_v29  ;;  %v1309_v11 = vmax.f32 %v3394_v10, %v1952_v24  ;;  %v1358_v58 = vmax.f32 %v3395_v46, %v2099_v25  ;;  %v722_v59 = vpop.f32.mrb[87].mxu0  ;;  %v1212_v4 = vpop.f32.mrb[87].mxu1  ;;  %v3407_v49 = vld [vmem:[#allocation45_spill] sm:$0xff]  ;;  %v3408_v25 = vld [vmem:[#allocation38_spill] sm:$0xff]  ;;  %v3409_v10 = vld [vmem:[#allocation39_spill] sm:$0xff] }
 0x1a5   :  { %1556 = vst [vmem:[%s3317_s3 + $0x108] sm:$0xff] %v1507_v20  ;;  %v1460_v5 = vadd.f32 %v3020_v23, %v1404_v21  ;;  %v1308_v30 = vmax.f32 %v3396_v47, %v722_v59  ;;  %v1357_v52 = vmax.f32 %v3397_v12, %v1212_v4  ;;  %v3410_v12 = vld [vmem:[#allocation48_spill] sm:$0xff] }
 0x1a6   :  { %v1510_v53 = vmax.f32 %v1461_v26, 0.0  ;;  %v1407_v38 = vmax.f32 %v1309_v11, %v1358_v58 }
 0x1a7   :  { %v1509_v40 = vmax.f32 %v1460_v5, 0.0  ;;  %v1406_v41 = vmax.f32 %v1308_v30, %v1357_v52  ;;  %v1955_v39 = vpop.f32.mrb[88].mxu0  ;;  %v2102_v14 = vpop.f32.mrb[88].mxu1 }
 0x1a8   :  { %1559 = vst [vmem:[%s3317_s3 + $0x120] sm:$0xff] %v1510_v53  ;;  %v1463_v15 = vadd.f32 %v3020_v23, %v1407_v38  ;;  %v1311_v9 = vmax.f32 %v3398_v8, %v1955_v39  ;;  %v1360_v62 = vmax.f32 %v3399_v32, %v2102_v14  ;;  %v732_v63 = vpop.f32.mrb[89].mxu0  ;;  %v1222_v33 = vpop.f32.mrb[89].mxu1  ;;  %v3411_v53 = vld [vmem:[#allocation49_spill] sm:$0xff]  ;;  %v3412_v14 = vld [vmem:[#allocation42_spill] sm:$0xff]  ;;  %v3413_v8 = vld [vmem:[#allocation43_spill] sm:$0xff] }
 0x1a9   :  { %1558 = vst [vmem:[%s3317_s3 + $0x118] sm:$0xff] %v1509_v40  ;;  %v1462_v18 = vadd.f32 %v3020_v23, %v1406_v41  ;;  %v1310_v56 = vmax.f32 %v3400_v19, %v732_v63  ;;  %v1359_v50 = vmax.f32 %v3401_v57, %v1222_v33  ;;  %v3414_v57 = vld [vmem:[#allocation50_spill] sm:$0xff] }
 0x1aa   :  { %v1512_v51 = vmax.f32 %v1463_v15, 0.0  ;;  %v1409_v27 = vmax.f32 %v1311_v9, %v1360_v62 }
 0x1ab   :  { %v1511_v31 = vmax.f32 %v1462_v18, 0.0  ;;  %v1408_v17 = vmax.f32 %v1310_v56, %v1359_v50  ;;  %v1958_v44 = vpop.f32.mrb[90].mxu0  ;;  %v2105_v45 = vpop.f32.mrb[90].mxu1 }
 0x1ac   :  { %1561 = vst [vmem:[%s3317_s3 + $0x130] sm:$0xff] %v1512_v51  ;;  %v1465_v2 = vadd.f32 %v3020_v23, %v1409_v27  ;;  %v1313_v13 = vmax.f32 %v3402_v3, %v1958_v44  ;;  %v1362_v42 = vmax.f32 %v3403_v34, %v2105_v45  ;;  %v742_v60 = vpop.f32.mrb[91].mxu0  ;;  %v1232_v61 = vpop.f32.mrb[91].mxu1  ;;  %v3415_v51 = vld [vmem:[#allocation51_spill] sm:$0xff]  ;;  %v3416_v45 = vld [vmem:[#allocation46_spill] sm:$0xff] }
 0x1ad   :  { %1560 = vst [vmem:[%s3317_s3 + $0x128] sm:$0xff] %v1511_v31  ;;  %v1464_v43 = vadd.f32 %v3020_v23, %v1408_v17  ;;  %v1312_v16 = vmax.f32 %v3404_v35, %v742_v60  ;;  %v1361_v54 = vmax.f32 %v3405_v22, %v1232_v61  ;;  %v3417_v3 = vld [vmem:[#allocation47_spill] sm:$0xff] }
 0x1ae   :  { %v1514_v55 = vmax.f32 %v1465_v2, 0.0  ;;  %v1411_v36 = vmax.f32 %v1313_v13, %v1362_v42 }
 0x1af   :  { %v1513_v6 = vmax.f32 %v1464_v43, 0.0  ;;  %v1410_v7 = vmax.f32 %v1312_v16, %v1361_v54  ;;  %v1961_v37 = vpop.f32.mrb[92].mxu0  ;;  %v2108_v28 = vpop.f32.mrb[92].mxu1 }
 0x1b0   :  { %1563 = vst [vmem:[%s3317_s3 + $0x140] sm:$0xff] %v1514_v55  ;;  %v1467_v48 = vadd.f32 %v3020_v23, %v1411_v36  ;;  %v1315_v1 = vmax.f32 %v3406_v0, %v1961_v37  ;;  %v1364_v29 = vmax.f32 %v3407_v49, %v2108_v28  ;;  %v752_v20 = vpop.f32.mrb[93].mxu0  ;;  %v1242_v21 = vpop.f32.mrb[93].mxu1 }
 0x1b1   :  { %1562 = vst [vmem:[%s3317_s3 + $0x138] sm:$0xff] %v1513_v6  ;;  %v1466_v24 = vadd.f32 %v3020_v23, %v1410_v7  ;;  %v1314_v26 = vmax.f32 %v3408_v25, %v752_v20  ;;  %v1363_v11 = vmax.f32 %v3409_v10, %v1242_v21 }
 0x1b2   :  { %v1516_v46 = vmax.f32 %v1467_v48, 0.0  ;;  %v1413_v58 = vmax.f32 %v1315_v1, %v1364_v29 }
 0x1b3   :  { %v1515_v59 = vmax.f32 %v1466_v24, 0.0  ;;  %v1412_v4 = vmax.f32 %v1314_v26, %v1363_v11  ;;  %v1964_v5 = vpop.f32.mrb[94].mxu0  ;;  %v2111_v47 = vpop.f32.mrb[94].mxu1 }
 0x1b4   :  { %1565 = vst [vmem:[%s3317_s3 + $0x150] sm:$0xff] %v1516_v46  ;;  %v1469_v30 = vadd.f32 %v3020_v23, %v1413_v58  ;;  %v1317_v52 = vmax.f32 %v3410_v12, %v1964_v5  ;;  %v1366_v38 = vmax.f32 %v3411_v53, %v2111_v47  ;;  %v762_v40 = vpop.f32.mrb[95].mxu0  ;;  %v1252_v41 = vpop.f32.mrb[95].mxu1 }
 0x1b5   :  { %1564 = vst [vmem:[%s3317_s3 + $0x148] sm:$0xff] %v1515_v59  ;;  %v1468_v39 = vadd.f32 %v3020_v23, %v1412_v4  ;;  %v1316_v15 = vmax.f32 %v3412_v14, %v762_v40  ;;  %v1365_v9 = vmax.f32 %v3413_v8, %v1252_v41 }
 0x1b6   :  { %v1518_v32 = vmax.f32 %v1469_v30, 0.0  ;;  %v1415_v62 = vmax.f32 %v1317_v52, %v1366_v38 }
 0x1b7   :  { %v1517_v63 = vmax.f32 %v1468_v39, 0.0  ;;  %v1414_v33 = vmax.f32 %v1316_v15, %v1365_v9  ;;  %v1967_v18 = vpop.f32.mrb[96].mxu0  ;;  %v2114_v19 = vpop.f32.mrb[96].mxu1 }
 0x1b8   :  { %1567 = vst [vmem:[%s3317_s3 + $0x160] sm:$0xff] %v1518_v32  ;;  %v1471_v56 = vadd.f32 %v3020_v23, %v1415_v62  ;;  %v1319_v50 = vmax.f32 %v3414_v57, %v1967_v18  ;;  %v1368_v27 = vmax.f32 %v3415_v51, %v2114_v19  ;;  %v772_v31 = vpop.f32.mrb[97].mxu0  ;;  %v1262_v17 = vpop.f32.mrb[97].mxu1 }
 0x1b9   :  { %1566 = vst [vmem:[%s3317_s3 + $0x158] sm:$0xff] %v1517_v63  ;;  %v1470_v44 = vadd.f32 %v3020_v23, %v1414_v33  ;;  %v1318_v2 = vmax.f32 %v3416_v45, %v772_v31  ;;  %v1367_v13 = vmax.f32 %v3417_v3, %v1262_v17 }
 0x1ba   :  { %v1520_v34 = vmax.f32 %v1471_v56, 0.0  ;;  %v1417_v42 = vmax.f32 %v1319_v50, %v1368_v27 }
 0x1bb   :  { %v1519_v60 = vmax.f32 %v1470_v44, 0.0  ;;  %v1416_v61 = vmax.f32 %v1318_v2, %v1367_v13 }
 0x1bc   :  { %1569 = vst [vmem:[%s3317_s3 + $0x170] sm:$0xff] %v1520_v34  ;;  %v1473_v43 = vadd.f32 %v3020_v23, %v1417_v42 }
 0x1bd   :  { %1568 = vst [vmem:[%s3317_s3 + $0x168] sm:$0xff] %v1519_v60  ;;  %v1472_v35 = vadd.f32 %v3020_v23, %v1416_v61 }
 0x1be   :  { %v1522_v16 = vmax.f32 %v1473_v43, 0.0 }
 0x1bf   :  { %v1521_v22 = vmax.f32 %v1472_v35, 0.0 }
 0x1c0   :  { %1571 = vst [vmem:[%s3317_s3 + $0x180] sm:$0xff] %v1522_v16 }
 0x1c1   :  { %1570 = vst [vmem:[%s3317_s3 + $0x178] sm:$0xff] %v1521_v22 }

// kernel: net_forward.3
= control target key start
LH: loop header
LB: loop body
LE: loop exit
PB: predicated region body
PF: predicated region fallthrough
CT: control target
= control target key end

     0   :  { %v10298_v0 = vmov 0.0|0.0   ;;  %vm6818_vm0 = vmmov 0   ;;  %s10288_s1 = inlined_call_operand.vmem [shape: f32[256,128], index: 1, kind: input, shape index: {}]   ;;  %s10289_s0 = inlined_call_operand.vmem [shape: f32[1024,256], index: 0, kind: input, shape index: {}]   ;;  %s10290_s3 = inlined_call_operand.vmem [shape: f32[32,128,128], index: 3, kind: input, shape index: {}]   ;;  %s10291_s2 = inlined_call_operand.vmem [shape: f32[1,128], index: 2, kind: input, shape index: {}]   ;;  %s10292_s5 = inlined_call_operand.vmem [shape: f32[128,128], index: 5, kind: input, shape index: {}]   ;;  %s10293_s7 = inlined_call_operand.vmem [shape: f32[128,128], index: 7, kind: input, shape index: {}]   ;;  %s10294_s4 = inlined_call_operand.vmem [shape: f32[1,128], index: 4, kind: input, shape index: {}]   ;;  %s10295_s6 = inlined_call_operand.vmem [shape: f32[1,128], index: 6, kind: input, shape index: {}]   ;;  %s10296_s8 = inlined_call_operand.vmem [shape: f32[1,128], index: 8, kind: input, shape index: {}]   ;;  %s10297_s9 = inlined_call_operand.vmem [shape: f32[8,128], index: 9, kind: output, shape index: {}]  }
   0x1   :  { %5948 = vmatprep.subr.bf16.mxu0 %v10298_v0  ;;  %v288_v1 = vld [vmem:[%s10288_s1] sm:$0xff]  ;;  %v289_v2 = vld [vmem:[%s10288_s1 + $0x8] sm:$0xff]  ;;  %v290_v3 = vld [vmem:[%s10288_s1 + $0x10] sm:$0xff]  ;;  %5996 = vmatprep.subr.bf16.mxu1 %v10298_v0 }
   0x2   :  { %v5949_v4 = vpack.c.bf16 %v289_v2, %v288_v1  ;;  %v291_v5 = vld [vmem:[%s10288_s1 + $0x18] sm:$0xff]  ;;  %v292_v7 = vld [vmem:[%s10288_s1 + $0x20] sm:$0xff]  ;;  %v293_v8 = vld [vmem:[%s10288_s1 + $0x28] sm:$0xff] }
   0x3   :  { %v5952_v6 = vpack.c.bf16 %v291_v5, %v290_v3  ;;  %v5955_v9 = vpack.c.bf16 %v293_v8, %v292_v7  ;;  %v294_v10 = vld [vmem:[%s10288_s1 + $0x30] sm:$0xff]  ;;  %v295_v11 = vld [vmem:[%s10288_s1 + $0x38] sm:$0xff]  ;;  %v33_v12 = vld [vmem:[%s10289_s0 + $0x8] sm:$0xff] }
   0x4   :  { %5950 = vmatpush1.bf16.msra.mxu0 %v5949_v4  ;;  %v5958_v13 = vpack.c.bf16 %v295_v11, %v294_v10  ;;  %384 = vmatprep.mubr.f32.mxu0 %v33_v12  ;;  %v296_v14 = vld [vmem:[%s10288_s1 + $0x40] sm:$0xff]  ;;  %v297_v15 = vld [vmem:[%s10288_s1 + $0x48] sm:$0xff]  ;;  %v298_v17 = vld [vmem:[%s10288_s1 + $0x50] sm:$0xff] }
   0x5   :  { %5951 = vmatprep.subr.bf16.mxu0 %v10298_v0  ;;  %v5961_v16 = vpack.c.bf16 %v297_v15, %v296_v14  ;;  %v299_v18 = vld [vmem:[%s10288_s1 + $0x58] sm:$0xff]  ;;  %v300_v20 = vld [vmem:[%s10288_s1 + $0x60] sm:$0xff]  ;;  %v301_v21 = vld [vmem:[%s10288_s1 + $0x68] sm:$0xff] }
   0x6   :  { %v5964_v19 = vpack.c.bf16 %v299_v18, %v298_v17  ;;  %v5967_v22 = vpack.c.bf16 %v301_v21, %v300_v20  ;;  %v302_v23 = vld [vmem:[%s10288_s1 + $0x70] sm:$0xff]  ;;  %v303_v24 = vld [vmem:[%s10288_s1 + $0x78] sm:$0xff]  ;;  %v304_v26 = vld [vmem:[%s10288_s1 + $0x80] sm:$0xff] }
   0x7   :  { %v5970_v25 = vpack.c.bf16 %v303_v24, %v302_v23  ;;  %v305_v27 = vld [vmem:[%s10288_s1 + $0x88] sm:$0xff]  ;;  %v306_v29 = vld [vmem:[%s10288_s1 + $0x90] sm:$0xff]  ;;  %v307_v30 = vld [vmem:[%s10288_s1 + $0x98] sm:$0xff] }
   0x8   :  { %5953 = vmatpush1.bf16.msra.mxu0 %v5952_v6  ;;  %v5973_v28 = vpack.c.bf16 %v305_v27, %v304_v26  ;;  %v5976_v31 = vpack.c.bf16 %v307_v30, %v306_v29  ;;  %v308_v32 = vld [vmem:[%s10288_s1 + $0xa0] sm:$0xff]  ;;  %v309_v33 = vld [vmem:[%s10288_s1 + $0xa8] sm:$0xff]  ;;  %v310_v35 = vld [vmem:[%s10288_s1 + $0xb0] sm:$0xff] }
   0x9   :  { %5954 = vmatprep.subr.bf16.mxu0 %v10298_v0  ;;  %v5979_v34 = vpack.c.bf16 %v309_v33, %v308_v32  ;;  %v311_v36 = vld [vmem:[%s10288_s1 + $0xb8] sm:$0xff]  ;;  %v312_v38 = vld [vmem:[%s10288_s1 + $0xc0] sm:$0xff]  ;;  %v313_v39 = vld [vmem:[%s10288_s1 + $0xc8] sm:$0xff] }
   0xa   :  { %v5982_v37 = vpack.c.bf16 %v311_v36, %v310_v35  ;;  %v5985_v40 = vpack.c.bf16 %v313_v39, %v312_v38  ;;  %v314_v41 = vld [vmem:[%s10288_s1 + $0xd0] sm:$0xff]  ;;  %v315_v42 = vld [vmem:[%s10288_s1 + $0xd8] sm:$0xff]  ;;  %v316_v44 = vld [vmem:[%s10288_s1 + $0xe0] sm:$0xff] }
   0xb   :  { %v5988_v43 = vpack.c.bf16 %v315_v42, %v314_v41  ;;  %v317_v45 = vld [vmem:[%s10288_s1 + $0xe8] sm:$0xff]  ;;  %v318_v47 = vld [vmem:[%s10288_s1 + $0xf0] sm:$0xff]  ;;  %v319_v48 = vld [vmem:[%s10288_s1 + $0xf8] sm:$0xff] }
   0xc   :  { %5956 = vmatpush1.bf16.msra.mxu0 %v5955_v9  ;;  %v5991_v46 = vpack.c.bf16 %v317_v45, %v316_v44  ;;  %v5994_v49 = vpack.c.bf16 %v319_v48, %v318_v47  ;;  %v32_v50 = vld [vmem:[%s10289_s0] sm:$0xff]  ;;  %v35_v51 = vld [vmem:[%s10289_s0 + $0x18] sm:$0xff]  ;;  %v34_v52 = vld [vmem:[%s10289_s0 + $0x10] sm:$0xff] }
   0xd   :  { %5957 = vmatprep.subr.bf16.mxu0 %v10298_v0  ;;  %v37_v53 = vld [vmem:[%s10289_s0 + $0x28] sm:$0xff]  ;;  %v36_v54 = vld [vmem:[%s10289_s0 + $0x20] sm:$0xff]  ;;  %v39_v55 = vld [vmem:[%s10289_s0 + $0x38] sm:$0xff] }
   0xe   :  { %v38_v56 = vld [vmem:[%s10289_s0 + $0x30] sm:$0xff]  ;;  %v41_v57 = vld [vmem:[%s10289_s0 + $0x48] sm:$0xff]  ;;  %v40_v58 = vld [vmem:[%s10289_s0 + $0x40] sm:$0xff] }
   0xf   :  { %v43_v59 = vld [vmem:[%s10289_s0 + $0x58] sm:$0xff]  ;;  %v42_v60 = vld [vmem:[%s10289_s0 + $0x50] sm:$0xff]  ;;  %v45_v61 = vld [vmem:[%s10289_s0 + $0x68] sm:$0xff] }
  0x10   :  { %5959 = vmatpush1.bf16.msra.mxu0 %v5958_v13  ;;  %v44_v62 = vld [vmem:[%s10289_s0 + $0x60] sm:$0xff]  ;;  %v47_v63 = vld [vmem:[%s10289_s0 + $0x78] sm:$0xff]  ;;  %v46_v1 = vld [vmem:[%s10289_s0 + $0x70] sm:$0xff] }
  0x11   :  { %5960 = vmatprep.subr.bf16.mxu0 %v10298_v0  ;;  %v49_v2 = vld [vmem:[%s10289_s0 + $0x88] sm:$0xff]  ;;  %v48_v3 = vld [vmem:[%s10289_s0 + $0x80] sm:$0xff]  ;;  %v51_v4 = vld [vmem:[%s10289_s0 + $0x98] sm:$0xff] }
  0x12   :  { %v50_v5 = vld [vmem:[%s10289_s0 + $0x90] sm:$0xff]  ;;  %v53_v6 = vld [vmem:[%s10289_s0 + $0xa8] sm:$0xff]  ;;  %v52_v7 = vld [vmem:[%s10289_s0 + $0xa0] sm:$0xff] }
  0x13   :  { %v55_v8 = vld [vmem:[%s10289_s0 + $0xb8] sm:$0xff]  ;;  %v54_v9 = vld [vmem:[%s10289_s0 + $0xb0] sm:$0xff]  ;;  %v57_v10 = vld [vmem:[%s10289_s0 + $0xc8] sm:$0xff] }
  0x14   :  { %5962 = vmatpush1.bf16.msra.mxu0 %v5961_v16  ;;  %v56_v11 = vld [vmem:[%s10289_s0 + $0xc0] sm:$0xff]  ;;  %v59_v12 = vld [vmem:[%s10289_s0 + $0xd8] sm:$0xff]  ;;  %v58_v13 = vld [vmem:[%s10289_s0 + $0xd0] sm:$0xff] }
  0x15   :  { %5963 = vmatprep.subr.bf16.mxu0 %v10298_v0  ;;  %v61_v14 = vld [vmem:[%s10289_s0 + $0xe8] sm:$0xff]  ;;  %v60_v15 = vld [vmem:[%s10289_s0 + $0xe0] sm:$0xff]  ;;  %v63_v16 = vld [vmem:[%s10289_s0 + $0xf8] sm:$0xff] }
  0x16   :  { %v62_v17 = vld [vmem:[%s10289_s0 + $0xf0] sm:$0xff]  ;;  %v65_v18 = vld [vmem:[%s10289_s0 + $0x108] sm:$0xff]  ;;  %v67_v20 = vld [vmem:[%s10289_s0 + $0x118] sm:$0xff] }
  0x17   :  { %v66_v21 = vld [vmem:[%s10289_s0 + $0x110] sm:$0xff]  ;;  %v68_v23 = vld [vmem:[%s10289_s0 + $0x120] sm:$0xff]  ;;  %v71_v24 = vld [vmem:[%s10289_s0 + $0x138] sm:$0xff] }
  0x18   :  { %5965 = vmatpush1.bf16.msra.mxu0 %v5964_v19  ;;  %v64_v19 = vld [vmem:[%s10289_s0 + $0x100] sm:$0xff]  ;;  %v73_v26 = vld [vmem:[%s10289_s0 + $0x148] sm:$0xff]  ;;  %v74_v29 = vld [vmem:[%s10289_s0 + $0x150] sm:$0xff] }
  0x19   :  { %5966 = vmatprep.subr.bf16.mxu0 %v10298_v0  ;;  %v72_v27 = vld [vmem:[%s10289_s0 + $0x140] sm:$0xff]  ;;  %v77_v30 = vld [vmem:[%s10289_s0 + $0x168] sm:$0xff]  ;;  %v79_v32 = vld [vmem:[%s10289_s0 + $0x178] sm:$0xff] }
  0x1a   :  { %v78_v33 = vld [vmem:[%s10289_s0 + $0x170] sm:$0xff]  ;;  %v80_v35 = vld [vmem:[%s10289_s0 + $0x180] sm:$0xff]  ;;  %v83_v36 = vld [vmem:[%s10289_s0 + $0x198] sm:$0xff] }
  0x1b   :  { %v85_v38 = vld [vmem:[%s10289_s0 + $0x1a8] sm:$0xff]  ;;  %v84_v39 = vld [vmem:[%s10289_s0 + $0x1a0] sm:$0xff]  ;;  %v86_v41 = vld [vmem:[%s10289_s0 + $0x1b0] sm:$0xff] }
  0x1c   :  { %5968 = vmatpush1.bf16.msra.mxu0 %v5967_v22  ;;  %v69_v22 = vld [vmem:[%s10289_s0 + $0x128] sm:$0xff]  ;;  %v91_v44 = vld [vmem:[%s10289_s0 + $0x1d8] sm:$0xff]  ;;  %v90_v45 = vld [vmem:[%s10289_s0 + $0x1d0] sm:$0xff] }
  0x1d   :  { %5969 = vmatprep.subr.bf16.mxu0 %v10298_v0  ;;  %v89_v42 = vld [vmem:[%s10289_s0 + $0x1c8] sm:$0xff]  ;;  %v92_v47 = vld [vmem:[%s10289_s0 + $0x1e0] sm:$0xff]  ;;  %v95_v48 = vld [vmem:[%s10289_s0 + $0x1f8] sm:$0xff] }
  0x20   :  { %5971 = vmatpush1.bf16.msra.mxu0 %v5970_v25  ;;  %v70_v25 = vld [vmem:[%s10289_s0 + $0x130] sm:$0xff] }
  0x21   :  { %5972 = vmatprep.subr.bf16.mxu0 %v10298_v0 }
  0x24   :  { %5974 = vmatpush1.bf16.msra.mxu0 %v5973_v28  ;;  %v75_v28 = vld [vmem:[%s10289_s0 + $0x158] sm:$0xff] }
  0x25   :  { %5975 = vmatprep.subr.bf16.mxu0 %v10298_v0 }
  0x28   :  { %5977 = vmatpush1.bf16.msra.mxu0 %v5976_v31  ;;  %v76_v31 = vld [vmem:[%s10289_s0 + $0x160] sm:$0xff] }
  0x29   :  { %5978 = vmatprep.subr.bf16.mxu0 %v10298_v0 }
  0x2c   :  { %5980 = vmatpush1.bf16.msra.mxu0 %v5979_v34  ;;  %v81_v34 = vld [vmem:[%s10289_s0 + $0x188] sm:$0xff] }
  0x2d   :  { %5981 = vmatprep.subr.bf16.mxu0 %v10298_v0 }
  0x30   :  { %5983 = vmatpush1.bf16.msra.mxu0 %v5982_v37  ;;  %v82_v37 = vld [vmem:[%s10289_s0 + $0x190] sm:$0xff] }
  0x31   :  { %5984 = vmatprep.subr.bf16.mxu0 %v10298_v0 }
  0x34   :  { %5986 = vmatpush1.bf16.msra.mxu0 %v5985_v40  ;;  %v87_v40 = vld [vmem:[%s10289_s0 + $0x1b8] sm:$0xff] }
  0x35   :  { %5987 = vmatprep.subr.bf16.mxu0 %v10298_v0 }
  0x38   :  { %5989 = vmatpush1.bf16.msra.mxu0 %v5988_v43  ;;  %v88_v43 = vld [vmem:[%s10289_s0 + $0x1c0] sm:$0xff] }
  0x39   :  { %5990 = vmatprep.subr.bf16.mxu0 %v10298_v0 }
  0x3c   :  { %5992 = vmatpush1.bf16.msra.mxu0 %v5991_v46  ;;  %v93_v46 = vld [vmem:[%s10289_s0 + $0x1e8] sm:$0xff] }
  0x3d   :  { %5993 = vmatprep.subr.bf16.mxu0 %v10298_v0 }
  0x40   :  { %5995 = vmatpush1.bf16.msra.mxu0 %v5994_v49  ;;  %v94_v49 = vld [vmem:[%s10289_s0 + $0x1f0] sm:$0xff] }
  0x41   :  { %6404 = vmatprep.subr.bf16.mxu0 %v10298_v0 }
  0x43   :  { %385 = vmatmul.mubr.f32.vlgmr.msra.gmra.mrb[0].mxu0 %v32_v50  ;;  %v97_v50 = vld [vmem:[%s10289_s0 + $0x208] sm:$0xff] }
  0x44   :  { %389 = vmatprep.mubr.f32.mxu0 %v35_v51  ;;  %v96_v51 = vld [vmem:[%s10289_s0 + $0x200] sm:$0xff] }
  0x47   :  { %390 = vmatmul.mubr.f32.gmra.mrb[2].mxu0 %v34_v52  ;;  %v99_v52 = vld [vmem:[%s10289_s0 + $0x218] sm:$0xff] }
  0x48   :  { %394 = vmatprep.mubr.f32.mxu0 %v37_v53  ;;  %v98_v53 = vld [vmem:[%s10289_s0 + $0x210] sm:$0xff] }
  0x4b   :  { %395 = vmatmul.mubr.f32.gmra.mrb[4].mxu0 %v36_v54  ;;  %v101_v54 = vld [vmem:[%s10289_s0 + $0x228] sm:$0xff] }
  0x4c   :  { %399 = vmatprep.mubr.f32.mxu0 %v39_v55  ;;  %v100_v55 = vld [vmem:[%s10289_s0 + $0x220] sm:$0xff] }
  0x4f   :  { %400 = vmatmul.mubr.f32.gmra.mrb[6].mxu0 %v38_v56  ;;  %v103_v56 = vld [vmem:[%s10289_s0 + $0x238] sm:$0xff] }
  0x50   :  { %404 = vmatprep.mubr.f32.mxu0 %v41_v57  ;;  %v102_v57 = vld [vmem:[%s10289_s0 + $0x230] sm:$0xff] }
  0x53   :  { %405 = vmatmul.mubr.f32.gmra.mrb[8].mxu0 %v40_v58  ;;  %v105_v58 = vld [vmem:[%s10289_s0 + $0x248] sm:$0xff] }
  0x54   :  { %409 = vmatprep.mubr.f32.mxu0 %v43_v59  ;;  %v104_v59 = vld [vmem:[%s10289_s0 + $0x240] sm:$0xff] }
  0x57   :  { %410 = vmatmul.mubr.f32.gmra.mrb[10].mxu0 %v42_v60  ;;  %v107_v60 = vld [vmem:[%s10289_s0 + $0x258] sm:$0xff] }
  0x58   :  { %414 = vmatprep.mubr.f32.mxu0 %v45_v61  ;;  %v106_v61 = vld [vmem:[%s10289_s0 + $0x250] sm:$0xff] }
  0x5b   :  { %415 = vmatmul.mubr.f32.gmra.mrb[12].mxu0 %v44_v62  ;;  %v109_v62 = vld [vmem:[%s10289_s0 + $0x268] sm:$0xff] }
  0x5c   :  { %419 = vmatprep.mubr.f32.mxu0 %v47_v63  ;;  %v108_v63 = vld [vmem:[%s10289_s0 + $0x260] sm:$0xff] }
  0x5f   :  { %420 = vmatmul.mubr.f32.gmra.mrb[14].mxu0 %v46_v1  ;;  %v111_v1 = vld [vmem:[%s10289_s0 + $0x278] sm:$0xff] }
  0x60   :  { %424 = vmatprep.mubr.f32.mxu0 %v49_v2  ;;  %v110_v2 = vld [vmem:[%s10289_s0 + $0x270] sm:$0xff] }
  0x63   :  { %425 = vmatmul.mubr.f32.gmra.mrb[16].mxu0 %v48_v3  ;;  %v113_v3 = vld [vmem:[%s10289_s0 + $0x288] sm:$0xff] }
  0x64   :  { %429 = vmatprep.mubr.f32.mxu0 %v51_v4  ;;  %v112_v4 = vld [vmem:[%s10289_s0 + $0x280] sm:$0xff] }
  0x67   :  { %430 = vmatmul.mubr.f32.gmra.mrb[18].mxu0 %v50_v5  ;;  %v115_v5 = vld [vmem:[%s10289_s0 + $0x298] sm:$0xff] }
  0x68   :  { %434 = vmatprep.mubr.f32.mxu0 %v53_v6  ;;  %v114_v6 = vld [vmem:[%s10289_s0 + $0x290] sm:$0xff] }
  0x6b   :  { %435 = vmatmul.mubr.f32.gmra.mrb[20].mxu0 %v52_v7  ;;  %v117_v7 = vld [vmem:[%s10289_s0 + $0x2a8] sm:$0xff] }
  0x6c   :  { %439 = vmatprep.mubr.f32.mxu0 %v55_v8  ;;  %v116_v8 = vld [vmem:[%s10289_s0 + $0x2a0] sm:$0xff] }
  0x6f   :  { %440 = vmatmul.mubr.f32.gmra.mrb[22].mxu0 %v54_v9  ;;  %v119_v9 = vld [vmem:[%s10289_s0 + $0x2b8] sm:$0xff] }
  0x70   :  { %444 = vmatprep.mubr.f32.mxu0 %v57_v10  ;;  %v118_v10 = vld [vmem:[%s10289_s0 + $0x2b0] sm:$0xff] }
  0x73   :  { %445 = vmatmul.mubr.f32.gmra.mrb[24].mxu0 %v56_v11  ;;  %v121_v11 = vld [vmem:[%s10289_s0 + $0x2c8] sm:$0xff] }
  0x74   :  { %449 = vmatprep.mubr.f32.mxu0 %v59_v12  ;;  %v120_v12 = vld [vmem:[%s10289_s0 + $0x2c0] sm:$0xff] }
  0x77   :  { %450 = vmatmul.mubr.f32.gmra.mrb[26].mxu0 %v58_v13  ;;  %v123_v13 = vld [vmem:[%s10289_s0 + $0x2d8] sm:$0xff] }
  0x78   :  { %454 = vmatprep.mubr.f32.mxu0 %v61_v14  ;;  %v122_v14 = vld [vmem:[%s10289_s0 + $0x2d0] sm:$0xff] }
  0x7b   :  { %455 = vmatmul.mubr.f32.gmra.mrb[28].mxu0 %v60_v15  ;;  %v125_v15 = vld [vmem:[%s10289_s0 + $0x2e8] sm:$0xff] }
  0x7c   :  { %459 = vmatprep.mubr.f32.mxu0 %v63_v16  ;;  %v124_v16 = vld [vmem:[%s10289_s0 + $0x2e0] sm:$0xff] }
  0x7f   :  { %460 = vmatmul.mubr.f32.gmra.mrb[30].mxu0 %v62_v17  ;;  %v127_v17 = vld [vmem:[%s10289_s0 + $0x2f8] sm:$0xff] }
  0x80   :  { %464 = vmatprep.mubr.f32.mxu0 %v65_v18  ;;  %v126_v18 = vld [vmem:[%s10289_s0 + $0x2f0] sm:$0xff] }
  0x83   :  { %465 = vmatmul.mubr.f32.gmra.mrb[32].mxu0 %v64_v19  ;;  %v129_v19 = vld [vmem:[%s10289_s0 + $0x308] sm:$0xff] }
  0x84   :  { %469 = vmatprep.mubr.f32.mxu0 %v67_v20  ;;  %v128_v20 = vld [vmem:[%s10289_s0 + $0x300] sm:$0xff] }
  0x87   :  { %470 = vmatmul.mubr.f32.gmra.mrb[34].mxu0 %v66_v21  ;;  %v131_v21 = vld [vmem:[%s10289_s0 + $0x318] sm:$0xff] }
  0x88   :  { %474 = vmatprep.mubr.f32.mxu0 %v69_v22  ;;  %v130_v22 = vld [vmem:[%s10289_s0 + $0x310] sm:$0xff] }
  0x8b   :  { %475 = vmatmul.mubr.f32.gmra.mrb[36].mxu0 %v68_v23  ;;  %v133_v23 = vld [vmem:[%s10289_s0 + $0x328] sm:$0xff] }
  0x8c   :  { %479 = vmatprep.mubr.f32.mxu0 %v71_v24  ;;  %v132_v24 = vld [vmem:[%s10289_s0 + $0x320] sm:$0xff] }
  0x8f   :  { %480 = vmatmul.mubr.f32.gmra.mrb[38].mxu0 %v70_v25  ;;  %v135_v25 = vld [vmem:[%s10289_s0 + $0x338] sm:$0xff] }
  0x90   :  { %484 = vmatprep.mubr.f32.mxu0 %v73_v26  ;;  %v134_v26 = vld [vmem:[%s10289_s0 + $0x330] sm:$0xff] }
  0x93   :  { %485 = vmatmul.mubr.f32.gmra.mrb[40].mxu0 %v72_v27  ;;  %v137_v27 = vld [vmem:[%s10289_s0 + $0x348] sm:$0xff] }
  0x94   :  { %489 = vmatprep.mubr.f32.mxu0 %v75_v28  ;;  %v136_v28 = vld [vmem:[%s10289_s0 + $0x340] sm:$0xff] }
  0x97   :  { %490 = vmatmul.mubr.f32.gmra.mrb[42].mxu0 %v74_v29  ;;  %v139_v29 = vld [vmem:[%s10289_s0 + $0x358] sm:$0xff] }
  0x98   :  { %494 = vmatprep.mubr.f32.mxu0 %v77_v30  ;;  %v138_v30 = vld [vmem:[%s10289_s0 + $0x350] sm:$0xff] }
  0x9b   :  { %495 = vmatmul.mubr.f32.gmra.mrb[44].mxu0 %v76_v31  ;;  %v141_v31 = vld [vmem:[%s10289_s0 + $0x368] sm:$0xff] }
  0x9c   :  { %499 = vmatprep.mubr.f32.mxu0 %v79_v32 }
  0x9f   :  { %500 = vmatmul.mubr.f32.gmra.mrb[46].mxu0 %v78_v33 }
  0xa0   :  { %504 = vmatprep.mubr.f32.mxu0 %v81_v34  ;;  %v140_v34 = vld [vmem:[%s10289_s0 + $0x360] sm:$0xff] }
  0xa3   :  { %505 = vmatmul.mubr.f32.gmra.mrb[48].mxu0 %v80_v35  ;;  %v143_v35 = vld [vmem:[%s10289_s0 + $0x378] sm:$0xff] }
  0xa4   :  { %509 = vmatprep.mubr.f32.mxu0 %v83_v36 }
  0xa7   :  { %510 = vmatmul.mubr.f32.gmra.mrb[50].mxu0 %v82_v37 }
  0xa8   :  { %514 = vmatprep.mubr.f32.mxu0 %v85_v38  ;;  %v142_v38 = vld [vmem:[%s10289_s0 + $0x370] sm:$0xff] }
  0xab   :  { %515 = vmatmul.mubr.f32.gmra.mrb[52].mxu0 %v84_v39  ;;  %v145_v39 = vld [vmem:[%s10289_s0 + $0x388] sm:$0xff] }
  0xac   :  { %519 = vmatprep.mubr.f32.mxu0 %v87_v40 }
  0xaf   :  { %520 = vmatmul.mubr.f32.gmra.mrb[54].mxu0 %v86_v41 }
  0xb0   :  { %524 = vmatprep.mubr.f32.mxu0 %v89_v42  ;;  %v144_v42 = vld [vmem:[%s10289_s0 + $0x380] sm:$0xff] }
  0xb3   :  { %525 = vmatmul.mubr.f32.gmra.mrb[56].mxu0 %v88_v43  ;;  %v147_v43 = vld [vmem:[%s10289_s0 + $0x398] sm:$0xff] }
  0xb4   :  { %529 = vmatprep.mubr.f32.mxu0 %v91_v44 }
  0xb7   :  { %530 = vmatmul.mubr.f32.gmra.mrb[58].mxu0 %v90_v45 }
  0xb8   :  { %534 = vmatprep.mubr.f32.mxu0 %v93_v46  ;;  %v146_v46 = vld [vmem:[%s10289_s0 + $0x390] sm:$0xff] }
  0xbb   :  { %535 = vmatmul.mubr.f32.gmra.mrb[60].mxu0 %v92_v47  ;;  %v149_v47 = vld [vmem:[%s10289_s0 + $0x3a8] sm:$0xff] }
  0xbc   :  { %539 = vmatprep.mubr.f32.mxu0 %v95_v48 }
  0xbf   :  { %540 = vmatmul.mubr.f32.gmra.mrb[62].mxu0 %v94_v49 }
  0xc0   :  { %544 = vmatprep.mubr.f32.mxu0 %v97_v50  ;;  %v148_v50 = vld [vmem:[%s10289_s0 + $0x3a0] sm:$0xff] }
  0xc3   :  { %545 = vmatmul.mubr.f32.gmra.mrb[64].mxu0 %v96_v51  ;;  %v151_v51 = vld [vmem:[%s10289_s0 + $0x3b8] sm:$0xff] }
  0xc4   :  { %549 = vmatprep.mubr.f32.mxu0 %v99_v52 }
  0xc7   :  { %550 = vmatmul.mubr.f32.gmra.mrb[66].mxu0 %v98_v53 }
  0xc8   :  { %554 = vmatprep.mubr.f32.mxu0 %v101_v54  ;;  %v150_v54 = vld [vmem:[%s10289_s0 + $0x3b0] sm:$0xff] }
  0xcb   :  { %555 = vmatmul.mubr.f32.gmra.mrb[68].mxu0 %v100_v55  ;;  %v153_v55 = vld [vmem:[%s10289_s0 + $0x3c8] sm:$0xff] }
  0xcc   :  { %559 = vmatprep.mubr.f32.mxu0 %v103_v56 }
  0xcf   :  { %560 = vmatmul.mubr.f32.gmra.mrb[70].mxu0 %v102_v57 }
  0xd0   :  { %564 = vmatprep.mubr.f32.mxu0 %v105_v58  ;;  %v152_v58 = vld [vmem:[%s10289_s0 + $0x3c0] sm:$0xff] }
  0xd3   :  { %565 = vmatmul.mubr.f32.gmra.mrb[72].mxu0 %v104_v59  ;;  %v155_v59 = vld [vmem:[%s10289_s0 + $0x3d8] sm:$0xff] }
  0xd4   :  { %569 = vmatprep.mubr.f32.mxu0 %v107_v60 }
  0xd7   :  { %570 = vmatmul.mubr.f32.gmra.mrb[74].mxu0 %v106_v61 }
  0xd8   :  { %574 = vmatprep.mubr.f32.mxu0 %v109_v62  ;;  %v154_v62 = vld [vmem:[%s10289_s0 + $0x3d0] sm:$0xff] }
  0xdb   :  { %575 = vmatmul.mubr.f32.gmra.mrb[76].mxu0 %v108_v63  ;;  %v157_v63 = vld [vmem:[%s10289_s0 + $0x3e8] sm:$0xff] }
  0xdc   :  { %579 = vmatprep.mubr.f32.mxu0 %v111_v1 }
  0xdf   :  { %580 = vmatmul.mubr.f32.gmra.mrb[78].mxu0 %v110_v2 }
  0xe0   :  { %584 = vmatprep.mubr.f32.mxu0 %v113_v3  ;;  %v156_v3 = vld [vmem:[%s10289_s0 + $0x3e0] sm:$0xff] }
  0xe3   :  { %585 = vmatmul.mubr.f32.gmra.mrb[80].mxu0 %v112_v4  ;;  %v159_v4 = vld [vmem:[%s10289_s0 + $0x3f8] sm:$0xff] }
  0xe4   :  { %589 = vmatprep.mubr.f32.mxu0 %v115_v5 }
  0xe7   :  { %590 = vmatmul.mubr.f32.gmra.mrb[82].mxu0 %v114_v6 }
  0xe8   :  { %594 = vmatprep.mubr.f32.mxu0 %v117_v7  ;;  %v158_v7 = vld [vmem:[%s10289_s0 + $0x3f0] sm:$0xff] }
  0xeb   :  { %595 = vmatmul.mubr.f32.gmra.mrb[84].mxu0 %v116_v8  ;;  %v161_v8 = vld [vmem:[%s10289_s0 + $0x408] sm:$0xff] }
  0xec   :  { %599 = vmatprep.mubr.f32.mxu0 %v119_v9 }
  0xef   :  { %600 = vmatmul.mubr.f32.gmra.mrb[86].mxu0 %v118_v10 }
  0xf0   :  { %604 = vmatprep.mubr.f32.mxu0 %v121_v11  ;;  %v160_v11 = vld [vmem:[%s10289_s0 + $0x400] sm:$0xff] }
  0xf3   :  { %605 = vmatmul.mubr.f32.gmra.mrb[88].mxu0 %v120_v12  ;;  %v163_v12 = vld [vmem:[%s10289_s0 + $0x418] sm:$0xff] }
  0xf4   :  { %609 = vmatprep.mubr.f32.mxu0 %v123_v13 }
  0xf7   :  { %610 = vmatmul.mubr.f32.gmra.mrb[90].mxu0 %v122_v14 }
  0xf8   :  { %614 = vmatprep.mubr.f32.mxu0 %v125_v15  ;;  %v162_v15 = vld [vmem:[%s10289_s0 + $0x410] sm:$0xff] }
  0xfb   :  { %615 = vmatmul.mubr.f32.gmra.mrb[92].mxu0 %v124_v16  ;;  %v165_v16 = vld [vmem:[%s10289_s0 + $0x428] sm:$0xff] }
  0xfc   :  { %619 = vmatprep.mubr.f32.mxu0 %v127_v17 }
  0xff   :  { %620 = vmatmul.mubr.f32.gmra.mrb[94].mxu0 %v126_v18 }
 0x100   :  { %624 = vmatprep.mubr.f32.mxu0 %v129_v19  ;;  %v164_v19 = vld [vmem:[%s10289_s0 + $0x420] sm:$0xff] }
 0x103   :  { %625 = vmatmul.mubr.f32.gmra.mrb[96].mxu0 %v128_v20  ;;  %v167_v20 = vld [vmem:[%s10289_s0 + $0x438] sm:$0xff] }
 0x104   :  { %629 = vmatprep.mubr.f32.mxu0 %v131_v21 }
 0x107   :  { %630 = vmatmul.mubr.f32.gmra.mrb[98].mxu0 %v130_v22 }
 0x108   :  { %634 = vmatprep.mubr.f32.mxu0 %v133_v23  ;;  %v166_v23 = vld [vmem:[%s10289_s0 + $0x430] sm:$0xff] }
 0x10b   :  { %635 = vmatmul.mubr.f32.gmra.mrb[100].mxu0 %v132_v24  ;;  %v169_v24 = vld [vmem:[%s10289_s0 + $0x448] sm:$0xff] }
 0x10c   :  { %639 = vmatprep.mubr.f32.mxu0 %v135_v25 }
 0x10f   :  { %640 = vmatmul.mubr.f32.gmra.mrb[102].mxu0 %v134_v26 }
 0x110   :  { %644 = vmatprep.mubr.f32.mxu0 %v137_v27  ;;  %v168_v27 = vld [vmem:[%s10289_s0 + $0x440] sm:$0xff] }
 0x113   :  { %645 = vmatmul.mubr.f32.gmra.mrb[104].mxu0 %v136_v28  ;;  %v171_v28 = vld [vmem:[%s10289_s0 + $0x458] sm:$0xff] }
 0x114   :  { %649 = vmatprep.mubr.f32.mxu0 %v139_v29 }
 0x116   :  { %v7311_v32 = vpop.f32.mrb[0].mxu0 }
 0x117   :  { %v388_v33 = vpop.f32.mrb[1].mxu0  ;;  %650 = vmatmul.mubr.f32.gmra.mrb[106].mxu0 %v138_v30 }
 0x118   :  { %654 = vmatprep.mubr.f32.mxu0 %v141_v31  ;;  %v170_v31 = vld [vmem:[%s10289_s0 + $0x450] sm:$0xff]  ;;  %v173_v33 = vld [vmem:[%s10289_s0 + $0x468] sm:$0xff] }
 0x11a   :  { %v7319_v36 = vpop.f32.mrb[2].mxu0 }
 0x11b   :  { %v393_v37 = vpop.f32.mrb[3].mxu0  ;;  %655 = vmatmul.mubr.f32.gmra.mrb[108].mxu0 %v140_v34 }
 0x11c   :  { %659 = vmatprep.mubr.f32.mxu0 %v143_v35  ;;  %v172_v37 = vld [vmem:[%s10289_s0 + $0x460] sm:$0xff] }
 0x11e   :  { %v7327_v40 = vpop.f32.mrb[4].mxu0 }
 0x11f   :  { %v398_v41 = vpop.f32.mrb[5].mxu0  ;;  %660 = vmatmul.mubr.f32.gmra.mrb[110].mxu0 %v142_v38  ;;  %v175_v38 = vld [vmem:[%s10289_s0 + $0x478] sm:$0xff] }
 0x120   :  { %664 = vmatprep.mubr.f32.mxu0 %v145_v39 }
 0x122   :  { %v7335_v44 = vpop.f32.mrb[6].mxu0 }
 0x123   :  { %v403_v45 = vpop.f32.mrb[7].mxu0  ;;  %665 = vmatmul.mubr.f32.gmra.mrb[112].mxu0 %v144_v42  ;;  %v174_v42 = vld [vmem:[%s10289_s0 + $0x470] sm:$0xff] }
 0x124   :  { %669 = vmatprep.mubr.f32.mxu0 %v147_v43  ;;  %v177_v43 = vld [vmem:[%s10289_s0 + $0x488] sm:$0xff] }
 0x126   :  { %v7343_v48 = vpop.f32.mrb[8].mxu0 }
 0x127   :  { %v408_v49 = vpop.f32.mrb[9].mxu0  ;;  %670 = vmatmul.mubr.f32.gmra.mrb[114].mxu0 %v146_v46 }
 0x128   :  { %674 = vmatprep.mubr.f32.mxu0 %v149_v47  ;;  %v176_v47 = vld [vmem:[%s10289_s0 + $0x480] sm:$0xff]  ;;  %v179_v49 = vld [vmem:[%s10289_s0 + $0x498] sm:$0xff] }
 0x12a   :  { %v7351_v52 = vpop.f32.mrb[10].mxu0 }
 0x12b   :  { %v413_v53 = vpop.f32.mrb[11].mxu0  ;;  %675 = vmatmul.mubr.f32.gmra.mrb[116].mxu0 %v148_v50 }
 0x12c   :  { %679 = vmatprep.mubr.f32.mxu0 %v151_v51  ;;  %v178_v53 = vld [vmem:[%s10289_s0 + $0x490] sm:$0xff] }
 0x12e   :  { %v7359_v56 = vpop.f32.mrb[12].mxu0 }
 0x12f   :  { %v418_v57 = vpop.f32.mrb[13].mxu0  ;;  %680 = vmatmul.mubr.f32.gmra.mrb[118].mxu0 %v150_v54  ;;  %v181_v54 = vld [vmem:[%s10289_s0 + $0x4a8] sm:$0xff] }
 0x130   :  { %684 = vmatprep.mubr.f32.mxu0 %v153_v55 }
 0x132   :  { %v7367_v60 = vpop.f32.mrb[14].mxu0 }
 0x133   :  { %v423_v61 = vpop.f32.mrb[15].mxu0  ;;  %685 = vmatmul.mubr.f32.gmra.mrb[120].mxu0 %v152_v58  ;;  %v180_v58 = vld [vmem:[%s10289_s0 + $0x4a0] sm:$0xff] }
 0x134   :  { %689 = vmatprep.mubr.f32.mxu0 %v155_v59  ;;  %v183_v59 = vld [vmem:[%s10289_s0 + $0x4b8] sm:$0xff] }
 0x136   :  { %v7375_v1 = vpop.f32.mrb[16].mxu0 }
 0x137   :  { %v428_v2 = vpop.f32.mrb[17].mxu0  ;;  %690 = vmatmul.mubr.f32.gmra.mrb[122].mxu0 %v154_v62 }
 0x138   :  { %694 = vmatprep.mubr.f32.mxu0 %v157_v63  ;;  %v182_v63 = vld [vmem:[%s10289_s0 + $0x4b0] sm:$0xff]  ;;  %v185_v2 = vld [vmem:[%s10289_s0 + $0x4c8] sm:$0xff] }
 0x13a   :  { %v7383_v5 = vpop.f32.mrb[18].mxu0 }
 0x13b   :  { %v433_v6 = vpop.f32.mrb[19].mxu0  ;;  %695 = vmatmul.mubr.f32.gmra.mrb[124].mxu0 %v156_v3 }
 0x13c   :  { %699 = vmatprep.mubr.f32.mxu0 %v159_v4  ;;  %v184_v6 = vld [vmem:[%s10289_s0 + $0x4c0] sm:$0xff] }
 0x13e   :  { %v7391_v9 = vpop.f32.mrb[20].mxu0 }
 0x13f   :  { %v438_v10 = vpop.f32.mrb[21].mxu0  ;;  %700 = vmatmul.mubr.f32.gmra.mrb[126].mxu0 %v158_v7  ;;  %v187_v7 = vld [vmem:[%s10289_s0 + $0x4d8] sm:$0xff] }
 0x140   :  { %704 = vmatprep.mubr.f32.mxu0 %v161_v8 }
 0x142   :  { %v7399_v13 = vpop.f32.mrb[22].mxu0 }
 0x143   :  { %v443_v14 = vpop.f32.mrb[23].mxu0  ;;  %705 = vmatmul.mubr.f32.gmra.mrb[128].mxu0 %v160_v11  ;;  %v186_v11 = vld [vmem:[%s10289_s0 + $0x4d0] sm:$0xff] }
 0x144   :  { %709 = vmatprep.mubr.f32.mxu0 %v163_v12  ;;  %v189_v12 = vld [vmem:[%s10289_s0 + $0x4e8] sm:$0xff] }
 0x146   :  { %v7407_v17 = vpop.f32.mrb[24].mxu0 }
 0x147   :  { %v448_v18 = vpop.f32.mrb[25].mxu0  ;;  %710 = vmatmul.mubr.f32.gmra.mrb[130].mxu0 %v162_v15 }
 0x148   :  { %714 = vmatprep.mubr.f32.mxu0 %v165_v16  ;;  %v188_v16 = vld [vmem:[%s10289_s0 + $0x4e0] sm:$0xff]  ;;  %v191_v18 = vld [vmem:[%s10289_s0 + $0x4f8] sm:$0xff] }
 0x14a   :  { %v7415_v21 = vpop.f32.mrb[26].mxu0 }
 0x14b   :  { %v453_v22 = vpop.f32.mrb[27].mxu0  ;;  %715 = vmatmul.mubr.f32.gmra.mrb[132].mxu0 %v164_v19 }
 0x14c   :  { %719 = vmatprep.mubr.f32.mxu0 %v167_v20  ;;  %v190_v22 = vld [vmem:[%s10289_s0 + $0x4f0] sm:$0xff] }
 0x14e   :  { %v7423_v25 = vpop.f32.mrb[28].mxu0 }
 0x14f   :  { %v458_v26 = vpop.f32.mrb[29].mxu0  ;;  %720 = vmatmul.mubr.f32.gmra.mrb[134].mxu0 %v166_v23  ;;  %v193_v23 = vld [vmem:[%s10289_s0 + $0x508] sm:$0xff] }
 0x150   :  { %724 = vmatprep.mubr.f32.mxu0 %v169_v24 }
 0x152   :  { %v7431_v29 = vpop.f32.mrb[30].mxu0 }
 0x153   :  { %v463_v30 = vpop.f32.mrb[31].mxu0  ;;  %725 = vmatmul.mubr.f32.gmra.mrb[136].mxu0 %v168_v27  ;;  %v192_v27 = vld [vmem:[%s10289_s0 + $0x500] sm:$0xff] }
 0x154   :  { %729 = vmatprep.mubr.f32.mxu0 %v171_v28  ;;  %v195_v28 = vld [vmem:[%s10289_s0 + $0x518] sm:$0xff] }
 0x156   :  { %v7439_v34 = vpop.f32.mrb[32].mxu0 }
 0x157   :  { %10334 = vst [vmem:[#allocation2_spill] sm:$0xff] %v7439_v34  ;;  %v468_v35 = vpop.f32.mrb[33].mxu0  ;;  %730 = vmatmul.mubr.f32.gmra.mrb[138].mxu0 %v170_v31 }
 0x158   :  { %734 = vmatprep.mubr.f32.mxu0 %v173_v33  ;;  %v194_v33 = vld [vmem:[%s10289_s0 + $0x510] sm:$0xff]  ;;  %v197_v35 = vld [vmem:[%s10289_s0 + $0x528] sm:$0xff] }
 0x15a   :  { %v7447_v39 = vpop.f32.mrb[34].mxu0 }
 0x15b   :  { %10335 = vst [vmem:[#allocation3_spill] sm:$0xff] %v7447_v39  ;;  %v473_v41 = vpop.f32.mrb[35].mxu0  ;;  %735 = vmatmul.mubr.f32.gmra.mrb[140].mxu0 %v172_v37 }
 0x15c   :  { %739 = vmatprep.mubr.f32.mxu0 %v175_v38  ;;  %v196_v41 = vld [vmem:[%s10289_s0 + $0x520] sm:$0xff] }
 0x15e   :  { %v7455_v45 = vpop.f32.mrb[36].mxu0 }
 0x15f   :  { %10336 = vst [vmem:[#allocation4_spill] sm:$0xff] %v7455_v45  ;;  %v478_v46 = vpop.f32.mrb[37].mxu0  ;;  %740 = vmatmul.mubr.f32.gmra.mrb[142].mxu0 %v174_v42  ;;  %v199_v42 = vld [vmem:[%s10289_s0 + $0x538] sm:$0xff] }
 0x160   :  { %744 = vmatprep.mubr.f32.mxu0 %v177_v43 }
 0x162   :  { %v7463_v50 = vpop.f32.mrb[38].mxu0 }
 0x163   :  { %10337 = vst [vmem:[#allocation5_spill] sm:$0xff] %v7463_v50  ;;  %v483_v51 = vpop.f32.mrb[39].mxu0  ;;  %745 = vmatmul.mubr.f32.gmra.mrb[144].mxu0 %v176_v47  ;;  %v198_v47 = vld [vmem:[%s10289_s0 + $0x530] sm:$0xff] }
 0x164   :  { %749 = vmatprep.mubr.f32.mxu0 %v179_v49  ;;  %v201_v49 = vld [vmem:[%s10289_s0 + $0x548] sm:$0xff] }
 0x166   :  { %v7471_v55 = vpop.f32.mrb[40].mxu0 }
 0x167   :  { %10338 = vst [vmem:[#allocation6_spill] sm:$0xff] %v7471_v55  ;;  %v488_v57 = vpop.f32.mrb[41].mxu0  ;;  %750 = vmatmul.mubr.f32.gmra.mrb[146].mxu0 %v178_v53 }
 0x168   :  { %754 = vmatprep.mubr.f32.mxu0 %v181_v54  ;;  %v200_v54 = vld [vmem:[%s10289_s0 + $0x540] sm:$0xff]  ;;  %v203_v57 = vld [vmem:[%s10289_s0 + $0x558] sm:$0xff] }
 0x16a   :  { %v7479_v61 = vpop.f32.mrb[42].mxu0 }
 0x16b   :  { %10339 = vst [vmem:[#allocation7_spill] sm:$0xff] %v7479_v61  ;;  %v493_v62 = vpop.f32.mrb[43].mxu0  ;;  %755 = vmatmul.mubr.f32.gmra.mrb[148].mxu0 %v180_v58 }
 0x16c   :  { %759 = vmatprep.mubr.f32.mxu0 %v183_v59  ;;  %v202_v62 = vld [vmem:[%s10289_s0 + $0x550] sm:$0xff] }
 0x16e   :  { %v7487_v3 = vpop.f32.mrb[44].mxu0 }
 0x16f   :  { %10340 = vst [vmem:[#allocation8_spill] sm:$0xff] %v7487_v3  ;;  %v498_v4 = vpop.f32.mrb[45].mxu0  ;;  %760 = vmatmul.mubr.f32.gmra.mrb[150].mxu0 %v182_v63  ;;  %v205_v63 = vld [vmem:[%s10289_s0 + $0x568] sm:$0xff] }
 0x170   :  { %764 = vmatprep.mubr.f32.mxu0 %v185_v2 }
 0x172   :  { %v7495_v8 = vpop.f32.mrb[46].mxu0 }
 0x173   :  { %10341 = vst [vmem:[#allocation9_spill] sm:$0xff] %v7495_v8  ;;  %v503_v10 = vpop.f32.mrb[47].mxu0  ;;  %765 = vmatmul.mubr.f32.gmra.mrb[152].mxu0 %v184_v6 }
 0x174   :  { %769 = vmatprep.mubr.f32.mxu0 %v187_v7  ;;  %v204_v7 = vld [vmem:[%s10289_s0 + $0x560] sm:$0xff]  ;;  %v207_v10 = vld [vmem:[%s10289_s0 + $0x578] sm:$0xff] }
 0x176   :  { %v7503_v14 = vpop.f32.mrb[48].mxu0 }
 0x177   :  { %10342 = vst [vmem:[#allocation10_spill] sm:$0xff] %v7503_v14  ;;  %v508_v15 = vpop.f32.mrb[49].mxu0  ;;  %770 = vmatmul.mubr.f32.gmra.mrb[154].mxu0 %v186_v11  ;;  %v286_v14 = vld [vmem:[%s10289_s0 + $0x7f0] sm:$0xff] }
 0x178   :  { %774 = vmatprep.mubr.f32.mxu0 %v189_v12 }
 0x17a   :  { %v7511_v19 = vpop.f32.mrb[50].mxu0 }
 0x17b   :  { %10343 = vst [vmem:[#allocation11_spill] sm:$0xff] %v7511_v19  ;;  %v513_v20 = vpop.f32.mrb[51].mxu0  ;;  %775 = vmatmul.mubr.f32.gmra.mrb[156].mxu0 %v188_v16  ;;  %v206_v16 = vld [vmem:[%s10289_s0 + $0x570] sm:$0xff]  ;;  %v10361_v19 = vmov 0.0|0.0  }
 0x17c   :  { %779 = vmatprep.mubr.f32.mxu0 %v191_v18  ;;  %v209_v18 = vld [vmem:[%s10289_s0 + $0x588] sm:$0xff] }
 0x17e   :  { %v7519_v24 = vpop.f32.mrb[52].mxu0 }
 0x17f   :  { %10344 = vst [vmem:[#allocation12_spill] sm:$0xff] %v7519_v24  ;;  %v518_v26 = vpop.f32.mrb[53].mxu0  ;;  %780 = vmatmul.mubr.f32.gmra.mrb[158].mxu0 %v190_v22  ;;  %v284_v24 = vld [vmem:[%s10289_s0 + $0x7e0] sm:$0xff] }
 0x180   :  { %784 = vmatprep.mubr.f32.mxu0 %v193_v23  ;;  %v208_v26 = vld [vmem:[%s10289_s0 + $0x580] sm:$0xff] }
 0x182   :  { %v7527_v30 = vpop.f32.mrb[54].mxu0 }
 0x183   :  { %10345 = vst [vmem:[#allocation13_spill] sm:$0xff] %v7527_v30  ;;  %v523_v31 = vpop.f32.mrb[55].mxu0  ;;  %785 = vmatmul.mubr.f32.gmra.mrb[160].mxu0 %v192_v27  ;;  %v211_v27 = vld [vmem:[%s10289_s0 + $0x598] sm:$0xff] }
 0x184   :  { %789 = vmatprep.mubr.f32.mxu0 %v195_v28 }
 0x186   :  { %v7535_v37 = vpop.f32.mrb[56].mxu0 }
 0x187   :  { %10346 = vst [vmem:[#allocation14_spill] sm:$0xff] %v7535_v37  ;;  %v528_v38 = vpop.f32.mrb[57].mxu0  ;;  %790 = vmatmul.mubr.f32.gmra.mrb[162].mxu0 %v194_v33 }
 0x188   :  { %794 = vmatprep.mubr.f32.mxu0 %v197_v35  ;;  %v210_v35 = vld [vmem:[%s10289_s0 + $0x590] sm:$0xff]  ;;  %v213_v38 = vld [vmem:[%s10289_s0 + $0x5a8] sm:$0xff] }
 0x18a   :  { %v7543_v43 = vpop.f32.mrb[58].mxu0 }
 0x18b   :  { %10347 = vst [vmem:[#allocation15_spill] sm:$0xff] %v7543_v43  ;;  %v533_v46 = vpop.f32.mrb[59].mxu0  ;;  %795 = vmatmul.mubr.f32.gmra.mrb[164].mxu0 %v196_v41  ;;  %v279_v43 = vld [vmem:[%s10289_s0 + $0x7b8] sm:$0xff] }
 0x18c   :  { %799 = vmatprep.mubr.f32.mxu0 %v199_v42 }
 0x18e   :  { %v7551_v51 = vpop.f32.mrb[60].mxu0 }
 0x18f   :  { %10348 = vst [vmem:[#allocation16_spill] sm:$0xff] %v7551_v51  ;;  %v538_v53 = vpop.f32.mrb[61].mxu0  ;;  %800 = vmatmul.mubr.f32.gmra.mrb[166].mxu0 %v198_v47  ;;  %v212_v47 = vld [vmem:[%s10289_s0 + $0x5a0] sm:$0xff] }
 0x190   :  { %804 = vmatprep.mubr.f32.mxu0 %v201_v49  ;;  %v215_v49 = vld [vmem:[%s10289_s0 + $0x5b8] sm:$0xff] }
 0x192   :  { %v7559_v58 = vpop.f32.mrb[62].mxu0 }
 0x193   :  { %10349 = vst [vmem:[#allocation17_spill] sm:$0xff] %v7559_v58  ;;  %v543_v59 = vpop.f32.mrb[63].mxu0  ;;  %805 = vmatmul.mubr.f32.gmra.mrb[168].mxu0 %v200_v54 }
 0x194   :  { %809 = vmatprep.mubr.f32.mxu0 %v203_v57  ;;  %v214_v59 = vld [vmem:[%s10289_s0 + $0x5b0] sm:$0xff] }
 0x196   :  { %v7567_v2 = vpop.f32.mrb[64].mxu0 }
 0x197   :  { %v548_v6 = vpop.f32.mrb[65].mxu0  ;;  %810 = vmatmul.mubr.f32.gmra.mrb[170].mxu0 %v202_v62  ;;  %v217_v62 = vld [vmem:[%s10289_s0 + $0x5c8] sm:$0xff] }
 0x198   :  { %814 = vmatprep.mubr.f32.mxu0 %v205_v63 }
 0x19a   :  { %v7577_v11 = vpop.f32.mrb[66].mxu0 }
 0x19b   :  { %v553_v15 = vpop.f32.mrb[67].mxu0  ;;  %815 = vmatmul.mubr.f32.gmra.mrb[172].mxu0 %v204_v7 }
 0x19c   :  { %819 = vmatprep.mubr.f32.mxu0 %v207_v10  ;;  %v216_v10 = vld [vmem:[%s10289_s0 + $0x5c0] sm:$0xff]  ;;  %v219_v15 = vld [vmem:[%s10289_s0 + $0x5d8] sm:$0xff] }
 0x19e   :  { %v7587_v20 = vpop.f32.mrb[68].mxu0 }
 0x19f   :  { %v558_v23 = vpop.f32.mrb[69].mxu0  ;;  %820 = vmatmul.mubr.f32.gmra.mrb[174].mxu0 %v206_v16 }
 0x1a0   :  { %824 = vmatprep.mubr.f32.mxu0 %v209_v18 }
 0x1a2   :  { %v7597_v28 = vpop.f32.mrb[70].mxu0 }
 0x1a3   :  { %v563_v33 = vpop.f32.mrb[71].mxu0  ;;  %825 = vmatmul.mubr.f32.gmra.mrb[176].mxu0 %v208_v26  ;;  %v218_v26 = vld [vmem:[%s10289_s0 + $0x5d0] sm:$0xff] }
 0x1a4   :  { %829 = vmatprep.mubr.f32.mxu0 %v211_v27  ;;  %v221_v27 = vld [vmem:[%s10289_s0 + $0x5e8] sm:$0xff] }
 0x1a6   :  { %v7607_v41 = vpop.f32.mrb[72].mxu0 }
 0x1a7   :  { %v568_v46 = vpop.f32.mrb[73].mxu0  ;;  %830 = vmatmul.mubr.f32.gmra.mrb[178].mxu0 %v210_v35 }
 0x1a8   :  { %834 = vmatprep.mubr.f32.mxu0 %v213_v38  ;;  %v220_v46 = vld [vmem:[%s10289_s0 + $0x5e0] sm:$0xff] }
 0x1aa   :  { %v7617_v53 = vpop.f32.mrb[74].mxu0 }
 0x1ab   :  { %v573_v57 = vpop.f32.mrb[75].mxu0  ;;  %835 = vmatmul.mubr.f32.gmra.mrb[180].mxu0 %v212_v47  ;;  %v223_v47 = vld [vmem:[%s10289_s0 + $0x5f8] sm:$0xff] }
 0x1ac   :  { %839 = vmatprep.mubr.f32.mxu0 %v215_v49 }
 0x1ae   :  { %v7627_v63 = vpop.f32.mrb[76].mxu0 }
 0x1af   :  { %v578_v7 = vpop.f32.mrb[77].mxu0  ;;  %840 = vmatmul.mubr.f32.gmra.mrb[182].mxu0 %v214_v59 }
 0x1b0   :  { %844 = vmatprep.mubr.f32.mxu0 %v217_v62  ;;  %v222_v62 = vld [vmem:[%s10289_s0 + $0x5f0] sm:$0xff]  ;;  %v225_v7 = vld [vmem:[%s10289_s0 + $0x608] sm:$0xff] }
 0x1b2   :  { %v7637_v16 = vpop.f32.mrb[78].mxu0 }
 0x1b3   :  { %v583_v23 = vpop.f32.mrb[79].mxu0  ;;  %845 = vmatmul.mubr.f32.gmra.mrb[184].mxu0 %v216_v10 }
 0x1b4   :  { %849 = vmatprep.mubr.f32.mxu0 %v219_v15 }
 0x1b6   :  { %v7647_v33 = vpop.f32.mrb[80].mxu0 }
 0x1b7   :  { %v588_v38 = vpop.f32.mrb[81].mxu0  ;;  %850 = vmatmul.mubr.f32.gmra.mrb[186].mxu0 %v218_v26  ;;  %v224_v26 = vld [vmem:[%s10289_s0 + $0x600] sm:$0xff] }
 0x1b8   :  { %854 = vmatprep.mubr.f32.mxu0 %v221_v27  ;;  %v227_v27 = vld [vmem:[%s10289_s0 + $0x618] sm:$0xff] }
 0x1ba   :  { %v7657_v49 = vpop.f32.mrb[82].mxu0 }
 0x1bb   :  { %v593_v59 = vpop.f32.mrb[83].mxu0  ;;  %855 = vmatmul.mubr.f32.gmra.mrb[188].mxu0 %v220_v46 }
 0x1bc   :  { %859 = vmatprep.mubr.f32.mxu0 %v223_v47  ;;  %v226_v59 = vld [vmem:[%s10289_s0 + $0x610] sm:$0xff] }
 0x1be   :  { %v7667_v10 = vpop.f32.mrb[84].mxu0 }
 0x1bf   :  { %v598_v23 = vpop.f32.mrb[85].mxu0  ;;  %860 = vmatmul.mubr.f32.gmra.mrb[190].mxu0 %v222_v62  ;;  %v229_v62 = vld [vmem:[%s10289_s0 + $0x628] sm:$0xff] }
 0x1c0   :  { %864 = vmatprep.mubr.f32.mxu0 %v225_v7  ;;  %v257_v23 = vld [vmem:[%s10289_s0 + $0x708] sm:$0xff] }
 0x1c2   :  { %v7677_v38 = vpop.f32.mrb[86].mxu0 }
 0x1c3   :  { %v603_v47 = vpop.f32.mrb[87].mxu0  ;;  %865 = vmatmul.mubr.f32.gmra.mrb[192].mxu0 %v224_v26  ;;  %v228_v26 = vld [vmem:[%s10289_s0 + $0x620] sm:$0xff] }
 0x1c4   :  { %869 = vmatprep.mubr.f32.mxu0 %v227_v27  ;;  %v231_v27 = vld [vmem:[%s10289_s0 + $0x638] sm:$0xff] }
 0x1c6   :  { %v7687_v7 = vpop.f32.mrb[88].mxu0 }
 0x1c7   :  { %v608_v15 = vpop.f32.mrb[89].mxu0  ;;  %870 = vmatmul.mubr.f32.gmra.mrb[194].mxu0 %v226_v59  ;;  %v233_v59 = vld [vmem:[%s10289_s0 + $0x648] sm:$0xff] }
 0x1c8   :  { %874 = vmatprep.mubr.f32.mxu0 %v229_v62  ;;  %v230_v15 = vld [vmem:[%s10289_s0 + $0x630] sm:$0xff] }
 0x1ca   :  { %v7697_v47 = vpop.f32.mrb[90].mxu0 }
 0x1cb   :  { %v613_v57 = vpop.f32.mrb[91].mxu0  ;;  %875 = vmatmul.mubr.f32.gmra.mrb[196].mxu0 %v228_v26  ;;  %v235_v26 = vld [vmem:[%s10289_s0 + $0x658] sm:$0xff] }
 0x1cc   :  { %879 = vmatprep.mubr.f32.mxu0 %v231_v27  ;;  %v232_v57 = vld [vmem:[%s10289_s0 + $0x640] sm:$0xff] }
 0x1ce   :  { %v7707_v62 = vpop.f32.mrb[92].mxu0 }
 0x1cf   :  { %v618_v35 = vpop.f32.mrb[93].mxu0  ;;  %880 = vmatmul.mubr.f32.gmra.mrb[198].mxu0 %v230_v15  ;;  %v237_v15 = vld [vmem:[%s10289_s0 + $0x668] sm:$0xff] }
 0x1d0   :  { %884 = vmatprep.mubr.f32.mxu0 %v233_v59  ;;  %v234_v35 = vld [vmem:[%s10289_s0 + $0x650] sm:$0xff] }
 0x1d2   :  { %v7717_v27 = vpop.f32.mrb[94].mxu0 }
 0x1d3   :  { %v623_v18 = vpop.f32.mrb[95].mxu0  ;;  %885 = vmatmul.mubr.f32.gmra.mrb[200].mxu0 %v232_v57  ;;  %v239_v57 = vld [vmem:[%s10289_s0 + $0x678] sm:$0xff] }
 0x1d4   :  { %889 = vmatprep.mubr.f32.mxu0 %v235_v26  ;;  %v236_v18 = vld [vmem:[%s10289_s0 + $0x660] sm:$0xff] }
 0x1d6   :  { %v7727_v59 = vpop.f32.mrb[96].mxu0 }
 0x1d7   :  { %10350 = vst [vmem:[#allocation18_spill] sm:$0xff] %v7727_v59  ;;  %v628_v6 = vpop.f32.mrb[97].mxu0  ;;  %890 = vmatmul.mubr.f32.gmra.mrb[202].mxu0 %v234_v35  ;;  %v241_v35 = vld [vmem:[%s10289_s0 + $0x688] sm:$0xff] }
 0x1d8   :  { %894 = vmatprep.mubr.f32.mxu0 %v237_v15  ;;  %v238_v6 = vld [vmem:[%s10289_s0 + $0x670] sm:$0xff] }
 0x1da   :  { %v7737_v26 = vpop.f32.mrb[98].mxu0 }
 0x1db   :  { %10351 = vst [vmem:[#allocation19_spill] sm:$0xff] %v7737_v26  ;;  %v633_v54 = vpop.f32.mrb[99].mxu0  ;;  %895 = vmatmul.mubr.f32.gmra.mrb[204].mxu0 %v236_v18  ;;  %v243_v18 = vld [vmem:[%s10289_s0 + $0x698] sm:$0xff] }
 0x1dc   :  { %899 = vmatprep.mubr.f32.mxu0 %v239_v57  ;;  %v240_v54 = vld [vmem:[%s10289_s0 + $0x680] sm:$0xff] }
 0x1de   :  { %v7747_v15 = vpop.f32.mrb[100].mxu0 }
 0x1df   :  { %10352 = vst [vmem:[#allocation20_spill] sm:$0xff] %v7747_v15  ;;  %v638_v42 = vpop.f32.mrb[101].mxu0  ;;  %900 = vmatmul.mubr.f32.gmra.mrb[206].mxu0 %v238_v6  ;;  %v245_v6 = vld [vmem:[%s10289_s0 + $0x6a8] sm:$0xff] }
 0x1e0   :  { %904 = vmatprep.mubr.f32.mxu0 %v241_v35  ;;  %v242_v42 = vld [vmem:[%s10289_s0 + $0x690] sm:$0xff] }
 0x1e2   :  { %v7757_v57 = vpop.f32.mrb[102].mxu0 }
 0x1e3   :  { %10353 = vst [vmem:[#allocation21_spill] sm:$0xff] %v7757_v57  ;;  %v643_v31 = vpop.f32.mrb[103].mxu0  ;;  %905 = vmatmul.mubr.f32.gmra.mrb[208].mxu0 %v240_v54  ;;  %v247_v54 = vld [vmem:[%s10289_s0 + $0x6b8] sm:$0xff] }
 0x1e4   :  { %909 = vmatprep.mubr.f32.mxu0 %v243_v18  ;;  %v244_v31 = vld [vmem:[%s10289_s0 + $0x6a0] sm:$0xff] }
 0x1e6   :  { %v7767_v35 = vpop.f32.mrb[104].mxu0 }
 0x1e7   :  { %10354 = vst [vmem:[#allocation22_spill] sm:$0xff] %v7767_v35  ;;  %v648_v22 = vpop.f32.mrb[105].mxu0  ;;  %910 = vmatmul.mubr.f32.gmra.mrb[210].mxu0 %v242_v42  ;;  %v249_v42 = vld [vmem:[%s10289_s0 + $0x6c8] sm:$0xff] }
 0x1e8   :  { %914 = vmatprep.mubr.f32.mxu0 %v245_v6  ;;  %v246_v22 = vld [vmem:[%s10289_s0 + $0x6b0] sm:$0xff] }
 0x1ea   :  { %v7777_v18 = vpop.f32.mrb[106].mxu0 }
 0x1eb   :  { %10355 = vst [vmem:[#allocation23_spill] sm:$0xff] %v7777_v18  ;;  %v653_v12 = vpop.f32.mrb[107].mxu0  ;;  %915 = vmatmul.mubr.f32.gmra.mrb[212].mxu0 %v244_v31  ;;  %v251_v31 = vld [vmem:[%s10289_s0 + $0x6d8] sm:$0xff] }
 0x1ec   :  { %919 = vmatprep.mubr.f32.mxu0 %v247_v54  ;;  %v248_v12 = vld [vmem:[%s10289_s0 + $0x6c0] sm:$0xff] }
 0x1ee   :  { %v7787_v6 = vpop.f32.mrb[108].mxu0 }
 0x1ef   :  { %10356 = vst [vmem:[#allocation24_spill] sm:$0xff] %v7787_v6  ;;  %v658_v4 = vpop.f32.mrb[109].mxu0  ;;  %920 = vmatmul.mubr.f32.gmra.mrb[214].mxu0 %v246_v22  ;;  %v253_v22 = vld [vmem:[%s10289_s0 + $0x6e8] sm:$0xff] }
 0x1f0   :  { %924 = vmatprep.mubr.f32.mxu0 %v249_v42  ;;  %v250_v4 = vld [vmem:[%s10289_s0 + $0x6d0] sm:$0xff] }
 0x1f2   :  { %v7797_v54 = vpop.f32.mrb[110].mxu0 }
 0x1f3   :  { %10357 = vst [vmem:[#allocation25_spill] sm:$0xff] %v7797_v54  ;;  %v663_v0 = vpop.f32.mrb[111].mxu0  ;;  %925 = vmatmul.mubr.f32.gmra.mrb[216].mxu0 %v248_v12  ;;  %v255_v12 = vld [vmem:[%s10289_s0 + $0x6f8] sm:$0xff] }
 0x1f4   :  { %929 = vmatprep.mubr.f32.mxu0 %v251_v31  ;;  %v252_v0 = vld [vmem:[%s10289_s0 + $0x6e0] sm:$0xff] }
 0x1f6   :  { %v7807_v42 = vpop.f32.mrb[112].mxu0 }
 0x1f7   :  { %10358 = vst [vmem:[#allocation26_spill] sm:$0xff] %v7807_v42  ;;  %v668_v6 = vpop.f32.mrb[113].mxu0  ;;  %930 = vmatmul.mubr.f32.gmra.mrb[218].mxu0 %v250_v4  ;;  %v1192_v4 = vld [vmem:[%s10290_s3] sm:$0xff]  ;;  %v1194_v42 = vld [vmem:[%s10290_s3 + $0x10] sm:$0xff] }
 0x1f8   :  { %934 = vmatprep.mubr.f32.mxu0 %v253_v22  ;;  %v254_v6 = vld [vmem:[%s10289_s0 + $0x6f0] sm:$0xff]  ;;  %v1193_v22 = vld [vmem:[%s10290_s3 + $0x8] sm:$0xff] }
 0x1f9   :  { %v5997_v46 = vpack.c.bf16 %v1193_v22, %v1192_v4  ;;  %v1195_v4 = vld [vmem:[%s10290_s3 + $0x18] sm:$0xff]  ;;  %v260_v22 = vld [vmem:[%s10289_s0 + $0x720] sm:$0xff] }
 0x1fa   :  { %v7817_v31 = vpop.f32.mrb[114].mxu0 }
 0x1fb   :  { %10359 = vst [vmem:[#allocation27_spill] sm:$0xff] %v7817_v31  ;;  %v673_v54 = vpop.f32.mrb[115].mxu0  ;;  %935 = vmatmul.mubr.f32.gmra.mrb[220].mxu0 %v252_v0  ;;  %5998 = vmatpush3.bf16.msra.mxu1 %v5997_v46  ;;  %v256_v31 = vld [vmem:[%s10289_s0 + $0x700] sm:$0xff]  ;;  %v6000_v46 = vpack.c.bf16 %v1195_v4, %v1194_v42  ;;  %v258_v0 = vld [vmem:[%s10289_s0 + $0x710] sm:$0xff]  ;;  %v1197_v42 = vld [vmem:[%s10290_s3 + $0x28] sm:$0xff] }
 0x1fc   :  { %939 = vmatprep.mubr.f32.mxu0 %v255_v12  ;;  %5999 = vmatprep.subr.bf16.mxu1 %v10361_v19 }
 0x1fe   :  { %v7833_v54 = vpop.f32.mrb[116].mxu0 }
 0x1ff   :  { %10360 = vst [vmem:[#allocation28_spill] sm:$0xff] %v7833_v54  ;;  %v678_v12 = vpop.f32.mrb[117].mxu0  ;;  %940 = vmatmul.mubr.f32.gmra.mrb[222].mxu0 %v254_v6  ;;  %v259_v6 = vld [vmem:[%s10289_s0 + $0x718] sm:$0xff]  ;;  %6001 = vmatpush3.bf16.msra.mxu1 %v6000_v46  ;;  %v1196_v54 = vld [vmem:[%s10290_s3 + $0x20] sm:$0xff]  ;;  %v262_v46 = vld [vmem:[%s10289_s0 + $0x730] sm:$0xff] }
 0x200   :  { %944 = vmatprep.mubr.f32.mxu0 %v257_v23  ;;  %6002 = vmatprep.subr.bf16.mxu1 %v10361_v19  ;;  %v6003_v4 = vpack.c.bf16 %v1197_v42, %v1196_v54  ;;  %v1199_v54 = vld [vmem:[%s10290_s3 + $0x38] sm:$0xff] }
 0x202   :  { %v7850_v23 = vpop.f32.mrb[118].mxu0 }
 0x203   :  { %10362 = vst [vmem:[#allocation29_spill] sm:$0xff] %v7850_v23  ;;  %v683_v12 = vpop.f32.mrb[119].mxu0  ;;  %945 = vmatmul.mubr.f32.gmra.mrb[224].mxu0 %v256_v31  ;;  %v261_v31 = vld [vmem:[%s10289_s0 + $0x728] sm:$0xff]  ;;  %6004 = vmatpush3.bf16.msra.mxu1 %v6003_v4  ;;  %v1198_v23 = vld [vmem:[%s10290_s3 + $0x30] sm:$0xff]  ;;  %v264_v4 = vld [vmem:[%s10289_s0 + $0x740] sm:$0xff] }
 0x204   :  { %949 = vmatprep.mubr.f32.mxu0 %v259_v6  ;;  %6005 = vmatprep.subr.bf16.mxu1 %v10361_v19  ;;  %v6006_v42 = vpack.c.bf16 %v1199_v54, %v1198_v23  ;;  %v1201_v23 = vld [vmem:[%s10290_s3 + $0x48] sm:$0xff] }
 0x206   :  { %v7867_v6 = vpop.f32.mrb[120].mxu0 }
 0x207   :  { %10363 = vst [vmem:[#allocation30_spill] sm:$0xff] %v7867_v6  ;;  %v688_v12 = vpop.f32.mrb[121].mxu0  ;;  %950 = vmatmul.mubr.f32.gmra.mrb[226].mxu0 %v258_v0  ;;  %v263_v0 = vld [vmem:[%s10289_s0 + $0x738] sm:$0xff]  ;;  %6007 = vmatpush3.bf16.msra.mxu1 %v6006_v42  ;;  %v1200_v6 = vld [vmem:[%s10290_s3 + $0x40] sm:$0xff]  ;;  %v266_v42 = vld [vmem:[%s10289_s0 + $0x750] sm:$0xff] }
 0x208   :  { %954 = vmatprep.mubr.f32.mxu0 %v261_v31  ;;  %6008 = vmatprep.subr.bf16.mxu1 %v10361_v19  ;;  %v6009_v54 = vpack.c.bf16 %v1201_v23, %v1200_v6  ;;  %v1203_v6 = vld [vmem:[%s10290_s3 + $0x58] sm:$0xff] }
 0x20a   :  { %v7884_v31 = vpop.f32.mrb[122].mxu0 }
 0x20b   :  { %10364 = vst [vmem:[#allocation31_spill] sm:$0xff] %v7884_v31  ;;  %v693_v12 = vpop.f32.mrb[123].mxu0  ;;  %955 = vmatmul.mubr.f32.gmra.mrb[228].mxu0 %v260_v22  ;;  %v265_v22 = vld [vmem:[%s10289_s0 + $0x748] sm:$0xff]  ;;  %6010 = vmatpush3.bf16.msra.mxu1 %v6009_v54  ;;  %v1202_v31 = vld [vmem:[%s10290_s3 + $0x50] sm:$0xff] }
 0x20c   :  { %959 = vmatprep.mubr.f32.mxu0 %v263_v0  ;;  %6011 = vmatprep.subr.bf16.mxu1 %v10361_v19  ;;  %v6012_v23 = vpack.c.bf16 %v1203_v6, %v1202_v31  ;;  %v1205_v31 = vld [vmem:[%s10290_s3 + $0x68] sm:$0xff]  ;;  %v1206_v54 = vld [vmem:[%s10290_s3 + $0x70] sm:$0xff] }
 0x20e   :  { %v7901_v0 = vpop.f32.mrb[124].mxu0 }
 0x20f   :  { %10365 = vst [vmem:[#allocation32_spill] sm:$0xff] %v7901_v0  ;;  %v698_v12 = vpop.f32.mrb[125].mxu0  ;;  %960 = vmatmul.mubr.f32.gmra.mrb[230].mxu0 %v262_v46  ;;  %v267_v46 = vld [vmem:[%s10289_s0 + $0x758] sm:$0xff]  ;;  %6013 = vmatpush3.bf16.msra.mxu1 %v6012_v23  ;;  %v1204_v0 = vld [vmem:[%s10290_s3 + $0x60] sm:$0xff] }
 0x210   :  { %964 = vmatprep.mubr.f32.mxu0 %v265_v22  ;;  %6014 = vmatprep.subr.bf16.mxu1 %v10361_v19  ;;  %v6015_v6 = vpack.c.bf16 %v1205_v31, %v1204_v0  ;;  %v1207_v0 = vld [vmem:[%s10290_s3 + $0x78] sm:$0xff] }
 0x211   :  { %v6018_v31 = vpack.c.bf16 %v1207_v0, %v1206_v54  ;;  %v10312_v54 = vmov 0.0   ;;  %v272_v0 = vld [vmem:[%s10289_s0 + $0x780] sm:$0xff] }
 0x212   :  { %v7918_v22 = vpop.f32.mrb[126].mxu0  ;;  %4790 = vmatprep.mubr.msk.f32.mxu1 %vm6818_vm0, %v10312_v54  ;;  %v274_v54 = vld [vmem:[%s10289_s0 + $0x790] sm:$0xff] }
 0x213   :  { %10366 = vst [vmem:[#allocation33_spill] sm:$0xff] %v7918_v22  ;;  %v703_v12 = vpop.f32.mrb[127].mxu0  ;;  %965 = vmatmul.mubr.f32.gmra.mrb[232].mxu0 %v264_v4  ;;  %v269_v4 = vld [vmem:[%s10289_s0 + $0x768] sm:$0xff]  ;;  %6016 = vmatpush3.bf16.msra.mxu1 %v6015_v6 }
 0x214   :  { %969 = vmatprep.mubr.f32.mxu0 %v267_v46  ;;  %v268_v12 = vld [vmem:[%s10289_s0 + $0x760] sm:$0xff]  ;;  %6017 = vmatprep.subr.bf16.mxu1 %v10361_v19  ;;  %v273_v22 = vld [vmem:[%s10289_s0 + $0x788] sm:$0xff] }
 0x216   :  { %v7935_v46 = vpop.f32.mrb[128].mxu0 }
 0x217   :  { %v708_v23 = vpop.f32.mrb[129].mxu0  ;;  %970 = vmatmul.mubr.f32.gmra.mrb[234].mxu0 %v266_v42  ;;  %v271_v42 = vld [vmem:[%s10289_s0 + $0x778] sm:$0xff]  ;;  %6019 = vmatpush3.bf16.msra.mxu1 %v6018_v31 }
 0x218   :  { %974 = vmatprep.mubr.f32.mxu0 %v269_v4  ;;  %v270_v23 = vld [vmem:[%s10289_s0 + $0x770] sm:$0xff]  ;;  %6020 = vmatprep.subr.bf16.mxu1 %v10361_v19 }
 0x21a   :  { %v7950_v4 = vpop.f32.mrb[130].mxu0 }
 0x21b   :  { %v713_v6 = vpop.f32.mrb[131].mxu0  ;;  %975 = vmatmul.mubr.f32.gmra.mrb[236].mxu0 %v268_v12 }
 0x21c   :  { %979 = vmatprep.mubr.f32.mxu0 %v271_v42  ;;  %v275_v42 = vld [vmem:[%s10289_s0 + $0x798] sm:$0xff] }
 0x21e   :  { %v7959_v58 = vpop.f32.mrb[132].mxu0 }
 0x21f   :  { %v718_v12 = vpop.f32.mrb[133].mxu0  ;;  %980 = vmatmul.mubr.f32.gmra.mrb[238].mxu0 %v270_v23  ;;  %v1464_v23 = vld [vmem:[%s10290_s3 + $0x880] sm:$0xff] }
 0x220   :  { %984 = vmatprep.mubr.f32.mxu0 %v273_v22  ;;  %v277_v22 = vld [vmem:[%s10289_s0 + $0x7a8] sm:$0xff] }
 0x221   :  { %v1465_v12 = vld [vmem:[%s10290_s3 + $0x888] sm:$0xff] }
 0x222   :  { %v7969_v31 = vpop.f32.mrb[134].mxu0 }
 0x223   :  { %v723_v6 = vpop.f32.mrb[135].mxu0  ;;  %985 = vmatmul.mubr.f32.gmra.mrb[240].mxu0 %v272_v0  ;;  %v6405_v0 = vpack.c.bf16 %v1465_v12, %v1464_v23 }
 0x224   :  { %989 = vmatprep.mubr.f32.mxu0 %v275_v42  ;;  %v276_v6 = vld [vmem:[%s10289_s0 + $0x7a0] sm:$0xff] }
 0x225   :  { %6406 = vmatpush3.bf16.msra.mxu0 %v6405_v0  ;;  %v280_v0 = vld [vmem:[%s10289_s0 + $0x7c0] sm:$0xff] }
 0x226   :  { %v7983_v51 = vpop.f32.mrb[136].mxu0  ;;  %6407 = vmatprep.subr.bf16.mxu0 %v10361_v19 }
 0x227   :  { %v728_v42 = vpop.f32.mrb[137].mxu0  ;;  %990 = vmatmul.mubr.f32.gmra.mrb[242].mxu0 %v274_v54  ;;  %v278_v54 = vld [vmem:[%s10289_s0 + $0x7b0] sm:$0xff] }
 0x228   :  { %994 = vmatprep.mubr.f32.mxu0 %v277_v22  ;;  %v281_v22 = vld [vmem:[%s10289_s0 + $0x7c8] sm:$0xff] }
 0x22a   :  { %v7992_v37 = vpop.f32.mrb[138].mxu0 }
 0x22b   :  { %v733_v30 = vpop.f32.mrb[139].mxu0  ;;  %995 = vmatmul.mubr.f32.gmra.mrb[244].mxu0 %v276_v6  ;;  %v282_v6 = vld [vmem:[%s10289_s0 + $0x7d0] sm:$0xff] }
 0x22c   :  { %999 = vmatprep.mubr.f32.mxu0 %v279_v43  ;;  %v283_v30 = vld [vmem:[%s10289_s0 + $0x7d8] sm:$0xff] }
 0x22e   :  { %v8000_v23 = vpop.f32.mrb[140].mxu0 }
 0x22f   :  { %v738_v12 = vpop.f32.mrb[141].mxu0  ;;  %1000 = vmatmul.mubr.f32.gmra.mrb[246].mxu0 %v278_v54  ;;  %v285_v54 = vld [vmem:[%s10289_s0 + $0x7e8] sm:$0xff] }
 0x230   :  { %1004 = vmatprep.mubr.f32.mxu0 %v281_v22 }
 0x232   :  { %v8008_v43 = vpop.f32.mrb[142].mxu0 }
 0x233   :  { %v743_v42 = vpop.f32.mrb[143].mxu0  ;;  %1005 = vmatmul.mubr.f32.gmra.mrb[248].mxu0 %v280_v0  ;;  %v287_v0 = vld [vmem:[%s10289_s0 + $0x7f8] sm:$0xff] }
 0x234   :  { %1009 = vmatprep.mubr.f32.mxu0 %v283_v30 }
 0x236   :  { %v8016_v22 = vpop.f32.mrb[144].mxu0 }
 0x237   :  { %v748_v12 = vpop.f32.mrb[145].mxu0  ;;  %1010 = vmatmul.mubr.f32.gmra.mrb[250].mxu0 %v282_v6 }
 0x238   :  { %1014 = vmatprep.mubr.f32.mxu0 %v285_v54  ;;  %v10367_v54 = vmov 0.0  }
 0x23a   :  { %v8024_v30 = vpop.f32.mrb[146].mxu0 }
 0x23b   :  { %v753_v42 = vpop.f32.mrb[147].mxu0  ;;  %1015 = vmatmul.mubr.f32.gmra.mrb[252].mxu0 %v284_v24 }
 0x23c   :  { %1019 = vmatprep.mubr.f32.mxu0 %v287_v0  ;;  %v1466_v42 = vld [vmem:[%s10290_s3 + $0x890] sm:$0xff]  ;;  %v1467_v0 = vld [vmem:[%s10290_s3 + $0x898] sm:$0xff] }
 0x23d   :  { %v6408_v61 = vpack.c.bf16 %v1467_v0, %v1466_v42  ;;  %v1471_v42 = vld [vmem:[%s10290_s3 + $0x8b8] sm:$0xff] }
 0x23e   :  { %v8029_v12 = vpop.f32.mrb[148].mxu0 }
 0x23f   :  { %v758_v6 = vpop.f32.mrb[149].mxu0  ;;  %1020 = vmatmul.mubr.f32.gmra.mrb[254].mxu0 %v286_v14  ;;  %v1468_v14 = vld [vmem:[%s10290_s3 + $0x8a0] sm:$0xff] }
 0x240   :  { %5385 = vmatprep.mubr.msk.f32.mxu0 %vm6818_vm0, %v10367_v54  ;;  %6409 = vmatpush3.bf16.msra.mxu0 %v6408_v61 }
 0x241   :  { %6410 = vmatprep.subr.bf16.mxu0 %v10361_v19 }
 0x242   :  { %v8033_v8 = vpop.f32.mrb[150].mxu0 }
 0x243   :  { %v763_v3 = vpop.f32.mrb[151].mxu0 }
 0x244   :  { %v1469_v3 = vld [vmem:[%s10290_s3 + $0x8a8] sm:$0xff] }
 0x245   :  { %v6411_v55 = vpack.c.bf16 %v1469_v3, %v1468_v14  ;;  %v1473_v14 = vld [vmem:[%s10290_s3 + $0x8c8] sm:$0xff] }
 0x246   :  { %v8038_v24 = vpop.f32.mrb[152].mxu0 }
 0x247   :  { %v768_v18 = vpop.f32.mrb[153].mxu0  ;;  %6412 = vmatpush3.bf16.msra.mxu0 %v6411_v55 }
 0x248   :  { %v1470_v18 = vld [vmem:[%s10290_s3 + $0x8b0] sm:$0xff]  ;;  %6413 = vmatprep.subr.bf16.mxu0 %v10361_v19 }
 0x249   :  { %v6414_v57 = vpack.c.bf16 %v1471_v42, %v1470_v18  ;;  %v1474_v18 = vld [vmem:[%s10290_s3 + $0x8d0] sm:$0xff]  ;;  %v1475_v42 = vld [vmem:[%s10290_s3 + $0x8d8] sm:$0xff] }
 0x24a   :  { %v8046_v6 = vpop.f32.mrb[154].mxu0  ;;  %v6420_v15 = vpack.c.bf16 %v1475_v42, %v1474_v18  ;;  %v1478_v18 = vld [vmem:[%s10290_s3 + $0x8f0] sm:$0xff]  ;;  %v1479_v42 = vld [vmem:[%s10290_s3 + $0x8f8] sm:$0xff] }
 0x24b   :  { %v773_v35 = vpop.f32.mrb[155].mxu0  ;;  %6415 = vmatpush3.bf16.msra.mxu0 %v6414_v57  ;;  %v6426_v26 = vpack.c.bf16 %v1479_v42, %v1478_v18 }
 0x24c   :  { %v1472_v35 = vld [vmem:[%s10290_s3 + $0x8c0] sm:$0xff]  ;;  %6416 = vmatprep.subr.bf16.mxu0 %v10361_v19 }
 0x24d   :  { %v6417_v50 = vpack.c.bf16 %v1473_v14, %v1472_v35  ;;  %v1476_v35 = vld [vmem:[%s10290_s3 + $0x8e0] sm:$0xff]  ;;  %v1477_v14 = vld [vmem:[%s10290_s3 + $0x8e8] sm:$0xff] }
 0x24e   :  { %v8055_v61 = vpop.f32.mrb[156].mxu0  ;;  %v6423_v45 = vpack.c.bf16 %v1477_v14, %v1476_v35 }
 0x24f   :  { %v778_v0 = vpop.f32.mrb[157].mxu0  ;;  %6418 = vmatpush3.bf16.msra.mxu0 %v6417_v50 }
 0x250   :  { %6419 = vmatprep.subr.bf16.mxu0 %v10361_v19 }
 0x252   :  { %v8064_v55 = vpop.f32.mrb[158].mxu0 }
 0x253   :  { %v783_v3 = vpop.f32.mrb[159].mxu0  ;;  %6421 = vmatpush3.bf16.msra.mxu0 %v6420_v15 }
 0x254   :  { %6422 = vmatprep.subr.bf16.mxu0 %v10361_v19 }
 0x256   :  { %v8073_v57 = vpop.f32.mrb[160].mxu0 }
 0x257   :  { %10368 = vst [vmem:[#allocation34_spill] sm:$0xff] %v8073_v57  ;;  %v788_v0 = vpop.f32.mrb[161].mxu0  ;;  %6424 = vmatpush3.bf16.msra.mxu0 %v6423_v45 }
 0x258   :  { %6425 = vmatprep.subr.bf16.mxu0 %v10361_v19 }
 0x25a   :  { %v8082_v50 = vpop.f32.mrb[162].mxu0 }
 0x25b   :  { %10369 = vst [vmem:[#allocation35_spill] sm:$0xff] %v8082_v50  ;;  %v793_v3 = vpop.f32.mrb[163].mxu0  ;;  %6427 = vmatpush3.bf16.msra.mxu0 %v6426_v26 }
 0x25c   :  { %6452 = vmatprep.subr.bf16.mxu0 %v10361_v19 }
 0x25e   :  { %v8091_v15 = vpop.f32.mrb[164].mxu0 }
 0x25f   :  { %10370 = vst [vmem:[#allocation36_spill] sm:$0xff] %v8091_v15  ;;  %v798_v0 = vpop.f32.mrb[165].mxu0 }
 0x262   :  { %v8097_v39 = vpop.f32.mrb[166].mxu0 }
 0x263   :  { %10371 = vst [vmem:[#allocation37_spill] sm:$0xff] %v8097_v39  ;;  %v803_v45 = vpop.f32.mrb[167].mxu0 }
 0x266   :  { %v8100_v35 = vpop.f32.mrb[168].mxu0 }
 0x267   :  { %10372 = vst [vmem:[#allocation38_spill] sm:$0xff] %v8100_v35  ;;  %v808_v14 = vpop.f32.mrb[169].mxu0 }
 0x26a   :  { %v8102_v3 = vpop.f32.mrb[170].mxu0 }
 0x26b   :  { %10373 = vst [vmem:[#allocation39_spill] sm:$0xff] %v8102_v3  ;;  %v813_v15 = vpop.f32.mrb[171].mxu0 }
 0x26e   :  { %v8104_v50 = vpop.f32.mrb[172].mxu0 }
 0x26f   :  { %10374 = vst [vmem:[#allocation40_spill] sm:$0xff] %v8104_v50  ;;  %v818_v59 = vpop.f32.mrb[173].mxu0 }
 0x272   :  { %v8106_v34 = vpop.f32.mrb[174].mxu0 }
 0x273   :  { %10375 = vst [vmem:[#allocation41_spill] sm:$0xff] %v8106_v34  ;;  %v823_v57 = vpop.f32.mrb[175].mxu0 }
 0x276   :  { %v8108_v0 = vpop.f32.mrb[176].mxu0 }
 0x277   :  { %10376 = vst [vmem:[#allocation42_spill] sm:$0xff] %v8108_v0  ;;  %v828_v26 = vpop.f32.mrb[177].mxu0 }
 0x27a   :  { %v8110_v18 = vpop.f32.mrb[178].mxu0 }
 0x27b   :  { %10377 = vst [vmem:[#allocation43_spill] sm:$0xff] %v8110_v18  ;;  %v833_v42 = vpop.f32.mrb[179].mxu0 }
 0x27e   :  { %v8112_v39 = vpop.f32.mrb[180].mxu0 }
 0x27f   :  { %10378 = vst [vmem:[#allocation44_spill] sm:$0xff] %v8112_v39  ;;  %v838_v45 = vpop.f32.mrb[181].mxu0 }
 0x280   :  { %v8128_v45 = vld [vmem:[%s10291_s2] ss:$0 sm:$0xff] }
 0x282   :  { %v8114_v35 = vpop.f32.mrb[182].mxu0 }
 0x283   :  { %v843_v14 = vpop.f32.mrb[183].mxu0 }
 0x284   :  { %v10382_v14 = vmax.f32 %v7311_v32, %v7567_v2 }
 0x286   :  { %v8116_v3 = vpop.f32.mrb[184].mxu0 }
 0x287   :  { %v848_v15 = vpop.f32.mrb[185].mxu0 }
 0x28a   :  { %v8118_v50 = vpop.f32.mrb[186].mxu0 }
 0x28b   :  { %10379 = vst [vmem:[#allocation45_spill] sm:$0xff] %v8118_v50  ;;  %v853_v59 = vpop.f32.mrb[187].mxu0 }
 0x28c   :  { %v1208_v59 = vld [vmem:[%s10290_s3 + $0x80] sm:$0xff] }
 0x28e   :  { %v8120_v34 = vpop.f32.mrb[188].mxu0 }
 0x28f   :  { %10380 = vst [vmem:[#allocation46_spill] sm:$0xff] %v8120_v34  ;;  %v858_v57 = vpop.f32.mrb[189].mxu0  ;;  %v10383_v34 = vmax.f32 %v7319_v36, %v7577_v11  ;;  %v10384_v36 = vmax.f32 %v7327_v40, %v7587_v20  ;;  %v1212_v11 = vld [vmem:[%s10290_s3 + $0xa0] sm:$0xff]  ;;  %v10385_v40 = vmax.f32 %v7335_v44, %v7597_v28  ;;  %v10386_v44 = vmax.f32 %v7343_v48, %v7607_v41 }
 0x290   :  { %v1209_v57 = vld [vmem:[%s10290_s3 + $0x88] sm:$0xff]  ;;  %v10387_v48 = vmax.f32 %v7351_v52, %v7617_v53  ;;  %v10388_v52 = vmax.f32 %v7359_v56, %v7627_v63  ;;  %v10389_v56 = vmax.f32 %v7367_v60, %v7637_v16  ;;  %v10390_v16 = vmax.f32 %v7375_v1, %v7647_v33 }
 0x291   :  { %v10391_v1 = vmax.f32 %v7383_v5, %v7657_v49  ;;  %v10392_v5 = vmax.f32 %v7391_v9, %v7667_v10  ;;  %v10393_v9 = vmax.f32 %v7399_v13, %v7677_v38  ;;  %v10394_v13 = vmax.f32 %v7407_v17, %v7687_v7 }
 0x292   :  { %v8122_v0 = vpop.f32.mrb[190].mxu0  ;;  %v10395_v17 = vmax.f32 %v7415_v21, %v7697_v47  ;;  %v10396_v21 = vmax.f32 %v7423_v25, %v7707_v62  ;;  %v10397_v25 = vmax.f32 %v7431_v29, %v7717_v27  ;;  %v10399_v27 = vld [vmem:[#allocation2_spill] sm:$0xff] }
 0x293   :  { %10381 = vst [vmem:[#allocation47_spill] sm:$0xff] %v8122_v0  ;;  %v863_v26 = vpop.f32.mrb[191].mxu0  ;;  %v6021_v0 = vpack.c.bf16 %v1209_v57, %v1208_v59 }
 0x296   :  { %v866_v18 = vpop.f32.mrb[192].mxu0 }
 0x297   :  { %v1057_v42 = vmax.f32 %v7935_v46, %v866_v18  ;;  %v868_v39 = vpop.f32.mrb[193].mxu0 }
 0x299   :  { %v1089_v15 = vmax.f32 %v10382_v14, %v1057_v42  ;;  %v1210_v42 = vld [vmem:[%s10290_s3 + $0x90] sm:$0xff]  ;;  %v1211_v14 = vld [vmem:[%s10290_s3 + $0x98] sm:$0xff] }
 0x29a   :  { %v871_v26 = vpop.f32.mrb[194].mxu0  ;;  %v6024_v59 = vpack.c.bf16 %v1211_v14, %v1210_v42  ;;  %v1216_v14 = vld [vmem:[%s10290_s3 + $0xc0] sm:$0xff] }
 0x29b   :  { %v1058_v39 = vmax.f32 %v7950_v4, %v871_v26  ;;  %v873_v46 = vpop.f32.mrb[195].mxu0  ;;  %v1128_v18 = vadd.f32 %v8128_v45, %v1089_v15 }
 0x29c   :  { %v1215_v46 = vld [vmem:[%s10290_s3 + $0xb8] sm:$0xff] }
 0x29d   :  { %v8144_v32 = vmax.f32 %v10383_v34, %v1058_v39  ;;  %v1160_v2 = vmax.f32 %v1128_v18, 0.0  ;;  %v1214_v39 = vld [vmem:[%s10290_s3 + $0xb0] sm:$0xff] }
 0x29e   :  { %v876_v50 = vpop.f32.mrb[196].mxu0  ;;  %v6030_v42 = vpack.c.bf16 %v1215_v46, %v1214_v39 }
 0x29f   :  { %v1059_v4 = vmax.f32 %v7959_v58, %v876_v50  ;;  %4791 = vmatmul.mubr.f32.vlgmr.msra.gmra.mrb[0].mxu1 %v1160_v2  ;;  %v878_v15 = vpop.f32.mrb[197].mxu0  ;;  %v1213_v58 = vld [vmem:[%s10290_s3 + $0xa8] sm:$0xff]  ;;  %v1129_v60 = vadd.f32 %v8128_v45, %v8144_v32 }
 0x2a0   :  { %6022 = vmatpush3.bf16.msra.mxu1 %v6021_v0  ;;  %4825 = vmatprep.mubr.msk.f32.mxu1 %vm6818_vm0, %v10367_v54  ;;  %v6027_v26 = vpack.c.bf16 %v1213_v58, %v1212_v11  ;;  %v1218_v11 = vld [vmem:[%s10290_s3 + $0xd0] sm:$0xff]  ;;  %v1219_v58 = vld [vmem:[%s10290_s3 + $0xd8] sm:$0xff] }
 0x2a1   :  { %v8158_v34 = vmax.f32 %v10384_v36, %v1059_v4  ;;  %6023 = vmatprep.subr.bf16.mxu1 %v10361_v19  ;;  %v1217_v4 = vld [vmem:[%s10290_s3 + $0xc8] sm:$0xff] }
 0x2a2   :  { %v881_v50 = vpop.f32.mrb[198].mxu0  ;;  %v6033_v36 = vpack.c.bf16 %v1217_v4, %v1216_v14 }
 0x2a3   :  { %v1060_v0 = vmax.f32 %v7969_v31, %v881_v50  ;;  %v883_v57 = vpop.f32.mrb[199].mxu0  ;;  %v1130_v29 = vadd.f32 %v8128_v45, %v8158_v34 }
 0x2a4   :  { %6025 = vmatpush3.bf16.msra.mxu1 %v6024_v59  ;;  %v6036_v57 = vpack.c.bf16 %v1219_v58, %v1218_v11  ;;  %v1226_v11 = vld [vmem:[%s10290_s3 + $0x110] sm:$0xff]  ;;  %v1227_v58 = vld [vmem:[%s10290_s3 + $0x118] sm:$0xff] }
 0x2a5   :  { %v8171_v20 = vmax.f32 %v10385_v40, %v1060_v0  ;;  %6026 = vmatprep.subr.bf16.mxu1 %v10361_v19  ;;  %v1221_v40 = vld [vmem:[%s10290_s3 + $0xe8] sm:$0xff] }
 0x2a6   :  { %v886_v18 = vpop.f32.mrb[200].mxu0 }
 0x2a7   :  { %v1061_v31 = vmax.f32 %v7983_v51, %v886_v18  ;;  %v888_v2 = vpop.f32.mrb[201].mxu0 }
 0x2a8   :  { %6028 = vmatpush3.bf16.msra.mxu1 %v6027_v26  ;;  %v1220_v26 = vld [vmem:[%s10290_s3 + $0xe0] sm:$0xff]  ;;  %v1223_v2 = vld [vmem:[%s10290_s3 + $0xf8] sm:$0xff] }
 0x2a9   :  { %v8184_v28 = vmax.f32 %v10386_v44, %v1061_v31  ;;  %6029 = vmatprep.subr.bf16.mxu1 %v10361_v19  ;;  %v6039_v18 = vpack.c.bf16 %v1221_v40, %v1220_v26  ;;  %v1222_v31 = vld [vmem:[%s10290_s3 + $0xf0] sm:$0xff] }
 0x2aa   :  { %v891_v15 = vpop.f32.mrb[202].mxu0  ;;  %v6042_v14 = vpack.c.bf16 %v1223_v2, %v1222_v31  ;;  %v1232_v2 = vld [vmem:[%s10290_s3 + $0x140] sm:$0xff] }
 0x2ab   :  { %v1062_v51 = vmax.f32 %v7992_v37, %v891_v15  ;;  %v893_v59 = vpop.f32.mrb[203].mxu0  ;;  %v1224_v15 = vld [vmem:[%s10290_s3 + $0x100] sm:$0xff] }
 0x2ac   :  { %6031 = vmatpush3.bf16.msra.mxu1 %v6030_v42 }
 0x2ad   :  { %v8197_v41 = vmax.f32 %v10387_v48, %v1062_v51  ;;  %6032 = vmatprep.subr.bf16.mxu1 %v10361_v19  ;;  %v1161_v48 = vmax.f32 %v1129_v60, 0.0  ;;  %v1234_v60 = vld [vmem:[%s10290_s3 + $0x150] sm:$0xff] }
 0x2ae   :  { %v896_v50 = vpop.f32.mrb[204].mxu0 }
 0x2af   :  { %v1063_v37 = vmax.f32 %v8000_v23, %v896_v50  ;;  %v898_v0 = vpop.f32.mrb[205].mxu0 }
 0x2b0   :  { %6034 = vmatpush3.bf16.msra.mxu1 %v6033_v36  ;;  %v6048_v0 = vpack.c.bf16 %v1227_v58, %v1226_v11  ;;  %v1238_v11 = vld [vmem:[%s10290_s3 + $0x170] sm:$0xff]  ;;  %v1239_v58 = vld [vmem:[%s10290_s3 + $0x178] sm:$0xff] }
 0x2b1   :  { %v8210_v53 = vmax.f32 %v10388_v52, %v1063_v37  ;;  %6035 = vmatprep.subr.bf16.mxu1 %v10361_v19 }
 0x2b2   :  { %v901_v39 = vpop.f32.mrb[206].mxu0 }
 0x2b3   :  { %v1064_v23 = vmax.f32 %v8008_v43, %v901_v39  ;;  %v903_v46 = vpop.f32.mrb[207].mxu0 }
 0x2b4   :  { %6037 = vmatpush3.bf16.msra.mxu1 %v6036_v57  ;;  %v1228_v57 = vld [vmem:[%s10290_s3 + $0x120] sm:$0xff]  ;;  %v1231_v46 = vld [vmem:[%s10290_s3 + $0x138] sm:$0xff] }
 0x2b5   :  { %v8223_v63 = vmax.f32 %v10389_v56, %v1064_v23  ;;  %6038 = vmatprep.subr.bf16.mxu1 %v10361_v19  ;;  %v1230_v23 = vld [vmem:[%s10290_s3 + $0x130] sm:$0xff] }
 0x2b6   :  { %v906_v42 = vpop.f32.mrb[208].mxu0  ;;  %v6054_v31 = vpack.c.bf16 %v1231_v46, %v1230_v23  ;;  %v1242_v46 = vld [vmem:[%s10290_s3 + $0x190] sm:$0xff] }
 0x2b7   :  { %v1065_v43 = vmax.f32 %v8016_v22, %v906_v42  ;;  %v908_v44 = vpop.f32.mrb[209].mxu0  ;;  %v1225_v22 = vld [vmem:[%s10290_s3 + $0x108] sm:$0xff] }
 0x2b8   :  { %6040 = vmatpush3.bf16.msra.mxu1 %v6039_v18  ;;  %v6045_v32 = vpack.c.bf16 %v1225_v22, %v1224_v15  ;;  %v1233_v42 = vld [vmem:[%s10290_s3 + $0x148] sm:$0xff] }
 0x2b9   :  { %v8238_v4 = vmax.f32 %v10390_v16, %v1065_v43  ;;  %6041 = vmatprep.subr.bf16.mxu1 %v10361_v19  ;;  %v1235_v16 = vld [vmem:[%s10290_s3 + $0x158] sm:$0xff] }
 0x2ba   :  { %v911_v51 = vpop.f32.mrb[210].mxu0 }
 0x2bb   :  { %v1066_v59 = vmax.f32 %v8024_v30, %v911_v51  ;;  %v913_v36 = vpop.f32.mrb[211].mxu0  ;;  %v6060_v51 = vpack.c.bf16 %v1235_v16, %v1234_v60 }
 0x2bc   :  { %6043 = vmatpush3.bf16.msra.mxu1 %v6042_v14  ;;  %v6057_v14 = vpack.c.bf16 %v1233_v42, %v1232_v2  ;;  %v1237_v36 = vld [vmem:[%s10290_s3 + $0x168] sm:$0xff]  ;;  %v1243_v2 = vld [vmem:[%s10290_s3 + $0x198] sm:$0xff]  ;;  %v1496_v42 = vld [vmem:[%s10290_s3 + $0x980] sm:$0xff] }
 0x2bd   :  { %v8251_v33 = vmax.f32 %v10391_v1, %v1066_v59  ;;  %6044 = vmatprep.subr.bf16.mxu1 %v10361_v19  ;;  %v1236_v59 = vld [vmem:[%s10290_s3 + $0x160] sm:$0xff]  ;;  %v6072_v16 = vpack.c.bf16 %v1243_v2, %v1242_v46  ;;  %v1502_v2 = vld [vmem:[%s10290_s3 + $0x9b0] sm:$0xff] }
 0x2be   :  { %v916_v30 = vpop.f32.mrb[212].mxu0  ;;  %v6063_v1 = vpack.c.bf16 %v1237_v36, %v1236_v59  ;;  %v1248_v46 = vld [vmem:[%s10290_s3 + $0x1c0] sm:$0xff] }
 0x2bf   :  { %v1067_v50 = vmax.f32 %v8029_v12, %v916_v30  ;;  %4826 = vmatmul.mubr.f32.vlgmr.msra.gmra.mrb[2].mxu1 %v1161_v48  ;;  %v918_v37 = vpop.f32.mrb[213].mxu0  ;;  %v1229_v12 = vld [vmem:[%s10290_s3 + $0x128] sm:$0xff] }
 0x2c0   :  { %6046 = vmatpush3.bf16.msra.mxu1 %v6045_v32  ;;  %4860 = vmatprep.mubr.msk.f32.mxu1 %vm6818_vm0, %v10367_v54  ;;  %v6051_v39 = vpack.c.bf16 %v1229_v12, %v1228_v57 }
 0x2c1   :  { %v8266_v49 = vmax.f32 %v10392_v5, %v1067_v50  ;;  %6047 = vmatprep.subr.bf16.mxu1 %v10361_v19  ;;  %v10400_v5 = vld [vmem:[#allocation18_spill] sm:$0xff] }
 0x2c2   :  { %v921_v52 = vpop.f32.mrb[214].mxu0  ;;  %v10401_v57 = vmax.f32 %v10399_v27, %v10400_v5  ;;  %v1247_v5 = vld [vmem:[%s10290_s3 + $0x1b8] sm:$0xff] }
 0x2c3   :  { %v1068_v26 = vmax.f32 %v8033_v8, %v921_v52  ;;  %v923_v40 = vpop.f32.mrb[215].mxu0  ;;  %v1240_v52 = vld [vmem:[%s10290_s3 + $0x180] sm:$0xff] }
 0x2c4   :  { %6049 = vmatpush3.bf16.msra.mxu1 %v6048_v0  ;;  %v6066_v0 = vpack.c.bf16 %v1239_v58, %v1238_v11 }
 0x2c5   :  { %v8279_v10 = vmax.f32 %v10393_v9, %v1068_v26  ;;  %6050 = vmatprep.subr.bf16.mxu1 %v10361_v19  ;;  %v1241_v26 = vld [vmem:[%s10290_s3 + $0x188] sm:$0xff] }
 0x2c6   :  { %v926_v18 = vpop.f32.mrb[216].mxu0  ;;  %v6069_v34 = vpack.c.bf16 %v1241_v26, %v1240_v52  ;;  %v1501_v52 = vld [vmem:[%s10290_s3 + $0x9a8] sm:$0xff] }
 0x2c7   :  { %v1069_v8 = vmax.f32 %v8038_v24, %v926_v18  ;;  %v928_v56 = vpop.f32.mrb[217].mxu0  ;;  %v1162_v18 = vmax.f32 %v1130_v29, 0.0 }
 0x2c8   :  { %6052 = vmatpush3.bf16.msra.mxu1 %v6051_v39  ;;  %v10402_v39 = vld [vmem:[#allocation35_spill] sm:$0xff] }
 0x2c9   :  { %v8292_v38 = vmax.f32 %v10394_v13, %v1069_v8  ;;  %6053 = vmatprep.subr.bf16.mxu1 %v10361_v19  ;;  %v10403_v8 = vld [vmem:[#allocation3_spill] sm:$0xff] }
 0x2ca   :  { %v931_v43 = vpop.f32.mrb[218].mxu0  ;;  %v10404_v56 = vld [vmem:[#allocation19_spill] sm:$0xff] }
 0x2cb   :  { %v1070_v24 = vmax.f32 %v8046_v6, %v931_v43  ;;  %v933_v44 = vpop.f32.mrb[219].mxu0  ;;  %v1497_v43 = vld [vmem:[%s10290_s3 + $0x988] sm:$0xff] }
 0x2cc   :  { %6055 = vmatpush3.bf16.msra.mxu1 %v6054_v31  ;;  %v10405_v31 = vmax.f32 %v10403_v8, %v10404_v56  ;;  %v10416_v8 = vld [vmem:[#allocation22_spill] sm:$0xff] }
 0x2cd   :  { %v8305_v7 = vmax.f32 %v10395_v17, %v1070_v24  ;;  %6056 = vmatprep.subr.bf16.mxu1 %v10361_v19 }
 0x2ce   :  { %v936_v15 = vpop.f32.mrb[220].mxu0 }
 0x2cf   :  { %v1071_v6 = vmax.f32 %v8055_v61, %v936_v15  ;;  %v938_v22 = vpop.f32.mrb[221].mxu0  ;;  %v6453_v15 = vpack.c.bf16 %v1497_v43, %v1496_v42  ;;  %v1503_v42 = vld [vmem:[%s10290_s3 + $0x9b8] sm:$0xff] }
 0x2d0   :  { %6058 = vmatpush3.bf16.msra.mxu1 %v6057_v14  ;;  %v10406_v14 = vld [vmem:[#allocation36_spill] sm:$0xff] }
 0x2d1   :  { %v8318_v47 = vmax.f32 %v10396_v21, %v1071_v6  ;;  %6059 = vmatprep.subr.bf16.mxu1 %v10361_v19  ;;  %v1244_v6 = vld [vmem:[%s10290_s3 + $0x1a0] sm:$0xff]  ;;  %v10408_v21 = vld [vmem:[#allocation20_spill] sm:$0xff] }
 0x2d2   :  { %v941_v32 = vpop.f32.mrb[222].mxu0 }
 0x2d3   :  { %v1072_v61 = vmax.f32 %v8064_v55, %v941_v32  ;;  %v943_v48 = vpop.f32.mrb[223].mxu0  ;;  %v10398_v55 = vld [vmem:[#allocation34_spill] sm:$0xff]  ;;  %v1245_v32 = vld [vmem:[%s10290_s3 + $0x1a8] sm:$0xff] }
 0x2d4   :  { %6061 = vmatpush3.bf16.msra.mxu1 %v6060_v51  ;;  %v10407_v51 = vld [vmem:[#allocation4_spill] sm:$0xff]  ;;  %v1499_v48 = vld [vmem:[%s10290_s3 + $0x998] sm:$0xff] }
 0x2d5   :  { %v8331_v62 = vmax.f32 %v10397_v25, %v1072_v61  ;;  %6062 = vmatprep.subr.bf16.mxu1 %v10361_v19  ;;  %v10409_v59 = vmax.f32 %v10407_v51, %v10408_v21  ;;  %v1498_v61 = vld [vmem:[%s10290_s3 + $0x990] sm:$0xff]  ;;  %v10410_v25 = vld [vmem:[#allocation37_spill] sm:$0xff] }
 0x2d6   :  { %v946_v30 = vpop.f32.mrb[224].mxu0  ;;  %v1251_v21 = vld [vmem:[%s10290_s3 + $0x1d8] sm:$0xff] }
 0x2d7   :  { %v1073_v50 = vmax.f32 %v10398_v55, %v946_v30  ;;  %v948_v37 = vpop.f32.mrb[225].mxu0  ;;  %v6075_v30 = vpack.c.bf16 %v1245_v32, %v1244_v6  ;;  %v6456_v55 = vpack.c.bf16 %v1499_v48, %v1498_v61  ;;  %v10420_v6 = vld [vmem:[#allocation23_spill] sm:$0xff]  ;;  %v10422_v48 = vld [vmem:[#allocation40_spill] sm:$0xff] }
 0x2d8   :  { %6064 = vmatpush3.bf16.msra.mxu1 %v6063_v1  ;;  %v10411_v37 = vld [vmem:[#allocation5_spill] sm:$0xff]  ;;  %v1505_v32 = vld [vmem:[%s10290_s3 + $0x9c8] sm:$0xff] }
 0x2d9   :  { %v8346_v12 = vmax.f32 %v10401_v57, %v1073_v50  ;;  %6065 = vmatprep.subr.bf16.mxu1 %v10361_v19  ;;  %v1246_v50 = vld [vmem:[%s10290_s3 + $0x1b0] sm:$0xff]  ;;  %v1500_v57 = vld [vmem:[%s10290_s3 + $0x9a0] sm:$0xff] }
 0x2da   :  { %v951_v40 = vpop.f32.mrb[226].mxu0 }
 0x2db   :  { %v1074_v9 = vmax.f32 %v10402_v39, %v951_v40  ;;  %v953_v23 = vpop.f32.mrb[227].mxu0  ;;  %v10414_v40 = vld [vmem:[#allocation38_spill] sm:$0xff] }
 0x2dc   :  { %6067 = vmatpush3.bf16.msra.mxu1 %v6066_v0  ;;  %v10412_v0 = vld [vmem:[#allocation21_spill] sm:$0xff]  ;;  %v6078_v23 = vpack.c.bf16 %v1247_v5, %v1246_v50  ;;  %v10424_v50 = vld [vmem:[#allocation24_spill] sm:$0xff] }
 0x2dd   :  { %v1106_v13 = vmax.f32 %v10405_v31, %v1074_v9  ;;  %6068 = vmatprep.subr.bf16.mxu1 %v10361_v19  ;;  %v10413_v29 = vmax.f32 %v10411_v37, %v10412_v0  ;;  %v1506_v5 = vld [vmem:[%s10290_s3 + $0x9d0] sm:$0xff] }
 0x2de   :  { %v956_v24 = vpop.f32.mrb[228].mxu0 }
 0x2df   :  { %v1145_v44 = vadd.f32 %v8128_v45, %v1106_v13  ;;  %v1075_v17 = vmax.f32 %v10406_v14, %v956_v24  ;;  %4861 = vmatmul.mubr.f32.vlgmr.msra.gmra.mrb[4].mxu1 %v1162_v18  ;;  %v958_v60 = vpop.f32.mrb[229].mxu0  ;;  %v10415_v18 = vld [vmem:[#allocation6_spill] sm:$0xff]  ;;  %v1249_v13 = vld [vmem:[%s10290_s3 + $0x1c8] sm:$0xff] }
 0x2e0   :  { %6070 = vmatpush3.bf16.msra.mxu1 %v6069_v34  ;;  %4895 = vmatprep.mubr.msk.f32.mxu1 %vm6818_vm0, %v10367_v54  ;;  %v6459_v34 = vpack.c.bf16 %v1501_v52, %v1500_v57  ;;  %v10417_v56 = vmax.f32 %v10415_v18, %v10416_v8  ;;  %v10418_v24 = vld [vmem:[#allocation39_spill] sm:$0xff]  ;;  %v6462_v60 = vpack.c.bf16 %v1503_v42, %v1502_v2  ;;  %v1507_v57 = vld [vmem:[%s10290_s3 + $0x9d8] sm:$0xff]  ;;  %v1508_v2 = vld [vmem:[%s10290_s3 + $0x9e0] sm:$0xff] }
 0x2e1   :  { %v1177_v22 = vmax.f32 %v1145_v44, 0.0  ;;  %v8382_v36 = vmax.f32 %v10409_v59, %v1075_v17  ;;  %6071 = vmatprep.subr.bf16.mxu1 %v10361_v19  ;;  %v6081_v17 = vpack.c.bf16 %v1249_v13, %v1248_v46  ;;  %v1504_v59 = vld [vmem:[%s10290_s3 + $0x9c0] sm:$0xff]  ;;  %v10427_v46 = vld [vmem:[#allocation9_spill] sm:$0xff]  ;;  %v1509_v42 = vld [vmem:[%s10290_s3 + $0x9e8] sm:$0xff] }
 0x2e2   :  { %v961_v1 = vpop.f32.mrb[230].mxu0  ;;  %v10428_v18 = vld [vmem:[#allocation25_spill] sm:$0xff] }
 0x2e3   :  { %v1076_v11 = vmax.f32 %v10410_v25, %v961_v1  ;;  %5386 = vmatmul.mubr.f32.vlgmr.msra.gmra.mrb[0].mxu0 %v1177_v22  ;;  %v963_v58 = vpop.f32.mrb[231].mxu0  ;;  %v10429_v8 = vmax.f32 %v10427_v46, %v10428_v18  ;;  %v1255_v13 = vld [vmem:[%s10290_s3 + $0x1f8] sm:$0xff] }
 0x2e4   :  { %6073 = vmatpush3.bf16.msra.mxu1 %v6072_v16  ;;  %6454 = vmatpush3.bf16.msra.mxu0 %v6453_v15  ;;  %v1250_v16 = vld [vmem:[%s10290_s3 + $0x1d0] sm:$0xff]  ;;  %v10419_v15 = vld [vmem:[#allocation7_spill] sm:$0xff]  ;;  %v6465_v58 = vpack.c.bf16 %v1505_v32, %v1504_v59 }
 0x2e5   :  { %v8401_v27 = vmax.f32 %v10413_v29, %v1076_v11  ;;  %6074 = vmatprep.subr.bf16.mxu1 %v10361_v19  ;;  %6455 = vmatprep.subr.bf16.mxu0 %v10361_v19  ;;  %v10421_v22 = vmax.f32 %v10419_v15, %v10420_v6  ;;  %v6084_v11 = vpack.c.bf16 %v1251_v21, %v1250_v16  ;;  %v1253_v29 = vld [vmem:[%s10290_s3 + $0x1e8] sm:$0xff]  ;;  %v1256_v16 = vld [vmem:[%s10290_s3 + $0x200] sm:$0xff] }
 0x2e6   :  { %v966_v26 = vpop.f32.mrb[232].mxu0  ;;  %5455 = vmatprep.mubr.msk.f32.mxu0 %vm6818_vm0, %v10367_v54  ;;  %v1131_v15 = vadd.f32 %v8128_v45, %v8171_v20  ;;  %v10431_v6 = vld [vmem:[#allocation10_spill] sm:$0xff]  ;;  %v1257_v32 = vld [vmem:[%s10290_s3 + $0x208] sm:$0xff]  ;;  %v1511_v20 = vld [vmem:[%s10290_s3 + $0x9f8] sm:$0xff] }
 0x2e7   :  { %v1077_v39 = vmax.f32 %v10414_v40, %v966_v26  ;;  %v968_v9 = vpop.f32.mrb[233].mxu0  ;;  %v10426_v26 = vld [vmem:[#allocation41_spill] sm:$0xff] }
 0x2e8   :  { %6076 = vmatpush3.bf16.msra.mxu1 %v6075_v30  ;;  %6457 = vmatpush3.bf16.msra.mxu0 %v6456_v55  ;;  %v1252_v30 = vld [vmem:[%s10290_s3 + $0x1e0] sm:$0xff]  ;;  %v10423_v55 = vld [vmem:[#allocation8_spill] sm:$0xff] }
 0x2e9   :  { %v8423_v31 = vmax.f32 %v10417_v56, %v1077_v39  ;;  %6077 = vmatprep.subr.bf16.mxu1 %v10361_v19  ;;  %6458 = vmatprep.subr.bf16.mxu0 %v10361_v19  ;;  %v10425_v37 = vmax.f32 %v10423_v55, %v10424_v50  ;;  %v6087_v9 = vpack.c.bf16 %v1253_v29, %v1252_v30  ;;  %v1258_v55 = vld [vmem:[%s10290_s3 + $0x210] sm:$0xff]  ;;  %v1163_v50 = vmax.f32 %v1131_v15, 0.0  ;;  %v10435_v29 = vld [vmem:[#allocation11_spill] sm:$0xff] }
 0x2ea   :  { %v971_v43 = vpop.f32.mrb[234].mxu0 }
 0x2eb   :  { %v1078_v44 = vmax.f32 %v10418_v24, %v971_v43  ;;  %v973_v14 = vpop.f32.mrb[235].mxu0  ;;  %v10430_v24 = vld [vmem:[#allocation42_spill] sm:$0xff] }
 0x2ec   :  { %6079 = vmatpush3.bf16.msra.mxu1 %v6078_v23  ;;  %6460 = vmatpush3.bf16.msra.mxu0 %v6459_v34  ;;  %v6468_v23 = vpack.c.bf16 %v1507_v57, %v1506_v5  ;;  %v1254_v34 = vld [vmem:[%s10290_s3 + $0x1f0] sm:$0xff]  ;;  %v10436_v5 = vld [vmem:[#allocation27_spill] sm:$0xff] }
 0x2ed   :  { %v8443_v51 = vmax.f32 %v10421_v22, %v1078_v44  ;;  %6080 = vmatprep.subr.bf16.mxu1 %v10361_v19  ;;  %6461 = vmatprep.subr.bf16.mxu0 %v10361_v19  ;;  %v10432_v22 = vld [vmem:[#allocation26_spill] sm:$0xff]  ;;  %v10437_v57 = vmax.f32 %v10435_v29, %v10436_v5 }
 0x2ee   :  { %v976_v61 = vpop.f32.mrb[236].mxu0  ;;  %v10433_v21 = vmax.f32 %v10431_v6, %v10432_v22  ;;  %v10445_v29 = vld [vmem:[#allocation14_spill] sm:$0xff] }
 0x2ef   :  { %v1079_v1 = vmax.f32 %v10422_v48, %v976_v61  ;;  %v978_v25 = vpop.f32.mrb[237].mxu0  ;;  %v1510_v61 = vld [vmem:[%s10290_s3 + $0x9f0] sm:$0xff]  ;;  %v10446_v5 = vld [vmem:[#allocation30_spill] sm:$0xff] }
 0x2f0   :  { %6082 = vmatpush3.bf16.msra.mxu1 %v6081_v17  ;;  %6463 = vmatpush3.bf16.msra.mxu0 %v6462_v60  ;;  %v6090_v17 = vpack.c.bf16 %v1255_v13, %v1254_v34  ;;  %v6471_v60 = vpack.c.bf16 %v1509_v42, %v1508_v2  ;;  %v6474_v30 = vpack.c.bf16 %v1511_v20, %v1510_v61  ;;  %v10439_v2 = vld [vmem:[#allocation12_spill] sm:$0xff]  ;;  %v10443_v61 = vld [vmem:[#allocation29_spill] sm:$0xff] }
 0x2f1   :  { %v8463_v0 = vmax.f32 %v10425_v37, %v1079_v1  ;;  %6083 = vmatprep.subr.bf16.mxu1 %v10361_v19  ;;  %6464 = vmatprep.subr.bf16.mxu0 %v10361_v19  ;;  %v10434_v1 = vld [vmem:[#allocation43_spill] sm:$0xff]  ;;  %v1147_v37 = vadd.f32 %v8128_v45, %v8401_v27  ;;  %v10440_v42 = vld [vmem:[#allocation28_spill] sm:$0xff] }
 0x2f2   :  { %v981_v52 = vpop.f32.mrb[238].mxu0  ;;  %v1529_v27 = vld [vmem:[%s10290_s3 + $0xa88] sm:$0xff] }
 0x2f3   :  { %v1080_v40 = vmax.f32 %v10426_v26, %v981_v52  ;;  %v983_v39 = vpop.f32.mrb[239].mxu0  ;;  %v1259_v26 = vld [vmem:[%s10290_s3 + $0x218] sm:$0xff]  ;;  %v1179_v13 = vmax.f32 %v1147_v37, 0.0  ;;  %v1264_v37 = vld [vmem:[%s10290_s3 + $0x240] sm:$0xff] }
 0x2f4   :  { %6085 = vmatpush3.bf16.msra.mxu1 %v6084_v11  ;;  %6466 = vmatpush3.bf16.msra.mxu0 %v6465_v58  ;;  %v6093_v58 = vpack.c.bf16 %v1257_v32, %v1256_v16  ;;  %v6096_v46 = vpack.c.bf16 %v1259_v26, %v1258_v55  ;;  %v10442_v32 = vld [vmem:[#allocation13_spill] sm:$0xff] }
 0x2f5   :  { %v8483_v56 = vmax.f32 %v10429_v8, %v1080_v40  ;;  %6086 = vmatprep.subr.bf16.mxu1 %v10361_v19  ;;  %6467 = vmatprep.subr.bf16.mxu0 %v10361_v19  ;;  %v1528_v40 = vld [vmem:[%s10290_s3 + $0xa80] sm:$0xff]  ;;  %v10444_v20 = vmax.f32 %v10442_v32, %v10443_v61  ;;  %v10453_v61 = vld [vmem:[#allocation16_spill] sm:$0xff] }
 0x2f6   :  { %v986_v43 = vpop.f32.mrb[240].mxu0  ;;  %v6501_v18 = vpack.c.bf16 %v1529_v27, %v1528_v40  ;;  %v1260_v8 = vld [vmem:[%s10290_s3 + $0x220] sm:$0xff]  ;;  %v1534_v40 = vld [vmem:[%s10290_s3 + $0xab0] sm:$0xff]  ;;  %v1535_v27 = vld [vmem:[%s10290_s3 + $0xab8] sm:$0xff] }
 0x2f7   :  { %v1081_v44 = vmax.f32 %v10430_v24, %v986_v43  ;;  %v988_v14 = vpop.f32.mrb[241].mxu0  ;;  %v10441_v43 = vmax.f32 %v10439_v2, %v10440_v42  ;;  %v10450_v2 = vld [vmem:[#allocation31_spill] sm:$0xff]  ;;  %v1268_v32 = vld [vmem:[%s10290_s3 + $0x260] sm:$0xff] }
 0x2f8   :  { %6088 = vmatpush3.bf16.msra.mxu1 %v6087_v9  ;;  %6469 = vmatpush3.bf16.msra.mxu0 %v6468_v23  ;;  %v10438_v9 = vld [vmem:[#allocation44_spill] sm:$0xff] }
 0x2f9   :  { %v8505_v59 = vmax.f32 %v10433_v21, %v1081_v44  ;;  %6089 = vmatprep.subr.bf16.mxu1 %v10361_v19  ;;  %6470 = vmatprep.subr.bf16.mxu0 %v10361_v19  ;;  %v1261_v44 = vld [vmem:[%s10290_s3 + $0x228] sm:$0xff]  ;;  %v1530_v14 = vld [vmem:[%s10290_s3 + $0xa90] sm:$0xff] }
 0x2fa   :  { %v991_v48 = vpop.f32.mrb[242].mxu0  ;;  %v6099_v6 = vpack.c.bf16 %v1261_v44, %v1260_v8  ;;  %v1262_v21 = vld [vmem:[%s10290_s3 + $0x230] sm:$0xff]  ;;  %v1267_v44 = vld [vmem:[%s10290_s3 + $0x258] sm:$0xff] }
 0x2fb   :  { %v1082_v25 = vmax.f32 %v10434_v1, %v991_v48  ;;  %v993_v11 = vpop.f32.mrb[243].mxu0  ;;  %v1532_v1 = vld [vmem:[%s10290_s3 + $0xaa0] sm:$0xff]  ;;  %v1266_v8 = vld [vmem:[%s10290_s3 + $0x250] sm:$0xff] }
 0x2fc   :  { %6091 = vmatpush3.bf16.msra.mxu1 %v6090_v17  ;;  %6472 = vmatpush3.bf16.msra.mxu0 %v6471_v60  ;;  %v1531_v17 = vld [vmem:[%s10290_s3 + $0xa98] sm:$0xff] }
 0x2fd   :  { %v8527_v52 = vmax.f32 %v10437_v57, %v1082_v25  ;;  %6092 = vmatprep.subr.bf16.mxu1 %v10361_v19  ;;  %6473 = vmatprep.subr.bf16.mxu0 %v10361_v19  ;;  %v6504_v22 = vpack.c.bf16 %v1531_v17, %v1530_v14  ;;  %v1533_v25 = vld [vmem:[%s10290_s3 + $0xaa8] sm:$0xff]  ;;  %v10447_v57 = vmax.f32 %v10445_v29, %v10446_v5  ;;  %v1536_v14 = vld [vmem:[%s10290_s3 + $0xac0] sm:$0xff] }
 0x2fe   :  { %v996_v39 = vpop.f32.mrb[244].mxu0  ;;  %v1537_v17 = vld [vmem:[%s10290_s3 + $0xac8] sm:$0xff] }
 0x2ff   :  { %v1083_v23 = vmax.f32 %v10438_v9, %v996_v39  ;;  %4896 = vmatmul.mubr.f32.vlgmr.msra.gmra.mrb[6].mxu1 %v1163_v50  ;;  %v998_v34 = vpop.f32.mrb[245].mxu0  ;;  %v6507_v50 = vpack.c.bf16 %v1533_v25, %v1532_v1  ;;  %v10448_v9 = vld [vmem:[#allocation45_spill] sm:$0xff]  ;;  %v1269_v25 = vld [vmem:[%s10290_s3 + $0x268] sm:$0xff] }
 0x300   :  { %6094 = vmatpush3.bf16.msra.mxu1 %v6093_v58  ;;  %6475 = vmatpush3.bf16.msra.mxu0 %v6474_v30  ;;  %v6111_v29 = vpack.c.bf16 %v1269_v25, %v1268_v32  ;;  %v1276_v32 = vld [vmem:[%s10290_s3 + $0x2a0] sm:$0xff]  ;;  %v1563_v25 = vld [vmem:[%s10290_s3 + $0xb98] sm:$0xff] }
 0x301   :  { %v8547_v24 = vmax.f32 %v10441_v43, %v1083_v23  ;;  %6095 = vmatprep.subr.bf16.mxu1 %v10361_v19  ;;  %6500 = vmatprep.subr.bf16.mxu0 %v10361_v19 }
 0x302   :  { %v1001_v60 = vpop.f32.mrb[246].mxu0  ;;  %4930 = vmatprep.mubr.msk.f32.mxu1 %vm6818_vm0, %v10367_v54 }
 0x303   :  { %v1084_v16 = vmax.f32 %v8114_v35, %v1001_v60  ;;  %5456 = vmatmul.mubr.f32.vlgmr.msra.gmra.mrb[2].mxu0 %v1179_v13  ;;  %v1003_v15 = vpop.f32.mrb[247].mxu0  ;;  %v1263_v35 = vld [vmem:[%s10290_s3 + $0x238] sm:$0xff]  ;;  %v10449_v13 = vld [vmem:[#allocation15_spill] sm:$0xff] }
 0x304   :  { %6097 = vmatpush3.bf16.msra.mxu1 %v6096_v46  ;;  %6502 = vmatpush3.bf16.msra.mxu0 %v6501_v18  ;;  %v6102_v55 = vpack.c.bf16 %v1263_v35, %v1262_v21  ;;  %v6510_v18 = vpack.c.bf16 %v1535_v27, %v1534_v40  ;;  %v10451_v42 = vmax.f32 %v10449_v13, %v10450_v2  ;;  %v10458_v40 = vld [vmem:[#allocation33_spill] sm:$0xff]  ;;  %v1273_v2 = vld [vmem:[%s10290_s3 + $0x288] sm:$0xff] }
 0x305   :  { %v8569_v48 = vmax.f32 %v10444_v20, %v1084_v16  ;;  %6098 = vmatprep.subr.bf16.mxu1 %v10361_v19  ;;  %6503 = vmatprep.subr.bf16.mxu0 %v10361_v19  ;;  %v10452_v16 = vld [vmem:[#allocation46_spill] sm:$0xff]  ;;  %v6513_v21 = vpack.c.bf16 %v1537_v17, %v1536_v14  ;;  %v10454_v20 = vld [vmem:[#allocation32_spill] sm:$0xff]  ;;  %v1132_v13 = vadd.f32 %v8128_v45, %v8184_v28 }
 0x306   :  { %v1006_v11 = vpop.f32.mrb[248].mxu0  ;;  %5525 = vmatprep.mubr.msk.f32.mxu0 %vm6818_vm0, %v10367_v54  ;;  %v10455_v35 = vmax.f32 %v10453_v61, %v10454_v20  ;;  %v1274_v17 = vld [vmem:[%s10290_s3 + $0x290] sm:$0xff]  ;;  %v1277_v20 = vld [vmem:[%s10290_s3 + $0x2a8] sm:$0xff] }
 0x307   :  { %v1085_v58 = vmax.f32 %v8116_v3, %v1006_v11  ;;  %v1008_v30 = vpop.f32.mrb[249].mxu0  ;;  %v1265_v3 = vld [vmem:[%s10290_s3 + $0x248] sm:$0xff]  ;;  %v1538_v11 = vld [vmem:[%s10290_s3 + $0xad0] sm:$0xff] }
 0x308   :  { %6100 = vmatpush3.bf16.msra.mxu1 %v6099_v6  ;;  %6505 = vmatpush3.bf16.msra.mxu0 %v6504_v22  ;;  %v6105_v46 = vpack.c.bf16 %v1265_v3, %v1264_v37  ;;  %v6108_v22 = vpack.c.bf16 %v1267_v44, %v1266_v8  ;;  %v10457_v3 = vld [vmem:[#allocation17_spill] sm:$0xff]  ;;  %v1272_v8 = vld [vmem:[%s10290_s3 + $0x280] sm:$0xff] }
 0x309   :  { %v8591_v26 = vmax.f32 %v10447_v57, %v1085_v58  ;;  %6101 = vmatprep.subr.bf16.mxu1 %v10361_v19  ;;  %6506 = vmatprep.subr.bf16.mxu0 %v10361_v19  ;;  %v1539_v58 = vld [vmem:[%s10290_s3 + $0xad8] sm:$0xff]  ;;  %v1270_v57 = vld [vmem:[%s10290_s3 + $0x270] sm:$0xff]  ;;  %v10459_v27 = vmax.f32 %v10457_v3, %v10458_v40  ;;  %v6117_v14 = vpack.c.bf16 %v1273_v2, %v1272_v8  ;;  %v1281_v3 = vld [vmem:[%s10290_s3 + $0x2c8] sm:$0xff] }
 0x30a   :  { %v1011_v39 = vpop.f32.mrb[250].mxu0  ;;  %v6516_v5 = vpack.c.bf16 %v1539_v58, %v1538_v11  ;;  %v1543_v44 = vld [vmem:[%s10290_s3 + $0xaf8] sm:$0xff]  ;;  %v6123_v11 = vpack.c.bf16 %v1277_v20, %v1276_v32  ;;  %v1566_v40 = vld [vmem:[%s10290_s3 + $0xbb0] sm:$0xff]  ;;  %v1569_v8 = vld [vmem:[%s10290_s3 + $0xbc8] sm:$0xff] }
 0x30b   :  { %v1086_v23 = vmax.f32 %v10448_v9, %v1011_v39  ;;  %v1013_v34 = vpop.f32.mrb[251].mxu0  ;;  %v1271_v9 = vld [vmem:[%s10290_s3 + $0x278] sm:$0xff]  ;;  %v1288_v32 = vld [vmem:[%s10290_s3 + $0x300] sm:$0xff]  ;;  %v1289_v20 = vld [vmem:[%s10290_s3 + $0x308] sm:$0xff] }
 0x30c   :  { %6103 = vmatpush3.bf16.msra.mxu1 %v6102_v55  ;;  %6508 = vmatpush3.bf16.msra.mxu0 %v6507_v50  ;;  %v10456_v55 = vld [vmem:[#allocation47_spill] sm:$0xff] }
 0x30d   :  { %v8611_v43 = vmax.f32 %v10451_v42, %v1086_v23  ;;  %6104 = vmatprep.subr.bf16.mxu1 %v10361_v19  ;;  %6509 = vmatprep.subr.bf16.mxu0 %v10361_v19  ;;  %v1540_v23 = vld [vmem:[%s10290_s3 + $0xae0] sm:$0xff]  ;;  %v1541_v34 = vld [vmem:[%s10290_s3 + $0xae8] sm:$0xff]  ;;  %v1542_v42 = vld [vmem:[%s10290_s3 + $0xaf0] sm:$0xff] }
 0x30e   :  { %v1016_v60 = vpop.f32.mrb[252].mxu0  ;;  %v6522_v28 = vpack.c.bf16 %v1543_v44, %v1542_v42  ;;  %v1284_v42 = vld [vmem:[%s10290_s3 + $0x2e0] sm:$0xff]  ;;  %v1285_v44 = vld [vmem:[%s10290_s3 + $0x2e8] sm:$0xff] }
 0x30f   :  { %v1087_v15 = vmax.f32 %v10452_v16, %v1016_v60  ;;  %v1018_v6 = vpop.f32.mrb[253].mxu0  ;;  %v1164_v60 = vmax.f32 %v1132_v13, 0.0  ;;  %v1149_v16 = vadd.f32 %v8128_v45, %v8443_v51 }
 0x310   :  { %6106 = vmatpush3.bf16.msra.mxu1 %v6105_v46  ;;  %6511 = vmatpush3.bf16.msra.mxu0 %v6510_v18  ;;  %v6114_v46 = vpack.c.bf16 %v1271_v9, %v1270_v57  ;;  %v6519_v18 = vpack.c.bf16 %v1541_v34, %v1540_v23  ;;  %v1560_v6 = vld [vmem:[%s10290_s3 + $0xb80] sm:$0xff]  ;;  %v1282_v34 = vld [vmem:[%s10290_s3 + $0x2d0] sm:$0xff] }
 0x311   :  { %v8631_v1 = vmax.f32 %v10455_v35, %v1087_v15  ;;  %6107 = vmatprep.subr.bf16.mxu1 %v10361_v19  ;;  %6512 = vmatprep.subr.bf16.mxu0 %v10361_v19  ;;  %v1275_v15 = vld [vmem:[%s10290_s3 + $0x298] sm:$0xff]  ;;  %v1181_v61 = vmax.f32 %v1149_v16, 0.0  ;;  %v1562_v35 = vld [vmem:[%s10290_s3 + $0xb90] sm:$0xff]  ;;  %v1280_v57 = vld [vmem:[%s10290_s3 + $0x2c0] sm:$0xff] }
 0x312   :  { %v1021_v30 = vpop.f32.mrb[254].mxu0  ;;  %v6120_v51 = vpack.c.bf16 %v1275_v15, %v1274_v17  ;;  %v6552_v58 = vpack.c.bf16 %v1563_v25, %v1562_v35  ;;  %v6129_v9 = vpack.c.bf16 %v1281_v3, %v1280_v57  ;;  %v6135_v17 = vpack.c.bf16 %v1285_v44, %v1284_v42  ;;  %v1286_v16 = vld [vmem:[%s10290_s3 + $0x2f0] sm:$0xff]  ;;  %v1287_v15 = vld [vmem:[%s10290_s3 + $0x2f8] sm:$0xff]  ;;  %v1293_v3 = vld [vmem:[%s10290_s3 + $0x328] sm:$0xff] }
 0x313   :  { %v1088_v50 = vmax.f32 %v10456_v55, %v1021_v30  ;;  %v1023_v37 = vpop.f32.mrb[255].mxu0  ;;  %v1278_v30 = vld [vmem:[%s10290_s3 + $0x2b0] sm:$0xff]  ;;  %v1279_v55 = vld [vmem:[%s10290_s3 + $0x2b8] sm:$0xff]  ;;  %v1296_v42 = vld [vmem:[%s10290_s3 + $0x340] sm:$0xff] }
 0x314   :  { %6109 = vmatpush3.bf16.msra.mxu1 %v6108_v22  ;;  %6514 = vmatpush3.bf16.msra.mxu0 %v6513_v21  ;;  %v1561_v22 = vld [vmem:[%s10290_s3 + $0xb88] sm:$0xff]  ;;  %v1574_v35 = vld [vmem:[%s10290_s3 + $0xbf0] sm:$0xff]  ;;  %v1575_v25 = vld [vmem:[%s10290_s3 + $0xbf8] sm:$0xff] }
 0x315   :  { %v8651_v39 = vmax.f32 %v10459_v27, %v1088_v50  ;;  %6110 = vmatprep.subr.bf16.mxu1 %v10361_v19  ;;  %6515 = vmatprep.subr.bf16.mxu0 %v10361_v19  ;;  %v6549_v21 = vpack.c.bf16 %v1561_v22, %v1560_v6  ;;  %v1564_v50 = vld [vmem:[%s10290_s3 + $0xba0] sm:$0xff]  ;;  %v1565_v37 = vld [vmem:[%s10290_s3 + $0xba8] sm:$0xff]  ;;  %v1567_v27 = vld [vmem:[%s10290_s3 + $0xbb8] sm:$0xff] }
 0x316   :  { %v6558_v23 = vpack.c.bf16 %v1567_v27, %v1566_v40  ;;  %v1572_v6 = vld [vmem:[%s10290_s3 + $0xbe0] sm:$0xff]  ;;  %v1573_v22 = vld [vmem:[%s10290_s3 + $0xbe8] sm:$0xff]  ;;  %v1594_v40 = vld [vmem:[%s10290_s3 + $0xc90] sm:$0xff] }
 0x317   :  { %v1595_v27 = vld [vmem:[%s10290_s3 + $0xc98] sm:$0xff]  ;;  %v1297_v44 = vld [vmem:[%s10290_s3 + $0x348] sm:$0xff] }
 0x318   :  { %6112 = vmatpush3.bf16.msra.mxu1 %v6111_v29  ;;  %6517 = vmatpush3.bf16.msra.mxu0 %v6516_v5  ;;  %v6126_v29 = vpack.c.bf16 %v1279_v55, %v1278_v30  ;;  %v6555_v5 = vpack.c.bf16 %v1565_v37, %v1564_v50  ;;  %v1151_v55 = vadd.f32 %v8128_v45, %v8483_v56  ;;  %v1291_v50 = vld [vmem:[%s10290_s3 + $0x318] sm:$0xff]  ;;  %v1592_v37 = vld [vmem:[%s10290_s3 + $0xc80] sm:$0xff] }
 0x319   :  { %6113 = vmatprep.subr.bf16.mxu1 %v10361_v19  ;;  %6518 = vmatprep.subr.bf16.mxu0 %v10361_v19 }
 0x31a   :  { %v1183_v57 = vmax.f32 %v1151_v55, 0.0  ;;  %v1605_v55 = vld [vmem:[%s10290_s3 + $0xce8] sm:$0xff] }
 0x31c   :  { %6115 = vmatpush3.bf16.msra.mxu1 %v6114_v46  ;;  %6520 = vmatpush3.bf16.msra.mxu0 %v6519_v18  ;;  %v1283_v46 = vld [vmem:[%s10290_s3 + $0x2d8] sm:$0xff]  ;;  %v1568_v18 = vld [vmem:[%s10290_s3 + $0xbc0] sm:$0xff] }
 0x31d   :  { %6116 = vmatprep.subr.bf16.mxu1 %v10361_v19  ;;  %6521 = vmatprep.subr.bf16.mxu0 %v10361_v19  ;;  %v6132_v13 = vpack.c.bf16 %v1283_v46, %v1282_v34  ;;  %v6561_v2 = vpack.c.bf16 %v1569_v8, %v1568_v18  ;;  %v1294_v34 = vld [vmem:[%s10290_s3 + $0x330] sm:$0xff]  ;;  %v1295_v46 = vld [vmem:[%s10290_s3 + $0x338] sm:$0xff]  ;;  %v1596_v18 = vld [vmem:[%s10290_s3 + $0xca0] sm:$0xff] }
 0x31e   :  { %v1597_v8 = vld [vmem:[%s10290_s3 + $0xca8] sm:$0xff] }
 0x31f   :  { %4931 = vmatmul.mubr.f32.vlgmr.msra.gmra.mrb[8].mxu1 %v1164_v60 }
 0x320   :  { %6118 = vmatpush3.bf16.msra.mxu1 %v6117_v14  ;;  %6523 = vmatpush3.bf16.msra.mxu0 %v6522_v28  ;;  %v1570_v14 = vld [vmem:[%s10290_s3 + $0xbd0] sm:$0xff]  ;;  %v1571_v28 = vld [vmem:[%s10290_s3 + $0xbd8] sm:$0xff] }
 0x321   :  { %6119 = vmatprep.subr.bf16.mxu1 %v10361_v19  ;;  %6548 = vmatprep.subr.bf16.mxu0 %v10361_v19  ;;  %v6564_v60 = vpack.c.bf16 %v1571_v28, %v1570_v14  ;;  %v1598_v14 = vld [vmem:[%s10290_s3 + $0xcb0] sm:$0xff]  ;;  %v1599_v28 = vld [vmem:[%s10290_s3 + $0xcb8] sm:$0xff] }
 0x322   :  { %4965 = vmatprep.mubr.msk.f32.mxu1 %vm6818_vm0, %v10367_v54 }
 0x323   :  { %5526 = vmatmul.mubr.f32.vlgmr.msra.gmra.mrb[4].mxu0 %v1181_v61  ;;  %v1133_v61 = vadd.f32 %v8128_v45, %v8197_v41  ;;  %v6570_v41 = vpack.c.bf16 %v1575_v25, %v1574_v35  ;;  %v1603_v35 = vld [vmem:[%s10290_s3 + $0xcd8] sm:$0xff] }
 0x324   :  { %6121 = vmatpush3.bf16.msra.mxu1 %v6120_v51  ;;  %6550 = vmatpush3.bf16.msra.mxu0 %v6549_v21  ;;  %v6138_v51 = vpack.c.bf16 %v1287_v15, %v1286_v16  ;;  %v6567_v21 = vpack.c.bf16 %v1573_v22, %v1572_v6  ;;  %v1298_v16 = vld [vmem:[%s10290_s3 + $0x350] sm:$0xff]  ;;  %v1299_v15 = vld [vmem:[%s10290_s3 + $0x358] sm:$0xff]  ;;  %v1600_v6 = vld [vmem:[%s10290_s3 + $0xcc0] sm:$0xff] }
 0x325   :  { %6122 = vmatprep.subr.bf16.mxu1 %v10361_v19  ;;  %6551 = vmatprep.subr.bf16.mxu0 %v10361_v19  ;;  %v1165_v30 = vmax.f32 %v1133_v61, 0.0  ;;  %v1601_v22 = vld [vmem:[%s10290_s3 + $0xcc8] sm:$0xff] }
 0x326   :  { %5595 = vmatprep.mubr.msk.f32.mxu0 %vm6818_vm0, %v10367_v54  ;;  %v1301_v61 = vld [vmem:[%s10290_s3 + $0x368] sm:$0xff] }
 0x328   :  { %6124 = vmatpush3.bf16.msra.mxu1 %v6123_v11  ;;  %6553 = vmatpush3.bf16.msra.mxu0 %v6552_v58  ;;  %v6141_v11 = vpack.c.bf16 %v1289_v20, %v1288_v32  ;;  %v1290_v58 = vld [vmem:[%s10290_s3 + $0x310] sm:$0xff]  ;;  %v1300_v32 = vld [vmem:[%s10290_s3 + $0x360] sm:$0xff] }
 0x329   :  { %6125 = vmatprep.subr.bf16.mxu1 %v10361_v19  ;;  %6554 = vmatprep.subr.bf16.mxu0 %v10361_v19  ;;  %v6144_v45 = vpack.c.bf16 %v1291_v50, %v1290_v58  ;;  %v1602_v20 = vld [vmem:[%s10290_s3 + $0xcd0] sm:$0xff]  ;;  %v6159_v25 = vpack.c.bf16 %v1301_v61, %v1300_v32  ;;  %v1303_v58 = vld [vmem:[%s10290_s3 + $0x378] sm:$0xff]  ;;  %v1313_v32 = vld [vmem:[%s10290_s3 + $0x3c8] sm:$0xff] }
 0x32a   :  { %v1630_v61 = vld [vmem:[%s10290_s3 + $0xdb0] sm:$0xff] }
 0x32c   :  { %6127 = vmatpush3.bf16.msra.mxu1 %v6126_v29  ;;  %6556 = vmatpush3.bf16.msra.mxu0 %v6555_v5  ;;  %v1593_v29 = vld [vmem:[%s10290_s3 + $0xc88] sm:$0xff]  ;;  %v1292_v5 = vld [vmem:[%s10290_s3 + $0x320] sm:$0xff] }
 0x32d   :  { %6128 = vmatprep.subr.bf16.mxu1 %v10361_v19  ;;  %6557 = vmatprep.subr.bf16.mxu0 %v10361_v19  ;;  %v6597_v56 = vpack.c.bf16 %v1593_v29, %v1592_v37  ;;  %v1304_v29 = vld [vmem:[%s10290_s3 + $0x380] sm:$0xff] }
 0x330   :  { %6130 = vmatpush3.bf16.msra.mxu1 %v6129_v9  ;;  %6559 = vmatpush3.bf16.msra.mxu0 %v6558_v23  ;;  %v6147_v9 = vpack.c.bf16 %v1293_v3, %v1292_v5  ;;  %v6600_v23 = vpack.c.bf16 %v1595_v27, %v1594_v40  ;;  %v1305_v5 = vld [vmem:[%s10290_s3 + $0x388] sm:$0xff]  ;;  %v1607_v3 = vld [vmem:[%s10290_s3 + $0xcf8] sm:$0xff]  ;;  %v1306_v27 = vld [vmem:[%s10290_s3 + $0x390] sm:$0xff] }
 0x331   :  { %6131 = vmatprep.subr.bf16.mxu1 %v10361_v19  ;;  %6560 = vmatprep.subr.bf16.mxu0 %v10361_v19  ;;  %v6165_v40 = vpack.c.bf16 %v1305_v5, %v1304_v29  ;;  %v1317_v29 = vld [vmem:[%s10290_s3 + $0x3e8] sm:$0xff]  ;;  %v1635_v5 = vld [vmem:[%s10290_s3 + $0xdd8] sm:$0xff] }
 0x334   :  { %6133 = vmatpush3.bf16.msra.mxu1 %v6132_v13  ;;  %6562 = vmatpush3.bf16.msra.mxu0 %v6561_v2  ;;  %v6150_v13 = vpack.c.bf16 %v1295_v46, %v1294_v34  ;;  %v6603_v2 = vpack.c.bf16 %v1597_v8, %v1596_v18  ;;  %v1307_v34 = vld [vmem:[%s10290_s3 + $0x398] sm:$0xff]  ;;  %v1624_v46 = vld [vmem:[%s10290_s3 + $0xd80] sm:$0xff]  ;;  %v1625_v18 = vld [vmem:[%s10290_s3 + $0xd88] sm:$0xff] }
 0x335   :  { %6134 = vmatprep.subr.bf16.mxu1 %v10361_v19  ;;  %6563 = vmatprep.subr.bf16.mxu0 %v10361_v19  ;;  %v6645_v8 = vpack.c.bf16 %v1625_v18, %v1624_v46 }
 0x338   :  { %6136 = vmatpush3.bf16.msra.mxu1 %v6135_v17  ;;  %6565 = vmatpush3.bf16.msra.mxu0 %v6564_v60  ;;  %v6153_v17 = vpack.c.bf16 %v1297_v44, %v1296_v42  ;;  %v6606_v60 = vpack.c.bf16 %v1599_v28, %v1598_v14  ;;  %v1309_v42 = vld [vmem:[%s10290_s3 + $0x3a8] sm:$0xff]  ;;  %v1626_v44 = vld [vmem:[%s10290_s3 + $0xd90] sm:$0xff]  ;;  %v1627_v14 = vld [vmem:[%s10290_s3 + $0xd98] sm:$0xff] }
 0x339   :  { %6137 = vmatprep.subr.bf16.mxu1 %v10361_v19  ;;  %6566 = vmatprep.subr.bf16.mxu0 %v10361_v19 }
 0x33c   :  { %6139 = vmatpush3.bf16.msra.mxu1 %v6138_v51  ;;  %6568 = vmatpush3.bf16.msra.mxu0 %v6567_v21  ;;  %v6156_v51 = vpack.c.bf16 %v1299_v15, %v1298_v16  ;;  %v6609_v21 = vpack.c.bf16 %v1601_v22, %v1600_v6  ;;  %v1311_v16 = vld [vmem:[%s10290_s3 + $0x3b8] sm:$0xff]  ;;  %v1628_v15 = vld [vmem:[%s10290_s3 + $0xda0] sm:$0xff]  ;;  %v1629_v6 = vld [vmem:[%s10290_s3 + $0xda8] sm:$0xff] }
 0x33d   :  { %6140 = vmatprep.subr.bf16.mxu1 %v10361_v19  ;;  %6569 = vmatprep.subr.bf16.mxu0 %v10361_v19 }
 0x33f   :  { %4966 = vmatmul.mubr.f32.vlgmr.msra.gmra.mrb[10].mxu1 %v1165_v30  ;;  %v1604_v30 = vld [vmem:[%s10290_s3 + $0xce0] sm:$0xff] }
 0x340   :  { %6142 = vmatpush3.bf16.msra.mxu1 %v6141_v11  ;;  %6571 = vmatpush3.bf16.msra.mxu0 %v6570_v41  ;;  %v6612_v11 = vpack.c.bf16 %v1603_v35, %v1602_v20  ;;  %v1302_v41 = vld [vmem:[%s10290_s3 + $0x370] sm:$0xff]  ;;  %v6615_v37 = vpack.c.bf16 %v1605_v55, %v1604_v30  ;;  %v1631_v20 = vld [vmem:[%s10290_s3 + $0xdb8] sm:$0xff]  ;;  %v1633_v30 = vld [vmem:[%s10290_s3 + $0xdc8] sm:$0xff] }
 0x341   :  { %6143 = vmatprep.subr.bf16.mxu1 %v10361_v19  ;;  %6596 = vmatprep.subr.bf16.mxu0 %v10361_v19  ;;  %v6162_v50 = vpack.c.bf16 %v1303_v58, %v1302_v41  ;;  %v1315_v41 = vld [vmem:[%s10290_s3 + $0x3d8] sm:$0xff]  ;;  %v1632_v58 = vld [vmem:[%s10290_s3 + $0xdc0] sm:$0xff] }
 0x342   :  { %5000 = vmatprep.mubr.msk.f32.mxu1 %vm6818_vm0, %v10367_v54 }
 0x343   :  { %5596 = vmatmul.mubr.f32.vlgmr.msra.gmra.mrb[6].mxu0 %v1183_v57  ;;  %v1606_v57 = vld [vmem:[%s10290_s3 + $0xcf0] sm:$0xff] }
 0x344   :  { %6145 = vmatpush3.bf16.msra.mxu1 %v6144_v45  ;;  %6598 = vmatpush3.bf16.msra.mxu0 %v6597_v56  ;;  %v8910_v45 = vld [vmem:[%s10291_s2] ss:$0 sm:$0xff] }
 0x345   :  { %6146 = vmatprep.subr.bf16.mxu1 %v10361_v19  ;;  %6599 = vmatprep.subr.bf16.mxu0 %v10361_v19  ;;  %v1134_v56 = vadd.f32 %v8910_v45, %v8210_v53  ;;  %v6618_v53 = vpack.c.bf16 %v1607_v3, %v1606_v57 }
 0x346   :  { %5665 = vmatprep.mubr.msk.f32.mxu0 %vm6818_vm0, %v10367_v54 }
 0x348   :  { %6148 = vmatpush3.bf16.msra.mxu1 %v6147_v9  ;;  %6601 = vmatpush3.bf16.msra.mxu0 %v6600_v23  ;;  %v1166_v9 = vmax.f32 %v1134_v56, 0.0  ;;  %v1153_v23 = vadd.f32 %v8910_v45, %v8527_v52  ;;  %v6168_v52 = vpack.c.bf16 %v1307_v34, %v1306_v27  ;;  %v1634_v56 = vld [vmem:[%s10290_s3 + $0xdd0] sm:$0xff]  ;;  %v1637_v34 = vld [vmem:[%s10290_s3 + $0xde8] sm:$0xff] }
 0x349   :  { %6149 = vmatprep.subr.bf16.mxu1 %v10361_v19  ;;  %6602 = vmatprep.subr.bf16.mxu0 %v10361_v19  ;;  %v1318_v27 = vld [vmem:[%s10290_s3 + $0x3f0] sm:$0xff] }
 0x34c   :  { %6151 = vmatpush3.bf16.msra.mxu1 %v6150_v13  ;;  %6604 = vmatpush3.bf16.msra.mxu0 %v6603_v2  ;;  %v1308_v13 = vld [vmem:[%s10290_s3 + $0x3a0] sm:$0xff]  ;;  %v1185_v2 = vmax.f32 %v1153_v23, 0.0 }
 0x34d   :  { %6152 = vmatprep.subr.bf16.mxu1 %v10361_v19  ;;  %6605 = vmatprep.subr.bf16.mxu0 %v10361_v19  ;;  %v6171_v28 = vpack.c.bf16 %v1309_v42, %v1308_v13  ;;  %v1636_v23 = vld [vmem:[%s10290_s3 + $0xde0] sm:$0xff]  ;;  %v1321_v13 = vld [vmem:[%s10290_s3 + $0x408] sm:$0xff]  ;;  %v1639_v42 = vld [vmem:[%s10290_s3 + $0xdf8] sm:$0xff] }
 0x34e   :  { %v6663_v18 = vpack.c.bf16 %v1637_v34, %v1636_v23 }
 0x350   :  { %6154 = vmatpush3.bf16.msra.mxu1 %v6153_v17  ;;  %6607 = vmatpush3.bf16.msra.mxu0 %v6606_v60  ;;  %v6648_v17 = vpack.c.bf16 %v1627_v14, %v1626_v44  ;;  %v1310_v60 = vld [vmem:[%s10290_s3 + $0x3b0] sm:$0xff] }
 0x351   :  { %6155 = vmatprep.subr.bf16.mxu1 %v10361_v19  ;;  %6608 = vmatprep.subr.bf16.mxu0 %v10361_v19  ;;  %v6174_v22 = vpack.c.bf16 %v1311_v16, %v1310_v60  ;;  %v1322_v14 = vld [vmem:[%s10290_s3 + $0x410] sm:$0xff]  ;;  %v1323_v60 = vld [vmem:[%s10290_s3 + $0x418] sm:$0xff]  ;;  %v1656_v16 = vld [vmem:[%s10290_s3 + $0xe80] sm:$0xff] }
 0x354   :  { %6157 = vmatpush3.bf16.msra.mxu1 %v6156_v51  ;;  %6610 = vmatpush3.bf16.msra.mxu0 %v6609_v21  ;;  %v6651_v51 = vpack.c.bf16 %v1629_v6, %v1628_v15  ;;  %v1312_v21 = vld [vmem:[%s10290_s3 + $0x3c0] sm:$0xff]  ;;  %v1657_v15 = vld [vmem:[%s10290_s3 + $0xe88] sm:$0xff] }
 0x355   :  { %6158 = vmatprep.subr.bf16.mxu1 %v10361_v19  ;;  %6611 = vmatprep.subr.bf16.mxu0 %v10361_v19  ;;  %v6177_v35 = vpack.c.bf16 %v1313_v32, %v1312_v21  ;;  %v6693_v6 = vpack.c.bf16 %v1657_v15, %v1656_v16  ;;  %v1325_v21 = vld [vmem:[%s10290_s3 + $0x428] sm:$0xff]  ;;  %v1658_v32 = vld [vmem:[%s10290_s3 + $0xe90] sm:$0xff]  ;;  %v1336_v15 = vld [vmem:[%s10290_s3 + $0x480] sm:$0xff] }
 0x358   :  { %6160 = vmatpush3.bf16.msra.mxu1 %v6159_v25  ;;  %6613 = vmatpush3.bf16.msra.mxu0 %v6612_v11  ;;  %v6654_v25 = vpack.c.bf16 %v1631_v20, %v1630_v61  ;;  %v1314_v11 = vld [vmem:[%s10290_s3 + $0x3d0] sm:$0xff]  ;;  %v1659_v61 = vld [vmem:[%s10290_s3 + $0xe98] sm:$0xff] }
 0x359   :  { %6161 = vmatprep.subr.bf16.mxu1 %v10361_v19  ;;  %6614 = vmatprep.subr.bf16.mxu0 %v10361_v19  ;;  %v6180_v55 = vpack.c.bf16 %v1315_v41, %v1314_v11  ;;  %v1327_v11 = vld [vmem:[%s10290_s3 + $0x438] sm:$0xff]  ;;  %v1660_v41 = vld [vmem:[%s10290_s3 + $0xea0] sm:$0xff] }
 0x35c   :  { %6163 = vmatpush3.bf16.msra.mxu1 %v6162_v50  ;;  %6616 = vmatpush3.bf16.msra.mxu0 %v6615_v37  ;;  %v6657_v50 = vpack.c.bf16 %v1633_v30, %v1632_v58  ;;  %v1316_v37 = vld [vmem:[%s10290_s3 + $0x3e0] sm:$0xff]  ;;  %v1661_v58 = vld [vmem:[%s10290_s3 + $0xea8] sm:$0xff] }
 0x35d   :  { %6164 = vmatprep.subr.bf16.mxu1 %v10361_v19  ;;  %6617 = vmatprep.subr.bf16.mxu0 %v10361_v19 }
 0x35f   :  { %5001 = vmatmul.mubr.f32.vlgmr.msra.gmra.mrb[12].mxu1 %v1166_v9  ;;  %v1319_v9 = vld [vmem:[%s10290_s3 + $0x3f8] sm:$0xff] }
 0x360   :  { %6166 = vmatpush3.bf16.msra.mxu1 %v6165_v40  ;;  %6619 = vmatpush3.bf16.msra.mxu0 %v6618_v53  ;;  %v6183_v40 = vpack.c.bf16 %v1317_v29, %v1316_v37  ;;  %v6660_v53 = vpack.c.bf16 %v1635_v5, %v1634_v56  ;;  %v6186_v46 = vpack.c.bf16 %v1319_v9, %v1318_v27  ;;  %v1329_v37 = vld [vmem:[%s10290_s3 + $0x448] sm:$0xff]  ;;  %v1662_v29 = vld [vmem:[%s10290_s3 + $0xeb0] sm:$0xff]  ;;  %v1663_v56 = vld [vmem:[%s10290_s3 + $0xeb8] sm:$0xff] }
 0x361   :  { %6167 = vmatprep.subr.bf16.mxu1 %v10361_v19  ;;  %6644 = vmatprep.subr.bf16.mxu0 %v10361_v19  ;;  %v1664_v27 = vld [vmem:[%s10290_s3 + $0xec0] sm:$0xff]  ;;  %v1665_v9 = vld [vmem:[%s10290_s3 + $0xec8] sm:$0xff] }
 0x362   :  { %5035 = vmatprep.mubr.msk.f32.mxu1 %vm6818_vm0, %v10367_v54  ;;  %v6705_v34 = vpack.c.bf16 %v1665_v9, %v1664_v27 }
 0x363   :  { %5666 = vmatmul.mubr.f32.vlgmr.msra.gmra.mrb[8].mxu0 %v1185_v2  ;;  %v1638_v2 = vld [vmem:[%s10290_s3 + $0xdf0] sm:$0xff] }
 0x364   :  { %6169 = vmatpush3.bf16.msra.mxu1 %v6168_v52  ;;  %6646 = vmatpush3.bf16.msra.mxu0 %v6645_v8  ;;  %v1320_v52 = vld [vmem:[%s10290_s3 + $0x400] sm:$0xff]  ;;  %v1135_v8 = vadd.f32 %v8910_v45, %v8223_v63  ;;  %v6666_v63 = vpack.c.bf16 %v1639_v42, %v1638_v2 }
 0x365   :  { %6170 = vmatprep.subr.bf16.mxu1 %v10361_v19  ;;  %6647 = vmatprep.subr.bf16.mxu0 %v10361_v19  ;;  %v6189_v44 = vpack.c.bf16 %v1321_v13, %v1320_v52  ;;  %v1666_v52 = vld [vmem:[%s10290_s3 + $0xed0] sm:$0xff] }
 0x366   :  { %5735 = vmatprep.mubr.msk.f32.mxu0 %vm6818_vm0, %v10367_v54 }
 0x368   :  { %6172 = vmatpush3.bf16.msra.mxu1 %v6171_v28  ;;  %6649 = vmatpush3.bf16.msra.mxu0 %v6648_v17  ;;  %v1167_v28 = vmax.f32 %v1135_v8, 0.0  ;;  %v1155_v17 = vadd.f32 %v8910_v45, %v8569_v48  ;;  %v6192_v48 = vpack.c.bf16 %v1323_v60, %v1322_v14  ;;  %v1667_v8 = vld [vmem:[%s10290_s3 + $0xed8] sm:$0xff]  ;;  %v1334_v14 = vld [vmem:[%s10290_s3 + $0x470] sm:$0xff] }
 0x369   :  { %6173 = vmatprep.subr.bf16.mxu1 %v10361_v19  ;;  %6650 = vmatprep.subr.bf16.mxu0 %v10361_v19 }
 0x36c   :  { %6175 = vmatpush3.bf16.msra.mxu1 %v6174_v22  ;;  %6652 = vmatpush3.bf16.msra.mxu0 %v6651_v51  ;;  %v1324_v22 = vld [vmem:[%s10290_s3 + $0x420] sm:$0xff]  ;;  %v1187_v51 = vmax.f32 %v1155_v17, 0.0  ;;  %v1669_v17 = vld [vmem:[%s10290_s3 + $0xee8] sm:$0xff] }
 0x36d   :  { %6176 = vmatprep.subr.bf16.mxu1 %v10361_v19  ;;  %6653 = vmatprep.subr.bf16.mxu0 %v10361_v19  ;;  %v6195_v20 = vpack.c.bf16 %v1325_v21, %v1324_v22  ;;  %v1670_v22 = vld [vmem:[%s10290_s3 + $0xef0] sm:$0xff] }
 0x370   :  { %6178 = vmatpush3.bf16.msra.mxu1 %v6177_v35  ;;  %6655 = vmatpush3.bf16.msra.mxu0 %v6654_v25  ;;  %v6696_v35 = vpack.c.bf16 %v1659_v61, %v1658_v32  ;;  %v1326_v25 = vld [vmem:[%s10290_s3 + $0x430] sm:$0xff] }
 0x371   :  { %6179 = vmatprep.subr.bf16.mxu1 %v10361_v19  ;;  %6656 = vmatprep.subr.bf16.mxu0 %v10361_v19  ;;  %v6198_v30 = vpack.c.bf16 %v1327_v11, %v1326_v25  ;;  %v1338_v32 = vld [vmem:[%s10290_s3 + $0x490] sm:$0xff]  ;;  %v1688_v25 = vld [vmem:[%s10290_s3 + $0xf80] sm:$0xff]  ;;  %v1689_v11 = vld [vmem:[%s10290_s3 + $0xf88] sm:$0xff] }
 0x372   :  { %v9015_v57 = vpop.f32.mrb[0].mxu1 }
 0x373   :  { %v4792_v3 = vpop.f32.mrb[1].mxu1 }
 0x374   :  { %6181 = vmatpush3.bf16.msra.mxu1 %v6180_v55  ;;  %6658 = vmatpush3.bf16.msra.mxu0 %v6657_v50  ;;  %v6699_v55 = vpack.c.bf16 %v1661_v58, %v1660_v41  ;;  %v1328_v50 = vld [vmem:[%s10290_s3 + $0x440] sm:$0xff]  ;;  %v6702_v3 = vpack.c.bf16 %v1663_v56, %v1662_v29  ;;  %v6741_v41 = vpack.c.bf16 %v1689_v11, %v1688_v25 }
 0x375   :  { %6182 = vmatprep.subr.bf16.mxu1 %v10361_v19  ;;  %6659 = vmatprep.subr.bf16.mxu0 %v10361_v19  ;;  %v6201_v5 = vpack.c.bf16 %v1329_v37, %v1328_v50  ;;  %v1340_v58 = vld [vmem:[%s10290_s3 + $0x4a0] sm:$0xff]  ;;  %v1690_v50 = vld [vmem:[%s10290_s3 + $0xf90] sm:$0xff]  ;;  %v1691_v37 = vld [vmem:[%s10290_s3 + $0xf98] sm:$0xff] }
 0x376   :  { %v6744_v56 = vpack.c.bf16 %v1691_v37, %v1690_v50  ;;  %v1352_v11 = vld [vmem:[%s10290_s3 + $0x500] sm:$0xff]  ;;  %v1159_v37 = vadd.f32 %v8910_v45, %v8651_v39 }
 0x377   :  { %v1356_v39 = vld [vmem:[%s10290_s3 + $0x520] sm:$0xff] }
 0x378   :  { %6184 = vmatpush3.bf16.msra.mxu1 %v6183_v40  ;;  %6661 = vmatpush3.bf16.msra.mxu0 %v6660_v53  ;;  %v1330_v40 = vld [vmem:[%s10290_s3 + $0x450] sm:$0xff]  ;;  %v1331_v53 = vld [vmem:[%s10290_s3 + $0x458] sm:$0xff] }
 0x379   :  { %6185 = vmatprep.subr.bf16.mxu1 %v10361_v19  ;;  %6662 = vmatprep.subr.bf16.mxu0 %v10361_v19  ;;  %v6204_v23 = vpack.c.bf16 %v1331_v53, %v1330_v40  ;;  %v1692_v40 = vld [vmem:[%s10290_s3 + $0xfa0] sm:$0xff]  ;;  %v1693_v53 = vld [vmem:[%s10290_s3 + $0xfa8] sm:$0xff] }
 0x37a   :  { %v6747_v9 = vpack.c.bf16 %v1693_v53, %v1692_v40  ;;  %v1357_v40 = vld [vmem:[%s10290_s3 + $0x528] sm:$0xff] }
 0x37b   :  { %v6243_v53 = vpack.c.bf16 %v1357_v40, %v1356_v39 }
 0x37c   :  { %6187 = vmatpush3.bf16.msra.mxu1 %v6186_v46  ;;  %6664 = vmatpush3.bf16.msra.mxu0 %v6663_v18  ;;  %v1332_v46 = vld [vmem:[%s10290_s3 + $0x460] sm:$0xff]  ;;  %v1333_v18 = vld [vmem:[%s10290_s3 + $0x468] sm:$0xff] }
 0x37d   :  { %6188 = vmatprep.subr.bf16.mxu1 %v10361_v19  ;;  %6665 = vmatprep.subr.bf16.mxu0 %v10361_v19 }
 0x37f   :  { %5036 = vmatmul.mubr.f32.vlgmr.msra.gmra.mrb[14].mxu1 %v1167_v28  ;;  %v1335_v28 = vld [vmem:[%s10290_s3 + $0x478] sm:$0xff] }
 0x380   :  { %6190 = vmatpush3.bf16.msra.mxu1 %v6189_v44  ;;  %6667 = vmatpush3.bf16.msra.mxu0 %v6666_v63  ;;  %v6207_v44 = vpack.c.bf16 %v1333_v18, %v1332_v46  ;;  %v6708_v63 = vpack.c.bf16 %v1667_v8, %v1666_v52  ;;  %v6210_v60 = vpack.c.bf16 %v1335_v28, %v1334_v14  ;;  %v1694_v46 = vld [vmem:[%s10290_s3 + $0xfb0] sm:$0xff]  ;;  %v1695_v18 = vld [vmem:[%s10290_s3 + $0xfb8] sm:$0xff] }
 0x381   :  { %6191 = vmatprep.subr.bf16.mxu1 %v10361_v19  ;;  %6692 = vmatprep.subr.bf16.mxu0 %v10361_v19  ;;  %v6750_v8 = vpack.c.bf16 %v1695_v18, %v1694_v46  ;;  %v1361_v46 = vld [vmem:[%s10290_s3 + $0x548] sm:$0xff] }
 0x382   :  { %5070 = vmatprep.mubr.msk.f32.mxu1 %vm6818_vm0, %v10367_v54 }
 0x383   :  { %5736 = vmatmul.mubr.f32.vlgmr.msra.gmra.mrb[10].mxu0 %v1187_v51  ;;  %v1671_v51 = vld [vmem:[%s10290_s3 + $0xef8] sm:$0xff] }
 0x384   :  { %6193 = vmatpush3.bf16.msra.mxu1 %v6192_v48  ;;  %6694 = vmatpush3.bf16.msra.mxu0 %v6693_v6  ;;  %v1136_v48 = vadd.f32 %v8910_v45, %v8238_v4  ;;  %v1337_v6 = vld [vmem:[%s10290_s3 + $0x488] sm:$0xff]  ;;  %v6714_v4 = vpack.c.bf16 %v1671_v51, %v1670_v22 }
 0x385   :  { %6194 = vmatprep.subr.bf16.mxu1 %v10361_v19  ;;  %6695 = vmatprep.subr.bf16.mxu0 %v10361_v19  ;;  %v6213_v21 = vpack.c.bf16 %v1337_v6, %v1336_v15 }
 0x386   :  { %5805 = vmatprep.mubr.msk.f32.mxu0 %vm6818_vm0, %v10367_v54  ;;  %v1168_v61 = vmax.f32 %v1136_v48, 0.0 }
 0x388   :  { %6196 = vmatpush3.bf16.msra.mxu1 %v6195_v20  ;;  %6697 = vmatpush3.bf16.msra.mxu0 %v6696_v35  ;;  %v1157_v20 = vadd.f32 %v8910_v45, %v8611_v43  ;;  %v1339_v35 = vld [vmem:[%s10290_s3 + $0x498] sm:$0xff] }
 0x389   :  { %6197 = vmatprep.subr.bf16.mxu1 %v10361_v19  ;;  %6698 = vmatprep.subr.bf16.mxu0 %v10361_v19  ;;  %v6216_v43 = vpack.c.bf16 %v1339_v35, %v1338_v32  ;;  %v1701_v32 = vld [vmem:[%s10290_s3 + $0xfe8] sm:$0xff] }
 0x38c   :  { %6199 = vmatpush3.bf16.msra.mxu1 %v6198_v30  ;;  %6700 = vmatpush3.bf16.msra.mxu0 %v6699_v55  ;;  %v1189_v30 = vmax.f32 %v1157_v20, 0.0  ;;  %v1341_v55 = vld [vmem:[%s10290_s3 + $0x4a8] sm:$0xff] }
 0x38d   :  { %6200 = vmatprep.subr.bf16.mxu1 %v10361_v19  ;;  %6701 = vmatprep.subr.bf16.mxu0 %v10361_v19  ;;  %v6219_v29 = vpack.c.bf16 %v1341_v55, %v1340_v58  ;;  %v1702_v58 = vld [vmem:[%s10290_s3 + $0xff0] sm:$0xff] }
 0x390   :  { %6202 = vmatpush3.bf16.msra.mxu1 %v6201_v5  ;;  %6703 = vmatpush3.bf16.msra.mxu0 %v6702_v3  ;;  %v1342_v5 = vld [vmem:[%s10290_s3 + $0x4b0] sm:$0xff]  ;;  %v1343_v3 = vld [vmem:[%s10290_s3 + $0x4b8] sm:$0xff] }
 0x391   :  { %6203 = vmatprep.subr.bf16.mxu1 %v10361_v19  ;;  %6704 = vmatprep.subr.bf16.mxu0 %v10361_v19  ;;  %v6222_v27 = vpack.c.bf16 %v1343_v3, %v1342_v5  ;;  %v1191_v3 = vmax.f32 %v1159_v37, 0.0 }
 0x392   :  { %v1840_v13 = vpop.f32.mrb[2].mxu1 }
 0x393   :  { %v9138_v2 = vadd.f32 %v1840_v13, %v9015_v57  ;;  %v4827_v42 = vpop.f32.mrb[3].mxu1  ;;  %v1668_v57 = vld [vmem:[%s10290_s3 + $0xee0] sm:$0xff]  ;;  %v1346_v13 = vld [vmem:[%s10290_s3 + $0x4d0] sm:$0xff] }
 0x394   :  { %6205 = vmatpush3.bf16.msra.mxu1 %v6204_v23  ;;  %6706 = vmatpush3.bf16.msra.mxu0 %v6705_v34  ;;  %v6711_v16 = vpack.c.bf16 %v1669_v17, %v1668_v57  ;;  %v1344_v23 = vld [vmem:[%s10290_s3 + $0x4c0] sm:$0xff]  ;;  %v1345_v34 = vld [vmem:[%s10290_s3 + $0x4c8] sm:$0xff]  ;;  %v1347_v42 = vld [vmem:[%s10290_s3 + $0x4d8] sm:$0xff] }
 0x395   :  { %6206 = vmatprep.subr.bf16.mxu1 %v10361_v19  ;;  %6707 = vmatprep.subr.bf16.mxu0 %v10361_v19  ;;  %v6225_v52 = vpack.c.bf16 %v1345_v34, %v1344_v23  ;;  %v6228_v14 = vpack.c.bf16 %v1347_v42, %v1346_v13  ;;  %v1348_v57 = vld [vmem:[%s10290_s3 + $0x4e0] sm:$0xff]  ;;  %v1349_v17 = vld [vmem:[%s10290_s3 + $0x4e8] sm:$0xff] }
 0x396   :  { %v6231_v22 = vpack.c.bf16 %v1349_v17, %v1348_v57  ;;  %v1360_v34 = vld [vmem:[%s10290_s3 + $0x540] sm:$0xff]  ;;  %v1366_v17 = vld [vmem:[%s10290_s3 + $0x570] sm:$0xff] }
 0x397   :  { %v6249_v18 = vpack.c.bf16 %v1361_v46, %v1360_v34  ;;  %v1364_v42 = vld [vmem:[%s10290_s3 + $0x560] sm:$0xff]  ;;  %v1139_v46 = vadd.f32 %v8910_v45, %v8279_v10  ;;  %v1387_v10 = vld [vmem:[%s10290_s3 + $0x618] sm:$0xff] }
 0x398   :  { %6208 = vmatpush3.bf16.msra.mxu1 %v6207_v44  ;;  %6709 = vmatpush3.bf16.msra.mxu0 %v6708_v63  ;;  %v1696_v44 = vld [vmem:[%s10290_s3 + $0xfc0] sm:$0xff]  ;;  %v1697_v63 = vld [vmem:[%s10290_s3 + $0xfc8] sm:$0xff] }
 0x399   :  { %6209 = vmatprep.subr.bf16.mxu1 %v10361_v19  ;;  %6710 = vmatprep.subr.bf16.mxu0 %v10361_v19  ;;  %v6753_v28 = vpack.c.bf16 %v1697_v63, %v1696_v44  ;;  %v1365_v44 = vld [vmem:[%s10290_s3 + $0x568] sm:$0xff] }
 0x39a   :  { %v6255_v57 = vpack.c.bf16 %v1365_v44, %v1364_v42  ;;  %v1386_v42 = vld [vmem:[%s10290_s3 + $0x610] sm:$0xff] }
 0x39b   :  { %v6288_v44 = vpack.c.bf16 %v1387_v10, %v1386_v42  ;;  %v1413_v42 = vld [vmem:[%s10290_s3 + $0x6e8] sm:$0xff] }
 0x39c   :  { %6211 = vmatpush3.bf16.msra.mxu1 %v6210_v60  ;;  %6712 = vmatpush3.bf16.msra.mxu0 %v6711_v16  ;;  %v1698_v60 = vld [vmem:[%s10290_s3 + $0xfd0] sm:$0xff]  ;;  %v1699_v16 = vld [vmem:[%s10290_s3 + $0xfd8] sm:$0xff] }
 0x39d   :  { %6212 = vmatprep.subr.bf16.mxu1 %v10361_v19  ;;  %6713 = vmatprep.subr.bf16.mxu0 %v10361_v19  ;;  %v6756_v51 = vpack.c.bf16 %v1699_v16, %v1698_v60  ;;  %v1367_v60 = vld [vmem:[%s10290_s3 + $0x578] sm:$0xff] }
 0x39f   :  { %5071 = vmatmul.mubr.f32.vlgmr.msra.gmra.mrb[16].mxu1 %v1168_v61 }
 0x3a0   :  { %6214 = vmatpush3.bf16.msra.mxu1 %v6213_v21  ;;  %6715 = vmatpush3.bf16.msra.mxu0 %v6714_v4  ;;  %v1350_v21 = vld [vmem:[%s10290_s3 + $0x4f0] sm:$0xff]  ;;  %v1351_v4 = vld [vmem:[%s10290_s3 + $0x4f8] sm:$0xff] }
 0x3a1   :  { %6215 = vmatprep.subr.bf16.mxu1 %v10361_v19  ;;  %6740 = vmatprep.subr.bf16.mxu0 %v10361_v19  ;;  %v6234_v35 = vpack.c.bf16 %v1351_v4, %v1350_v21 }
 0x3a2   :  { %5105 = vmatprep.mubr.msk.f32.mxu1 %vm6818_vm0, %v10367_v54 }
 0x3a3   :  { %5806 = vmatmul.mubr.f32.vlgmr.msra.gmra.mrb[12].mxu0 %v1189_v30  ;;  %v1703_v30 = vld [vmem:[%s10290_s3 + $0xff8] sm:$0xff] }
 0x3a4   :  { %6217 = vmatpush3.bf16.msra.mxu1 %v6216_v43  ;;  %6742 = vmatpush3.bf16.msra.mxu0 %v6741_v41  ;;  %v1137_v43 = vadd.f32 %v8910_v45, %v8251_v33  ;;  %v1353_v41 = vld [vmem:[%s10290_s3 + $0x508] sm:$0xff]  ;;  %v6762_v33 = vpack.c.bf16 %v1703_v30, %v1702_v58  ;;  %v1376_v58 = vld [vmem:[%s10290_s3 + $0x5c0] sm:$0xff] }
 0x3a5   :  { %6218 = vmatprep.subr.bf16.mxu1 %v10361_v19  ;;  %6743 = vmatprep.subr.bf16.mxu0 %v10361_v19  ;;  %v6237_v55 = vpack.c.bf16 %v1353_v41, %v1352_v11  ;;  %v1374_v11 = vld [vmem:[%s10290_s3 + $0x5b0] sm:$0xff]  ;;  %v1377_v30 = vld [vmem:[%s10290_s3 + $0x5c8] sm:$0xff] }
 0x3a6   :  { %5875 = vmatprep.mubr.msk.f32.mxu0 %vm6818_vm0, %v10367_v54  ;;  %v1169_v50 = vmax.f32 %v1137_v43, 0.0  ;;  %v1375_v43 = vld [vmem:[%s10290_s3 + $0x5b8] sm:$0xff] }
 0x3a7   :  { %v6270_v41 = vpack.c.bf16 %v1375_v43, %v1374_v11  ;;  %v1399_v11 = vld [vmem:[%s10290_s3 + $0x678] sm:$0xff] }
 0x3a8   :  { %6220 = vmatpush3.bf16.msra.mxu1 %v6219_v29  ;;  %6745 = vmatpush3.bf16.msra.mxu0 %v6744_v56  ;;  %v1354_v29 = vld [vmem:[%s10290_s3 + $0x510] sm:$0xff]  ;;  %v1355_v56 = vld [vmem:[%s10290_s3 + $0x518] sm:$0xff] }
 0x3a9   :  { %6221 = vmatprep.subr.bf16.mxu1 %v10361_v19  ;;  %6746 = vmatprep.subr.bf16.mxu0 %v10361_v19  ;;  %v6240_v5 = vpack.c.bf16 %v1355_v56, %v1354_v29  ;;  %v1380_v29 = vld [vmem:[%s10290_s3 + $0x5e0] sm:$0xff]  ;;  %v1381_v56 = vld [vmem:[%s10290_s3 + $0x5e8] sm:$0xff] }
 0x3aa   :  { %v6279_v40 = vpack.c.bf16 %v1381_v56, %v1380_v29  ;;  %v1402_v29 = vld [vmem:[%s10290_s3 + $0x690] sm:$0xff] }
 0x3ac   :  { %6223 = vmatpush3.bf16.msra.mxu1 %v6222_v27  ;;  %6748 = vmatpush3.bf16.msra.mxu0 %v6747_v9  ;;  %v1358_v27 = vld [vmem:[%s10290_s3 + $0x530] sm:$0xff]  ;;  %v1359_v9 = vld [vmem:[%s10290_s3 + $0x538] sm:$0xff] }
 0x3ad   :  { %6224 = vmatprep.subr.bf16.mxu1 %v10361_v19  ;;  %6749 = vmatprep.subr.bf16.mxu0 %v10361_v19  ;;  %v6246_v23 = vpack.c.bf16 %v1359_v9, %v1358_v27  ;;  %v1383_v27 = vld [vmem:[%s10290_s3 + $0x5f8] sm:$0xff] }
 0x3b0   :  { %6226 = vmatpush3.bf16.msra.mxu1 %v6225_v52  ;;  %6751 = vmatpush3.bf16.msra.mxu0 %v6750_v8  ;;  %v1362_v52 = vld [vmem:[%s10290_s3 + $0x550] sm:$0xff]  ;;  %v1363_v8 = vld [vmem:[%s10290_s3 + $0x558] sm:$0xff] }
 0x3b1   :  { %6227 = vmatprep.subr.bf16.mxu1 %v10361_v19  ;;  %6752 = vmatprep.subr.bf16.mxu0 %v10361_v19  ;;  %v6252_v13 = vpack.c.bf16 %v1363_v8, %v1362_v52  ;;  %v1385_v52 = vld [vmem:[%s10290_s3 + $0x608] sm:$0xff] }
 0x3b2   :  { %v1910_v15 = vpop.f32.mrb[4].mxu1 }
 0x3b3   :  { %v9261_v48 = vadd.f32 %v9138_v2, %v1910_v15  ;;  %v4862_v6 = vpop.f32.mrb[5].mxu1  ;;  %v1700_v2 = vld [vmem:[%s10290_s3 + $0xfe0] sm:$0xff] }
 0x3b4   :  { %6229 = vmatpush3.bf16.msra.mxu1 %v6228_v14  ;;  %6754 = vmatpush3.bf16.msra.mxu0 %v6753_v28  ;;  %v6759_v25 = vpack.c.bf16 %v1701_v32, %v1700_v2  ;;  %v6258_v6 = vpack.c.bf16 %v1367_v60, %v1366_v17  ;;  %v1370_v2 = vld [vmem:[%s10290_s3 + $0x590] sm:$0xff]  ;;  %v1391_v17 = vld [vmem:[%s10290_s3 + $0x638] sm:$0xff] }
 0x3b5   :  { %6230 = vmatprep.subr.bf16.mxu1 %v10361_v19  ;;  %6755 = vmatprep.subr.bf16.mxu0 %v10361_v19 }
 0x3b6   :  { %v9277_v61 = vpop.f32.mrb[0].mxu0 }
 0x3b7   :  { %v5387_v20 = vpop.f32.mrb[1].mxu0 }
 0x3b8   :  { %6232 = vmatpush3.bf16.msra.mxu1 %v6231_v22  ;;  %6757 = vmatpush3.bf16.msra.mxu0 %v6756_v51  ;;  %v1368_v22 = vld [vmem:[%s10290_s3 + $0x580] sm:$0xff]  ;;  %v1369_v51 = vld [vmem:[%s10290_s3 + $0x588] sm:$0xff] }
 0x3b9   :  { %6233 = vmatprep.subr.bf16.mxu1 %v10361_v19  ;;  %6758 = vmatprep.subr.bf16.mxu0 %v10361_v19  ;;  %v6261_v21 = vpack.c.bf16 %v1369_v51, %v1368_v22  ;;  %v1372_v20 = vld [vmem:[%s10290_s3 + $0x5a0] sm:$0xff]  ;;  %v1394_v22 = vld [vmem:[%s10290_s3 + $0x650] sm:$0xff]  ;;  %v1395_v51 = vld [vmem:[%s10290_s3 + $0x658] sm:$0xff] }
 0x3bc   :  { %6235 = vmatpush3.bf16.msra.mxu1 %v6234_v35  ;;  %6760 = vmatpush3.bf16.msra.mxu0 %v6759_v25  ;;  %v1373_v35 = vld [vmem:[%s10290_s3 + $0x5a8] sm:$0xff] }
 0x3bd   :  { %6236 = vmatprep.subr.bf16.mxu1 %v10361_v19  ;;  %6761 = vmatprep.subr.bf16.mxu0 %v10361_v19  ;;  %v6267_v25 = vpack.c.bf16 %v1373_v35, %v1372_v20 }
 0x3bf   :  { %5106 = vmatmul.mubr.f32.vlgmr.msra.gmra.mrb[18].mxu1 %v1169_v50  ;;  %v1379_v50 = vld [vmem:[%s10290_s3 + $0x5d8] sm:$0xff] }
 0x3c0   :  { %6238 = vmatpush3.bf16.msra.mxu1 %v6237_v55  ;;  %6763 = vmatpush3.bf16.msra.mxu0 %v6762_v33  ;;  %v6273_v55 = vpack.c.bf16 %v1377_v30, %v1376_v58  ;;  %v1378_v33 = vld [vmem:[%s10290_s3 + $0x5d0] sm:$0xff]  ;;  %v1140_v30 = vadd.f32 %v8910_v45, %v8292_v38  ;;  %v1403_v38 = vld [vmem:[%s10290_s3 + $0x698] sm:$0xff] }
 0x3c1   :  { %6239 = vmatprep.subr.bf16.mxu1 %v10361_v19  ;;  %5140 = vmatprep.mubr.msk.f32.mxu1 %vm6818_vm0, %v10367_v54  ;;  %v6276_v37 = vpack.c.bf16 %v1379_v50, %v1378_v33  ;;  %v1401_v33 = vld [vmem:[%s10290_s3 + $0x688] sm:$0xff]  ;;  %v6312_v56 = vpack.c.bf16 %v1403_v38, %v1402_v29 }
 0x3c2   :  { %6788 = vmatprep.subr.bf16.mxu0 %v10361_v19 }
 0x3c3   :  { %5876 = vmatmul.mubr.f32.vlgmr.msra.gmra.mrb[14].mxu0 %v1191_v3 }
 0x3c4   :  { %6241 = vmatpush3.bf16.msra.mxu1 %v6240_v5  ;;  %5945 = vmatprep.mubr.msk.f32.mxu0 %vm6818_vm0, %v10367_v54 }
 0x3c5   :  { %6242 = vmatprep.subr.bf16.mxu1 %v10361_v19 }
 0x3c8   :  { %6244 = vmatpush3.bf16.msra.mxu1 %v6243_v53  ;;  %v1382_v53 = vld [vmem:[%s10290_s3 + $0x5f0] sm:$0xff] }
 0x3c9   :  { %6245 = vmatprep.subr.bf16.mxu1 %v10361_v19  ;;  %v6282_v34 = vpack.c.bf16 %v1383_v27, %v1382_v53  ;;  %v1407_v53 = vld [vmem:[%s10290_s3 + $0x6b8] sm:$0xff] }
 0x3cc   :  { %6247 = vmatpush3.bf16.msra.mxu1 %v6246_v23 }
 0x3cd   :  { %6248 = vmatprep.subr.bf16.mxu1 %v10361_v19 }
 0x3d0   :  { %6250 = vmatpush3.bf16.msra.mxu1 %v6249_v18  ;;  %v1384_v18 = vld [vmem:[%s10290_s3 + $0x600] sm:$0xff] }
 0x3d1   :  { %6251 = vmatprep.subr.bf16.mxu1 %v10361_v19  ;;  %v6285_v8 = vpack.c.bf16 %v1385_v52, %v1384_v18  ;;  %v1410_v18 = vld [vmem:[%s10290_s3 + $0x6d0] sm:$0xff]  ;;  %v1411_v52 = vld [vmem:[%s10290_s3 + $0x6d8] sm:$0xff] }
 0x3d2   :  { %v1980_v63 = vpop.f32.mrb[6].mxu1 }
 0x3d3   :  { %v3946_v14 = vadd.f32 %v9261_v48, %v1980_v63  ;;  %v4897_v28 = vpop.f32.mrb[7].mxu1  ;;  %v1138_v48 = vadd.f32 %v8910_v45, %v8266_v49  ;;  %v1371_v49 = vld [vmem:[%s10290_s3 + $0x598] sm:$0xff]  ;;  %v1388_v63 = vld [vmem:[%s10290_s3 + $0x620] sm:$0xff] }
 0x3d4   :  { %6253 = vmatpush3.bf16.msra.mxu1 %v6252_v13  ;;  %v6264_v32 = vpack.c.bf16 %v1371_v49, %v1370_v2  ;;  %v1171_v13 = vmax.f32 %v1139_v46, 0.0  ;;  %v1397_v2 = vld [vmem:[%s10290_s3 + $0x668] sm:$0xff] }
 0x3d5   :  { %6254 = vmatprep.subr.bf16.mxu1 %v10361_v19  ;;  %v1170_v4 = vmax.f32 %v1138_v48, 0.0 }
 0x3d6   :  { %v9353_v16 = vpop.f32.mrb[2].mxu0 }
 0x3d7   :  { %v5457_v15 = vpop.f32.mrb[3].mxu0 }
 0x3d8   :  { %6256 = vmatpush3.bf16.msra.mxu1 %v6255_v57  ;;  %v1390_v57 = vld [vmem:[%s10290_s3 + $0x630] sm:$0xff]  ;;  %v1392_v15 = vld [vmem:[%s10290_s3 + $0x640] sm:$0xff] }
 0x3d9   :  { %6257 = vmatprep.subr.bf16.mxu1 %v10361_v19  ;;  %v6294_v60 = vpack.c.bf16 %v1391_v17, %v1390_v57  ;;  %v1415_v57 = vld [vmem:[%s10290_s3 + $0x6f8] sm:$0xff] }
 0x3dc   :  { %6259 = vmatpush3.bf16.msra.mxu1 %v6258_v6  ;;  %v1393_v6 = vld [vmem:[%s10290_s3 + $0x648] sm:$0xff] }
 0x3dd   :  { %6260 = vmatprep.subr.bf16.mxu1 %v10361_v19  ;;  %v6297_v48 = vpack.c.bf16 %v1393_v6, %v1392_v15  ;;  %v1141_v6 = vadd.f32 %v8910_v45, %v8305_v7  ;;  %v1419_v7 = vld [vmem:[%s10290_s3 + $0x718] sm:$0xff] }
 0x3df   :  { %5141 = vmatmul.mubr.f32.vlgmr.msra.gmra.mrb[20].mxu1 %v1170_v4  ;;  %v1396_v4 = vld [vmem:[%s10290_s3 + $0x660] sm:$0xff] }
 0x3e0   :  { %6262 = vmatpush3.bf16.msra.mxu1 %v6261_v21  ;;  %5175 = vmatprep.mubr.msk.f32.mxu1 %vm6818_vm0, %v10367_v54  ;;  %v6300_v21 = vpack.c.bf16 %v1395_v51, %v1394_v22  ;;  %v6303_v35 = vpack.c.bf16 %v1397_v2, %v1396_v4  ;;  %v1417_v22 = vld [vmem:[%s10290_s3 + $0x708] sm:$0xff]  ;;  %v1418_v4 = vld [vmem:[%s10290_s3 + $0x710] sm:$0xff]  ;;  %v1420_v2 = vld [vmem:[%s10290_s3 + $0x720] sm:$0xff] }
 0x3e1   :  { %6263 = vmatprep.subr.bf16.mxu1 %v10361_v19  ;;  %v6336_v45 = vpack.c.bf16 %v1419_v7, %v1418_v4  ;;  %v1445_v4 = vld [vmem:[%s10290_s3 + $0x7e8] sm:$0xff] }
 0x3e4   :  { %6265 = vmatpush3.bf16.msra.mxu1 %v6264_v32 }
 0x3e5   :  { %6266 = vmatprep.subr.bf16.mxu1 %v10361_v19 }
 0x3e8   :  { %6268 = vmatpush3.bf16.msra.mxu1 %v6267_v25  ;;  %v1398_v25 = vld [vmem:[%s10290_s3 + $0x670] sm:$0xff] }
 0x3e9   :  { %6269 = vmatprep.subr.bf16.mxu1 %v10361_v19  ;;  %v6306_v58 = vpack.c.bf16 %v1399_v11, %v1398_v25  ;;  %v1424_v11 = vld [vmem:[%s10290_s3 + $0x740] sm:$0xff] }
 0x3ec   :  { %6271 = vmatpush3.bf16.msra.mxu1 %v6270_v41 }
 0x3ed   :  { %6272 = vmatprep.subr.bf16.mxu1 %v10361_v19 }
 0x3f0   :  { %6274 = vmatpush3.bf16.msra.mxu1 %v6273_v55  ;;  %v1400_v55 = vld [vmem:[%s10290_s3 + $0x680] sm:$0xff] }
 0x3f1   :  { %6275 = vmatprep.subr.bf16.mxu1 %v10361_v19  ;;  %v6309_v50 = vpack.c.bf16 %v1401_v33, %v1400_v55  ;;  %v1427_v55 = vld [vmem:[%s10290_s3 + $0x758] sm:$0xff] }
 0x3f2   :  { %v2050_v5 = vpop.f32.mrb[8].mxu1 }
 0x3f3   :  { %v3947_v3 = vadd.f32 %v3946_v14, %v2050_v5  ;;  %v4932_v39 = vpop.f32.mrb[9].mxu1  ;;  %v1389_v14 = vld [vmem:[%s10290_s3 + $0x628] sm:$0xff]  ;;  %v1404_v5 = vld [vmem:[%s10290_s3 + $0x6a0] sm:$0xff] }
 0x3f4   :  { %6277 = vmatpush3.bf16.msra.mxu1 %v6276_v37  ;;  %v6291_v28 = vpack.c.bf16 %v1389_v14, %v1388_v63  ;;  %v1172_v37 = vmax.f32 %v1140_v30, 0.0  ;;  %v1426_v30 = vld [vmem:[%s10290_s3 + $0x750] sm:$0xff] }
 0x3f5   :  { %6278 = vmatprep.subr.bf16.mxu1 %v10361_v19  ;;  %v6348_v33 = vpack.c.bf16 %v1427_v55, %v1426_v30  ;;  %v1449_v30 = vld [vmem:[%s10290_s3 + $0x808] sm:$0xff] }
 0x3f6   :  { %v9415_v9 = vpop.f32.mrb[4].mxu0 }
 0x3f7   :  { %v5527_v23 = vpop.f32.mrb[5].mxu0 }
 0x3f8   :  { %6280 = vmatpush3.bf16.msra.mxu1 %v6279_v40  ;;  %v1406_v40 = vld [vmem:[%s10290_s3 + $0x6b0] sm:$0xff]  ;;  %v1408_v23 = vld [vmem:[%s10290_s3 + $0x6c0] sm:$0xff] }
 0x3f9   :  { %6281 = vmatprep.subr.bf16.mxu1 %v10361_v19  ;;  %v6318_v27 = vpack.c.bf16 %v1407_v53, %v1406_v40 }
 0x3fc   :  { %6283 = vmatpush3.bf16.msra.mxu1 %v6282_v34  ;;  %v1409_v34 = vld [vmem:[%s10290_s3 + $0x6c8] sm:$0xff] }
 0x3fd   :  { %6284 = vmatprep.subr.bf16.mxu1 %v10361_v19  ;;  %v6321_v46 = vpack.c.bf16 %v1409_v34, %v1408_v23  ;;  %v9606_v23 = vld [vmem:[%s10291_s2] ss:$0 sm:$0xff] }
 0x3fe   :  { %v1142_v34 = vadd.f32 %v9606_v23, %v8318_v47  ;;  %v1435_v47 = vld [vmem:[%s10290_s3 + $0x798] sm:$0xff] }
 0x3ff   :  { %5176 = vmatmul.mubr.f32.vlgmr.msra.gmra.mrb[22].mxu1 %v1171_v13  ;;  %v1412_v13 = vld [vmem:[%s10290_s3 + $0x6e0] sm:$0xff] }
 0x400   :  { %6286 = vmatpush3.bf16.msra.mxu1 %v6285_v8  ;;  %5210 = vmatprep.mubr.msk.f32.mxu1 %vm6818_vm0, %v10367_v54  ;;  %v6324_v8 = vpack.c.bf16 %v1411_v52, %v1410_v18  ;;  %v6327_v14 = vpack.c.bf16 %v1413_v42, %v1412_v13  ;;  %v1433_v18 = vld [vmem:[%s10290_s3 + $0x788] sm:$0xff]  ;;  %v1434_v13 = vld [vmem:[%s10290_s3 + $0x790] sm:$0xff] }
 0x401   :  { %6287 = vmatprep.subr.bf16.mxu1 %v10361_v19  ;;  %v6360_v42 = vpack.c.bf16 %v1435_v47, %v1434_v13  ;;  %v1461_v13 = vld [vmem:[%s10290_s3 + $0x868] sm:$0xff] }
 0x404   :  { %6289 = vmatpush3.bf16.msra.mxu1 %v6288_v44 }
 0x405   :  { %6290 = vmatprep.subr.bf16.mxu1 %v10361_v19 }
 0x408   :  { %6292 = vmatpush3.bf16.msra.mxu1 %v6291_v28  ;;  %v1414_v28 = vld [vmem:[%s10290_s3 + $0x6f0] sm:$0xff] }
 0x409   :  { %6293 = vmatprep.subr.bf16.mxu1 %v10361_v19  ;;  %v6330_v15 = vpack.c.bf16 %v1415_v57, %v1414_v28  ;;  %v1439_v28 = vld [vmem:[%s10290_s3 + $0x7b8] sm:$0xff] }
 0x40c   :  { %6295 = vmatpush3.bf16.msra.mxu1 %v6294_v60 }
 0x40d   :  { %6296 = vmatprep.subr.bf16.mxu1 %v10361_v19 }
 0x410   :  { %6298 = vmatpush3.bf16.msra.mxu1 %v6297_v48  ;;  %v1416_v48 = vld [vmem:[%s10290_s3 + $0x700] sm:$0xff] }
 0x411   :  { %6299 = vmatprep.subr.bf16.mxu1 %v10361_v19  ;;  %v6333_v51 = vpack.c.bf16 %v1417_v22, %v1416_v48  ;;  %v1442_v48 = vld [vmem:[%s10290_s3 + $0x7d0] sm:$0xff]  ;;  %v1443_v22 = vld [vmem:[%s10290_s3 + $0x7d8] sm:$0xff] }
 0x412   :  { %v2120_v49 = vpop.f32.mrb[10].mxu1 }
 0x413   :  { %v3948_v32 = vadd.f32 %v3947_v3, %v2120_v49  ;;  %v4967_v20 = vpop.f32.mrb[11].mxu1  ;;  %v1405_v3 = vld [vmem:[%s10290_s3 + $0x6a8] sm:$0xff] }
 0x414   :  { %6301 = vmatpush3.bf16.msra.mxu1 %v6300_v21  ;;  %v6315_v39 = vpack.c.bf16 %v1405_v3, %v1404_v5  ;;  %v1173_v21 = vmax.f32 %v1141_v6, 0.0  ;;  %v1421_v49 = vld [vmem:[%s10290_s3 + $0x728] sm:$0xff]  ;;  %v1422_v20 = vld [vmem:[%s10290_s3 + $0x730] sm:$0xff] }
 0x415   :  { %6302 = vmatprep.subr.bf16.mxu1 %v10361_v19  ;;  %v1430_v3 = vld [vmem:[%s10290_s3 + $0x770] sm:$0xff] }
 0x416   :  { %v9477_v43 = vpop.f32.mrb[6].mxu0 }
 0x417   :  { %v5597_v41 = vpop.f32.mrb[7].mxu0 }
 0x418   :  { %6304 = vmatpush3.bf16.msra.mxu1 %v6303_v35  ;;  %v1423_v35 = vld [vmem:[%s10290_s3 + $0x738] sm:$0xff]  ;;  %v1425_v41 = vld [vmem:[%s10290_s3 + $0x748] sm:$0xff] }
 0x419   :  { %6305 = vmatprep.subr.bf16.mxu1 %v10361_v19  ;;  %v6342_v25 = vpack.c.bf16 %v1423_v35, %v1422_v20  ;;  %v1447_v20 = vld [vmem:[%s10290_s3 + $0x7f8] sm:$0xff] }
 0x41c   :  { %6307 = vmatpush3.bf16.msra.mxu1 %v6306_v58  ;;  %v6345_v58 = vpack.c.bf16 %v1425_v41, %v1424_v11  ;;  %v1143_v41 = vadd.f32 %v9606_v23, %v8331_v62  ;;  %v1451_v62 = vld [vmem:[%s10290_s3 + $0x818] sm:$0xff] }
 0x41d   :  { %6308 = vmatprep.subr.bf16.mxu1 %v10361_v19 }
 0x41f   :  { %5211 = vmatmul.mubr.f32.vlgmr.msra.gmra.mrb[24].mxu1 %v1172_v37  ;;  %v1429_v37 = vld [vmem:[%s10290_s3 + $0x768] sm:$0xff] }
 0x420   :  { %6310 = vmatpush3.bf16.msra.mxu1 %v6309_v50  ;;  %5245 = vmatprep.mubr.msk.f32.mxu1 %vm6818_vm0, %v10367_v54  ;;  %v1428_v50 = vld [vmem:[%s10290_s3 + $0x760] sm:$0xff] }
 0x421   :  { %6311 = vmatprep.subr.bf16.mxu1 %v10361_v19  ;;  %v6351_v5 = vpack.c.bf16 %v1429_v37, %v1428_v50  ;;  %v1450_v50 = vld [vmem:[%s10290_s3 + $0x810] sm:$0xff] }
 0x422   :  { %v6384_v37 = vpack.c.bf16 %v1451_v62, %v1450_v50  ;;  %v1493_v50 = vld [vmem:[%s10290_s3 + $0x968] sm:$0xff] }
 0x424   :  { %6313 = vmatpush3.bf16.msra.mxu1 %v6312_v56 }
 0x425   :  { %6314 = vmatprep.subr.bf16.mxu1 %v10361_v19 }
 0x428   :  { %6316 = vmatpush3.bf16.msra.mxu1 %v6315_v39  ;;  %v1431_v39 = vld [vmem:[%s10290_s3 + $0x778] sm:$0xff] }
 0x429   :  { %6317 = vmatprep.subr.bf16.mxu1 %v10361_v19 }
 0x42c   :  { %6319 = vmatpush3.bf16.msra.mxu1 %v6318_v27  ;;  %v6354_v27 = vpack.c.bf16 %v1431_v39, %v1430_v3  ;;  %v1455_v3 = vld [vmem:[%s10290_s3 + $0x838] sm:$0xff] }
 0x42d   :  { %6320 = vmatprep.subr.bf16.mxu1 %v10361_v19 }
 0x430   :  { %6322 = vmatpush3.bf16.msra.mxu1 %v6321_v46  ;;  %v1432_v46 = vld [vmem:[%s10290_s3 + $0x780] sm:$0xff] }
 0x431   :  { %6323 = vmatprep.subr.bf16.mxu1 %v10361_v19  ;;  %v6357_v52 = vpack.c.bf16 %v1433_v18, %v1432_v46  ;;  %v1458_v46 = vld [vmem:[%s10290_s3 + $0x850] sm:$0xff]  ;;  %v1459_v18 = vld [vmem:[%s10290_s3 + $0x858] sm:$0xff] }
 0x432   :  { %v2190_v10 = vpop.f32.mrb[12].mxu1 }
 0x433   :  { %v3949_v44 = vadd.f32 %v3948_v32, %v2190_v10  ;;  %v5002_v63 = vpop.f32.mrb[13].mxu1  ;;  %v6339_v32 = vpack.c.bf16 %v1421_v49, %v1420_v2  ;;  %v1436_v10 = vld [vmem:[%s10290_s3 + $0x7a0] sm:$0xff] }
 0x434   :  { %6325 = vmatpush3.bf16.msra.mxu1 %v6324_v8  ;;  %v1174_v8 = vmax.f32 %v1142_v34, 0.0 }
 0x435   :  { %6326 = vmatprep.subr.bf16.mxu1 %v10361_v19 }
 0x436   :  { %v9539_v17 = vpop.f32.mrb[8].mxu0 }
 0x437   :  { %v5667_v60 = vpop.f32.mrb[9].mxu0 }
 0x438   :  { %6328 = vmatpush3.bf16.msra.mxu1 %v6327_v14  ;;  %v1438_v14 = vld [vmem:[%s10290_s3 + $0x7b0] sm:$0xff]  ;;  %v1440_v60 = vld [vmem:[%s10290_s3 + $0x7c0] sm:$0xff] }
 0x439   :  { %6329 = vmatprep.subr.bf16.mxu1 %v10361_v19  ;;  %v6366_v57 = vpack.c.bf16 %v1439_v28, %v1438_v14  ;;  %v1463_v14 = vld [vmem:[%s10290_s3 + $0x878] sm:$0xff] }
 0x43c   :  { %6331 = vmatpush3.bf16.msra.mxu1 %v6330_v15  ;;  %v1441_v15 = vld [vmem:[%s10290_s3 + $0x7c8] sm:$0xff] }
 0x43d   :  { %6332 = vmatprep.subr.bf16.mxu1 %v10361_v19  ;;  %v6369_v6 = vpack.c.bf16 %v1441_v15, %v1440_v60  ;;  %v1144_v15 = vadd.f32 %v9606_v23, %v8346_v12  ;;  %v1483_v12 = vld [vmem:[%s10290_s3 + $0x918] sm:$0xff] }
 0x43f   :  { %5246 = vmatmul.mubr.f32.vlgmr.msra.gmra.mrb[26].mxu1 %v1173_v21  ;;  %v1444_v21 = vld [vmem:[%s10290_s3 + $0x7e0] sm:$0xff] }
 0x440   :  { %6334 = vmatpush3.bf16.msra.mxu1 %v6333_v51  ;;  %5280 = vmatprep.mubr.msk.f32.mxu1 %vm6818_vm0, %v10367_v54  ;;  %v6372_v51 = vpack.c.bf16 %v1443_v22, %v1442_v48  ;;  %v6375_v49 = vpack.c.bf16 %v1445_v4, %v1444_v21  ;;  %v1481_v48 = vld [vmem:[%s10290_s3 + $0x908] sm:$0xff]  ;;  %v1482_v21 = vld [vmem:[%s10290_s3 + $0x910] sm:$0xff] }
 0x441   :  { %6335 = vmatprep.subr.bf16.mxu1 %v10361_v19  ;;  %v6432_v4 = vpack.c.bf16 %v1483_v12, %v1482_v21 }
 0x444   :  { %6337 = vmatpush3.bf16.msra.mxu1 %v6336_v45 }
 0x445   :  { %6338 = vmatprep.subr.bf16.mxu1 %v10361_v19 }
 0x448   :  { %6340 = vmatpush3.bf16.msra.mxu1 %v6339_v32  ;;  %v1446_v32 = vld [vmem:[%s10290_s3 + $0x7f0] sm:$0xff] }
 0x449   :  { %6341 = vmatprep.subr.bf16.mxu1 %v10361_v19  ;;  %v6378_v11 = vpack.c.bf16 %v1447_v20, %v1446_v32  ;;  %v1487_v32 = vld [vmem:[%s10290_s3 + $0x938] sm:$0xff] }
 0x44c   :  { %6343 = vmatpush3.bf16.msra.mxu1 %v6342_v25 }
 0x44d   :  { %6344 = vmatprep.subr.bf16.mxu1 %v10361_v19 }
 0x450   :  { %6346 = vmatpush3.bf16.msra.mxu1 %v6345_v58  ;;  %v1448_v58 = vld [vmem:[%s10290_s3 + $0x800] sm:$0xff] }
 0x451   :  { %6347 = vmatprep.subr.bf16.mxu1 %v10361_v19  ;;  %v6381_v55 = vpack.c.bf16 %v1449_v30, %v1448_v58  ;;  %v1490_v58 = vld [vmem:[%s10290_s3 + $0x950] sm:$0xff]  ;;  %v1491_v30 = vld [vmem:[%s10290_s3 + $0x958] sm:$0xff] }
 0x452   :  { %v2260_v29 = vpop.f32.mrb[14].mxu1 }
 0x453   :  { %v3950_v38 = vadd.f32 %v3949_v44, %v2260_v29  ;;  %v5037_v56 = vpop.f32.mrb[15].mxu1  ;;  %v1437_v44 = vld [vmem:[%s10290_s3 + $0x7a8] sm:$0xff]  ;;  %v1452_v29 = vld [vmem:[%s10290_s3 + $0x820] sm:$0xff] }
 0x454   :  { %6349 = vmatpush3.bf16.msra.mxu1 %v6348_v33  ;;  %v6363_v63 = vpack.c.bf16 %v1437_v44, %v1436_v10  ;;  %v1175_v33 = vmax.f32 %v1143_v41, 0.0 }
 0x455   :  { %6350 = vmatprep.subr.bf16.mxu1 %v10361_v19 }
 0x456   :  { %v9601_v40 = vpop.f32.mrb[10].mxu0 }
 0x457   :  { %v5737_v53 = vpop.f32.mrb[11].mxu0 }
 0x458   :  { %6352 = vmatpush3.bf16.msra.mxu1 %v6351_v5  ;;  %v1454_v5 = vld [vmem:[%s10290_s3 + $0x830] sm:$0xff]  ;;  %v1456_v53 = vld [vmem:[%s10290_s3 + $0x840] sm:$0xff] }
 0x459   :  { %6353 = vmatprep.subr.bf16.mxu1 %v10361_v19  ;;  %v6390_v39 = vpack.c.bf16 %v1455_v3, %v1454_v5  ;;  %v1495_v5 = vld [vmem:[%s10290_s3 + $0x978] sm:$0xff] }
 0x45c   :  { %6355 = vmatpush3.bf16.msra.mxu1 %v6354_v27  ;;  %v1457_v27 = vld [vmem:[%s10290_s3 + $0x848] sm:$0xff] }
 0x45d   :  { %6356 = vmatprep.subr.bf16.mxu1 %v10361_v19  ;;  %v6393_v34 = vpack.c.bf16 %v1457_v27, %v1456_v53  ;;  %v1512_v53 = vld [vmem:[%s10290_s3 + $0xa00] sm:$0xff]  ;;  %v1513_v27 = vld [vmem:[%s10290_s3 + $0xa08] sm:$0xff] }
 0x45f   :  { %5281 = vmatmul.mubr.f32.vlgmr.msra.gmra.mrb[28].mxu1 %v1174_v8  ;;  %v1460_v8 = vld [vmem:[%s10290_s3 + $0x860] sm:$0xff] }
 0x460   :  { %6358 = vmatpush3.bf16.msra.mxu1 %v6357_v52  ;;  %5315 = vmatprep.mubr.msk.f32.mxu1 %vm6818_vm0, %v10367_v54  ;;  %v6396_v52 = vpack.c.bf16 %v1459_v18, %v1458_v46  ;;  %v6399_v44 = vpack.c.bf16 %v1461_v13, %v1460_v8  ;;  %v1514_v18 = vld [vmem:[%s10290_s3 + $0xa10] sm:$0xff]  ;;  %v1516_v8 = vld [vmem:[%s10290_s3 + $0xa20] sm:$0xff]  ;;  %v1517_v13 = vld [vmem:[%s10290_s3 + $0xa28] sm:$0xff] }
 0x461   :  { %6359 = vmatprep.subr.bf16.mxu1 %v10361_v19 }
 0x464   :  { %6361 = vmatpush3.bf16.msra.mxu1 %v6360_v42 }
 0x465   :  { %6362 = vmatprep.subr.bf16.mxu1 %v10361_v19 }
 0x468   :  { %6364 = vmatpush3.bf16.msra.mxu1 %v6363_v63  ;;  %v1462_v63 = vld [vmem:[%s10290_s3 + $0x870] sm:$0xff] }
 0x469   :  { %6365 = vmatprep.subr.bf16.mxu1 %v10361_v19  ;;  %v6402_v60 = vpack.c.bf16 %v1463_v14, %v1462_v63  ;;  %v1520_v63 = vld [vmem:[%s10290_s3 + $0xa40] sm:$0xff]  ;;  %v1521_v14 = vld [vmem:[%s10290_s3 + $0xa48] sm:$0xff] }
 0x46c   :  { %6367 = vmatpush3.bf16.msra.mxu1 %v6366_v57 }
 0x46d   :  { %6368 = vmatprep.subr.bf16.mxu1 %v10361_v19 }
 0x470   :  { %6370 = vmatpush3.bf16.msra.mxu1 %v6369_v6  ;;  %v1480_v6 = vld [vmem:[%s10290_s3 + $0x900] sm:$0xff] }
 0x471   :  { %6371 = vmatprep.subr.bf16.mxu1 %v10361_v19  ;;  %v6429_v22 = vpack.c.bf16 %v1481_v48, %v1480_v6  ;;  %v1524_v48 = vld [vmem:[%s10290_s3 + $0xa60] sm:$0xff] }
 0x472   :  { %v2330_v7 = vpop.f32.mrb[16].mxu1 }
 0x473   :  { %v3951_v45 = vadd.f32 %v3950_v38, %v2330_v7  ;;  %v5072_v2 = vpop.f32.mrb[17].mxu1  ;;  %v1453_v38 = vld [vmem:[%s10290_s3 + $0x828] sm:$0xff]  ;;  %v1484_v7 = vld [vmem:[%s10290_s3 + $0x920] sm:$0xff] }
 0x474   :  { %6373 = vmatpush3.bf16.msra.mxu1 %v6372_v51  ;;  %v6387_v56 = vpack.c.bf16 %v1453_v38, %v1452_v29  ;;  %v1176_v51 = vmax.f32 %v1144_v15, 0.0  ;;  %v1523_v15 = vld [vmem:[%s10290_s3 + $0xa58] sm:$0xff] }
 0x475   :  { %6374 = vmatprep.subr.bf16.mxu1 %v10361_v19 }
 0x476   :  { %v9668_v35 = vpop.f32.mrb[12].mxu0 }
 0x477   :  { %v5807_v25 = vpop.f32.mrb[13].mxu0 }
 0x478   :  { %6376 = vmatpush3.bf16.msra.mxu1 %v6375_v49  ;;  %v1486_v49 = vld [vmem:[%s10290_s3 + $0x930] sm:$0xff]  ;;  %v1488_v25 = vld [vmem:[%s10290_s3 + $0x940] sm:$0xff] }
 0x479   :  { %6377 = vmatprep.subr.bf16.mxu1 %v10361_v19  ;;  %v6438_v20 = vpack.c.bf16 %v1487_v32, %v1486_v49  ;;  %v1148_v49 = vadd.f32 %v9606_v23, %v8423_v31  ;;  %v1544_v32 = vld [vmem:[%s10290_s3 + $0xb00] sm:$0xff]  ;;  %v1547_v31 = vld [vmem:[%s10290_s3 + $0xb18] sm:$0xff] }
 0x47c   :  { %6379 = vmatpush3.bf16.msra.mxu1 %v6378_v11  ;;  %v1489_v11 = vld [vmem:[%s10290_s3 + $0x948] sm:$0xff] }
 0x47d   :  { %6380 = vmatprep.subr.bf16.mxu1 %v10361_v19  ;;  %v6441_v41 = vpack.c.bf16 %v1489_v11, %v1488_v25  ;;  %v1180_v11 = vmax.f32 %v1148_v49, 0.0  ;;  %v1588_v49 = vld [vmem:[%s10290_s3 + $0xc60] sm:$0xff] }
 0x47f   :  { %5316 = vmatmul.mubr.f32.vlgmr.msra.gmra.mrb[30].mxu1 %v1175_v33  ;;  %v1492_v33 = vld [vmem:[%s10290_s3 + $0x960] sm:$0xff] }
 0x480   :  { %6382 = vmatpush3.bf16.msra.mxu1 %v6381_v55  ;;  %5350 = vmatprep.mubr.msk.f32.mxu1 %vm6818_vm0, %v10367_v54  ;;  %v6444_v55 = vpack.c.bf16 %v1491_v30, %v1490_v58  ;;  %v6447_v38 = vpack.c.bf16 %v1493_v50, %v1492_v33  ;;  %v1548_v30 = vld [vmem:[%s10290_s3 + $0xb20] sm:$0xff]  ;;  %v1550_v50 = vld [vmem:[%s10290_s3 + $0xb30] sm:$0xff] }
 0x481   :  { %6383 = vmatprep.subr.bf16.mxu1 %v10361_v19 }
 0x484   :  { %6385 = vmatpush3.bf16.msra.mxu1 %v6384_v37 }
 0x485   :  { %6386 = vmatprep.subr.bf16.mxu1 %v10361_v19 }
 0x488   :  { %6388 = vmatpush3.bf16.msra.mxu1 %v6387_v56  ;;  %v1494_v56 = vld [vmem:[%s10290_s3 + $0x970] sm:$0xff] }
 0x489   :  { %6389 = vmatprep.subr.bf16.mxu1 %v10361_v19  ;;  %v6450_v3 = vpack.c.bf16 %v1495_v5, %v1494_v56  ;;  %v1554_v5 = vld [vmem:[%s10290_s3 + $0xb50] sm:$0xff] }
 0x48c   :  { %6391 = vmatpush3.bf16.msra.mxu1 %v6390_v39  ;;  %v1146_v39 = vadd.f32 %v9606_v23, %v8382_v36  ;;  %v1515_v36 = vld [vmem:[%s10290_s3 + $0xa18] sm:$0xff] }
 0x48d   :  { %6392 = vmatprep.subr.bf16.mxu1 %v10361_v19 }
 0x48e   :  { %v1178_v46 = vmax.f32 %v1146_v39, 0.0 }
 0x490   :  { %6394 = vmatpush3.bf16.msra.mxu1 %v6393_v34  ;;  %v6477_v34 = vpack.c.bf16 %v1513_v27, %v1512_v53  ;;  %v1556_v53 = vld [vmem:[%s10290_s3 + $0xb60] sm:$0xff]  ;;  %v1557_v27 = vld [vmem:[%s10290_s3 + $0xb68] sm:$0xff] }
 0x491   :  { %6395 = vmatprep.subr.bf16.mxu1 %v10361_v19 }
 0x492   :  { %v2400_v47 = vpop.f32.mrb[18].mxu1 }
 0x493   :  { %v3952_v42 = vadd.f32 %v3951_v45, %v2400_v47  ;;  %v5107_v10 = vpop.f32.mrb[19].mxu1  ;;  %v1485_v45 = vld [vmem:[%s10290_s3 + $0x928] sm:$0xff]  ;;  %v6483_v47 = vpack.c.bf16 %v1517_v13, %v1516_v8  ;;  %v1559_v8 = vld [vmem:[%s10290_s3 + $0xb78] sm:$0xff] }
 0x494   :  { %6397 = vmatpush3.bf16.msra.mxu1 %v6396_v52  ;;  %v6435_v2 = vpack.c.bf16 %v1485_v45, %v1484_v7  ;;  %v6480_v52 = vpack.c.bf16 %v1515_v36, %v1514_v18  ;;  %v1519_v10 = vld [vmem:[%s10290_s3 + $0xa38] sm:$0xff]  ;;  %v1526_v7 = vld [vmem:[%s10290_s3 + $0xa70] sm:$0xff]  ;;  %v6543_v36 = vpack.c.bf16 %v1557_v27, %v1556_v53 }
 0x495   :  { %6398 = vmatprep.subr.bf16.mxu1 %v10361_v19  ;;  %v1527_v45 = vld [vmem:[%s10290_s3 + $0xa78] sm:$0xff] }
 0x496   :  { %v9730_v28 = vpop.f32.mrb[14].mxu0  ;;  %v1615_v53 = vld [vmem:[%s10290_s3 + $0xd38] sm:$0xff] }
 0x497   :  { %v5877_v57 = vpop.f32.mrb[15].mxu0 }
 0x498   :  { %6400 = vmatpush3.bf16.msra.mxu1 %v6399_v44  ;;  %v6489_v57 = vpack.c.bf16 %v1521_v14, %v1520_v63  ;;  %v1578_v14 = vld [vmem:[%s10290_s3 + $0xc10] sm:$0xff] }
 0x499   :  { %6401 = vmatprep.subr.bf16.mxu1 %v10361_v19 }
 0x49c   :  { %6403 = vmatpush3.bf16.msra.mxu1 %v6402_v60  ;;  %v1522_v60 = vld [vmem:[%s10290_s3 + $0xa50] sm:$0xff] }
 0x49d   :  { %6428 = vmatprep.subr.bf16.mxu1 %v10361_v19  ;;  %v6492_v6 = vpack.c.bf16 %v1523_v15, %v1522_v60  ;;  %v1580_v60 = vld [vmem:[%s10290_s3 + $0xc20] sm:$0xff]  ;;  %v1581_v15 = vld [vmem:[%s10290_s3 + $0xc28] sm:$0xff] }
 0x49f   :  { %5351 = vmatmul.mubr.f32.vlgmr.msra.gmra.mrb[32].mxu1 %v1176_v51 }
 0x4a0   :  { %6430 = vmatpush3.bf16.msra.mxu1 %v6429_v22  ;;  %5420 = vmatprep.mubr.msk.f32.mxu1 %vm6818_vm0, %v10367_v54  ;;  %v1525_v22 = vld [vmem:[%s10290_s3 + $0xa68] sm:$0xff] }
 0x4a1   :  { %6431 = vmatprep.subr.bf16.mxu1 %v10361_v19 }
 0x4a4   :  { %6433 = vmatpush3.bf16.msra.mxu1 %v6432_v4  ;;  %v6495_v4 = vpack.c.bf16 %v1525_v22, %v1524_v48  ;;  %v1582_v48 = vld [vmem:[%s10290_s3 + $0xc30] sm:$0xff]  ;;  %v1583_v22 = vld [vmem:[%s10290_s3 + $0xc38] sm:$0xff] }
 0x4a5   :  { %6434 = vmatprep.subr.bf16.mxu1 %v10361_v19 }
 0x4a8   :  { %6436 = vmatpush3.bf16.msra.mxu1 %v6435_v2  ;;  %v6498_v2 = vpack.c.bf16 %v1527_v45, %v1526_v7  ;;  %v1586_v7 = vld [vmem:[%s10290_s3 + $0xc50] sm:$0xff]  ;;  %v1587_v45 = vld [vmem:[%s10290_s3 + $0xc58] sm:$0xff] }
 0x4a9   :  { %6437 = vmatprep.subr.bf16.mxu1 %v10361_v19 }
 0x4ac   :  { %6439 = vmatpush3.bf16.msra.mxu1 %v6438_v20  ;;  %v1545_v20 = vld [vmem:[%s10290_s3 + $0xb08] sm:$0xff] }
 0x4ad   :  { %6440 = vmatprep.subr.bf16.mxu1 %v10361_v19  ;;  %v6525_v25 = vpack.c.bf16 %v1545_v20, %v1544_v32  ;;  %v1589_v32 = vld [vmem:[%s10290_s3 + $0xc68] sm:$0xff] }
 0x4b0   :  { %6442 = vmatpush3.bf16.msra.mxu1 %v6441_v41  ;;  %v1546_v41 = vld [vmem:[%s10290_s3 + $0xb10] sm:$0xff] }
 0x4b1   :  { %6443 = vmatprep.subr.bf16.mxu1 %v10361_v19  ;;  %v6528_v58 = vpack.c.bf16 %v1547_v31, %v1546_v41  ;;  %v6591_v41 = vpack.c.bf16 %v1589_v32, %v1588_v49  ;;  %v1590_v31 = vld [vmem:[%s10290_s3 + $0xc70] sm:$0xff]  ;;  %v1648_v32 = vld [vmem:[%s10290_s3 + $0xe40] sm:$0xff] }
 0x4b2   :  { %v2470_v62 = vpop.f32.mrb[20].mxu1 }
 0x4b3   :  { %v3953_v37 = vadd.f32 %v3952_v42, %v2470_v62  ;;  %v5142_v29 = vpop.f32.mrb[21].mxu1  ;;  %v1518_v42 = vld [vmem:[%s10290_s3 + $0xa30] sm:$0xff]  ;;  %v1551_v62 = vld [vmem:[%s10290_s3 + $0xb38] sm:$0xff] }
 0x4b4   :  { %6445 = vmatpush3.bf16.msra.mxu1 %v6444_v55  ;;  %v6486_v44 = vpack.c.bf16 %v1519_v10, %v1518_v42  ;;  %v1549_v55 = vld [vmem:[%s10290_s3 + $0xb28] sm:$0xff]  ;;  %v1552_v29 = vld [vmem:[%s10290_s3 + $0xb40] sm:$0xff] }
 0x4b5   :  { %6446 = vmatprep.subr.bf16.mxu1 %v10361_v19  ;;  %v6531_v33 = vpack.c.bf16 %v1549_v55, %v1548_v30  ;;  %v1576_v42 = vld [vmem:[%s10290_s3 + $0xc00] sm:$0xff]  ;;  %v1577_v10 = vld [vmem:[%s10290_s3 + $0xc08] sm:$0xff]  ;;  %v1152_v55 = vadd.f32 %v9606_v23, %v8505_v59  ;;  %v1611_v59 = vld [vmem:[%s10290_s3 + $0xd18] sm:$0xff] }
 0x4b8   :  { %6448 = vmatpush3.bf16.msra.mxu1 %v6447_v38  ;;  %v1553_v38 = vld [vmem:[%s10290_s3 + $0xb48] sm:$0xff] }
 0x4b9   :  { %6449 = vmatprep.subr.bf16.mxu1 %v10361_v19  ;;  %v6537_v56 = vpack.c.bf16 %v1553_v38, %v1552_v29  ;;  %v1610_v29 = vld [vmem:[%s10290_s3 + $0xd10] sm:$0xff] }
 0x4ba   :  { %v6624_v38 = vpack.c.bf16 %v1611_v59, %v1610_v29  ;;  %v1655_v29 = vld [vmem:[%s10290_s3 + $0xe78] sm:$0xff] }
 0x4bc   :  { %6451 = vmatpush3.bf16.msra.mxu1 %v6450_v3  ;;  %v1555_v3 = vld [vmem:[%s10290_s3 + $0xb58] sm:$0xff] }
 0x4bd   :  { %6476 = vmatprep.subr.bf16.mxu1 %v10361_v19  ;;  %v6540_v39 = vpack.c.bf16 %v1555_v3, %v1554_v5  ;;  %v1613_v5 = vld [vmem:[%s10290_s3 + $0xd28] sm:$0xff] }
 0x4bf   :  { %5421 = vmatmul.mubr.f32.vlgmr.msra.gmra.mrb[34].mxu1 %v1178_v46 }
 0x4c0   :  { %6478 = vmatpush3.bf16.msra.mxu1 %v6477_v34  ;;  %5490 = vmatprep.mubr.msk.f32.mxu1 %vm6818_vm0, %v10367_v54 }
 0x4c1   :  { %6479 = vmatprep.subr.bf16.mxu1 %v10361_v19 }
 0x4c4   :  { %6481 = vmatpush3.bf16.msra.mxu1 %v6480_v52  ;;  %v1558_v52 = vld [vmem:[%s10290_s3 + $0xb70] sm:$0xff] }
 0x4c5   :  { %6482 = vmatprep.subr.bf16.mxu1 %v10361_v19  ;;  %v6546_v13 = vpack.c.bf16 %v1559_v8, %v1558_v52  ;;  %v1619_v52 = vld [vmem:[%s10290_s3 + $0xd58] sm:$0xff] }
 0x4c8   :  { %6484 = vmatpush3.bf16.msra.mxu1 %v6483_v47  ;;  %v1150_v47 = vadd.f32 %v9606_v23, %v8463_v0  ;;  %v1579_v0 = vld [vmem:[%s10290_s3 + $0xc18] sm:$0xff] }
 0x4c9   :  { %6485 = vmatprep.subr.bf16.mxu1 %v10361_v19 }
 0x4ca   :  { %v1182_v63 = vmax.f32 %v1150_v47, 0.0  ;;  %v1621_v47 = vld [vmem:[%s10290_s3 + $0xd68] sm:$0xff] }
 0x4cc   :  { %6487 = vmatpush3.bf16.msra.mxu1 %v6486_v44  ;;  %v6573_v44 = vpack.c.bf16 %v1577_v10, %v1576_v42 }
 0x4cd   :  { %6488 = vmatprep.subr.bf16.mxu1 %v10361_v19 }
 0x4d0   :  { %6490 = vmatpush3.bf16.msra.mxu1 %v6489_v57  ;;  %v6576_v57 = vpack.c.bf16 %v1579_v0, %v1578_v14  ;;  %v1622_v14 = vld [vmem:[%s10290_s3 + $0xd70] sm:$0xff]  ;;  %v1623_v0 = vld [vmem:[%s10290_s3 + $0xd78] sm:$0xff] }
 0x4d1   :  { %6491 = vmatprep.subr.bf16.mxu1 %v10361_v19 }
 0x4d2   :  { %v2540_v51 = vpop.f32.mrb[22].mxu1 }
 0x4d3   :  { %v3954_v21 = vadd.f32 %v3953_v37, %v2540_v51  ;;  %v5177_v12 = vpop.f32.mrb[23].mxu1  ;;  %v6534_v37 = vpack.c.bf16 %v1551_v62, %v1550_v50  ;;  %v6582_v51 = vpack.c.bf16 %v1583_v22, %v1582_v48  ;;  %v1609_v50 = vld [vmem:[%s10290_s3 + $0xd08] sm:$0xff] }
 0x4d4   :  { %6493 = vmatpush3.bf16.msra.mxu1 %v6492_v6  ;;  %v6579_v6 = vpack.c.bf16 %v1581_v15, %v1580_v60  ;;  %v1585_v12 = vld [vmem:[%s10290_s3 + $0xc48] sm:$0xff]  ;;  %v1154_v60 = vadd.f32 %v9606_v23, %v8547_v24  ;;  %v1640_v15 = vld [vmem:[%s10290_s3 + $0xe00] sm:$0xff]  ;;  %v1643_v24 = vld [vmem:[%s10290_s3 + $0xe18] sm:$0xff] }
 0x4d5   :  { %6494 = vmatprep.subr.bf16.mxu1 %v10361_v19 }
 0x4d6   :  { %v1186_v22 = vmax.f32 %v1154_v60, 0.0 }
 0x4d8   :  { %6496 = vmatpush3.bf16.msra.mxu1 %v6495_v4 }
 0x4d9   :  { %6497 = vmatprep.subr.bf16.mxu1 %v10361_v19 }
 0x4dc   :  { %6499 = vmatpush3.bf16.msra.mxu1 %v6498_v2  ;;  %v6588_v2 = vpack.c.bf16 %v1587_v45, %v1586_v7  ;;  %v1646_v45 = vld [vmem:[%s10290_s3 + $0xe30] sm:$0xff] }
 0x4dd   :  { %6524 = vmatprep.subr.bf16.mxu1 %v10361_v19 }
 0x4df   :  { %5491 = vmatmul.mubr.f32.vlgmr.msra.gmra.mrb[36].mxu1 %v1180_v11 }
 0x4e0   :  { %6526 = vmatpush3.bf16.msra.mxu1 %v6525_v25  ;;  %5560 = vmatprep.mubr.msk.f32.mxu1 %vm6818_vm0, %v10367_v54 }
 0x4e1   :  { %6527 = vmatprep.subr.bf16.mxu1 %v10361_v19 }
 0x4e4   :  { %6529 = vmatpush3.bf16.msra.mxu1 %v6528_v58  ;;  %v1591_v58 = vld [vmem:[%s10290_s3 + $0xc78] sm:$0xff] }
 0x4e5   :  { %6530 = vmatprep.subr.bf16.mxu1 %v10361_v19  ;;  %v6594_v30 = vpack.c.bf16 %v1591_v58, %v1590_v31  ;;  %v1652_v58 = vld [vmem:[%s10290_s3 + $0xe60] sm:$0xff] }
 0x4e8   :  { %6532 = vmatpush3.bf16.msra.mxu1 %v6531_v33  ;;  %v1608_v33 = vld [vmem:[%s10290_s3 + $0xd00] sm:$0xff] }
 0x4e9   :  { %6533 = vmatprep.subr.bf16.mxu1 %v10361_v19  ;;  %v6621_v62 = vpack.c.bf16 %v1609_v50, %v1608_v33 }
 0x4ec   :  { %6535 = vmatpush3.bf16.msra.mxu1 %v6534_v37  ;;  %v1184_v37 = vmax.f32 %v1152_v55, 0.0 }
 0x4ed   :  { %6536 = vmatprep.subr.bf16.mxu1 %v10361_v19 }
 0x4f0   :  { %6538 = vmatpush3.bf16.msra.mxu1 %v6537_v56  ;;  %v1612_v56 = vld [vmem:[%s10290_s3 + $0xd20] sm:$0xff] }
 0x4f1   :  { %6539 = vmatprep.subr.bf16.mxu1 %v10361_v19  ;;  %v6627_v3 = vpack.c.bf16 %v1613_v5, %v1612_v56  ;;  %v1672_v56 = vld [vmem:[%s10290_s3 + $0xf00] sm:$0xff]  ;;  %v1673_v5 = vld [vmem:[%s10290_s3 + $0xf08] sm:$0xff] }
 0x4f2   :  { %v2610_v34 = vpop.f32.mrb[24].mxu1 }
 0x4f3   :  { %v3955_v46 = vadd.f32 %v3954_v21, %v2610_v34  ;;  %v5212_v18 = vpop.f32.mrb[25].mxu1  ;;  %v1584_v21 = vld [vmem:[%s10290_s3 + $0xc40] sm:$0xff] }
 0x4f4   :  { %6541 = vmatpush3.bf16.msra.mxu1 %v6540_v39  ;;  %v6585_v4 = vpack.c.bf16 %v1585_v12, %v1584_v21  ;;  %v1614_v39 = vld [vmem:[%s10290_s3 + $0xd30] sm:$0xff]  ;;  %v1616_v34 = vld [vmem:[%s10290_s3 + $0xd40] sm:$0xff] }
 0x4f5   :  { %6542 = vmatprep.subr.bf16.mxu1 %v10361_v19  ;;  %v6630_v27 = vpack.c.bf16 %v1615_v53, %v1614_v39  ;;  %v1644_v12 = vld [vmem:[%s10290_s3 + $0xe20] sm:$0xff]  ;;  %v1674_v53 = vld [vmem:[%s10290_s3 + $0xf10] sm:$0xff] }
 0x4f8   :  { %6544 = vmatpush3.bf16.msra.mxu1 %v6543_v36  ;;  %v1618_v36 = vld [vmem:[%s10290_s3 + $0xd50] sm:$0xff] }
 0x4f9   :  { %6545 = vmatprep.subr.bf16.mxu1 %v10361_v19  ;;  %v6636_v8 = vpack.c.bf16 %v1619_v52, %v1618_v36  ;;  %v1678_v36 = vld [vmem:[%s10290_s3 + $0xf30] sm:$0xff]  ;;  %v1679_v52 = vld [vmem:[%s10290_s3 + $0xf38] sm:$0xff] }
 0x4fc   :  { %6547 = vmatpush3.bf16.msra.mxu1 %v6546_v13  ;;  %v1620_v13 = vld [vmem:[%s10290_s3 + $0xd60] sm:$0xff] }
 0x4fd   :  { %6572 = vmatprep.subr.bf16.mxu1 %v10361_v19 }
 0x4ff   :  { %5561 = vmatmul.mubr.f32.vlgmr.msra.gmra.mrb[38].mxu1 %v1182_v63  ;;  %v6639_v63 = vpack.c.bf16 %v1621_v47, %v1620_v13  ;;  %v1680_v13 = vld [vmem:[%s10290_s3 + $0xf40] sm:$0xff]  ;;  %v1681_v47 = vld [vmem:[%s10290_s3 + $0xf48] sm:$0xff] }
 0x500   :  { %6574 = vmatpush3.bf16.msra.mxu1 %v6573_v44  ;;  %5630 = vmatprep.mubr.msk.f32.mxu1 %vm6818_vm0, %v10367_v54 }
 0x501   :  { %6575 = vmatprep.subr.bf16.mxu1 %v10361_v19 }
 0x504   :  { %6577 = vmatpush3.bf16.msra.mxu1 %v6576_v57  ;;  %v6642_v57 = vpack.c.bf16 %v1623_v0, %v1622_v14  ;;  %v1684_v14 = vld [vmem:[%s10290_s3 + $0xf60] sm:$0xff]  ;;  %v1685_v0 = vld [vmem:[%s10290_s3 + $0xf68] sm:$0xff] }
 0x505   :  { %6578 = vmatprep.subr.bf16.mxu1 %v10361_v19 }
 0x508   :  { %6580 = vmatpush3.bf16.msra.mxu1 %v6579_v6  ;;  %v1641_v6 = vld [vmem:[%s10290_s3 + $0xe08] sm:$0xff] }
 0x509   :  { %6581 = vmatprep.subr.bf16.mxu1 %v10361_v19  ;;  %v6669_v48 = vpack.c.bf16 %v1641_v6, %v1640_v15  ;;  %v6735_v6 = vpack.c.bf16 %v1685_v0, %v1684_v14  ;;  %v4086_v0 = vld [vmem:[%s10293_s7 + $0x40] sm:$0xff] }
 0x50c   :  { %6583 = vmatpush3.bf16.msra.mxu1 %v6582_v51  ;;  %v1642_v51 = vld [vmem:[%s10290_s3 + $0xe10] sm:$0xff] }
 0x50d   :  { %6584 = vmatprep.subr.bf16.mxu1 %v10361_v19  ;;  %v6672_v21 = vpack.c.bf16 %v1643_v24, %v1642_v51 }
 0x510   :  { %6586 = vmatpush3.bf16.msra.mxu1 %v6585_v4  ;;  %v1645_v4 = vld [vmem:[%s10290_s3 + $0xe28] sm:$0xff] }
 0x511   :  { %6587 = vmatprep.subr.bf16.mxu1 %v10361_v19  ;;  %v6675_v7 = vpack.c.bf16 %v1645_v4, %v1644_v12 }
 0x512   :  { %v2680_v20 = vpop.f32.mrb[26].mxu1 }
 0x513   :  { %v3956_v25 = vadd.f32 %v3955_v46, %v2680_v20  ;;  %v5247_v11 = vpop.f32.mrb[27].mxu1  ;;  %v1617_v46 = vld [vmem:[%s10290_s3 + $0xd48] sm:$0xff] }
 0x514   :  { %6589 = vmatpush3.bf16.msra.mxu1 %v6588_v2  ;;  %v6633_v18 = vpack.c.bf16 %v1617_v46, %v1616_v34  ;;  %v1647_v2 = vld [vmem:[%s10290_s3 + $0xe38] sm:$0xff]  ;;  %v1649_v20 = vld [vmem:[%s10290_s3 + $0xe48] sm:$0xff]  ;;  %v1650_v11 = vld [vmem:[%s10290_s3 + $0xe50] sm:$0xff] }
 0x515   :  { %6590 = vmatprep.subr.bf16.mxu1 %v10361_v19  ;;  %v6678_v49 = vpack.c.bf16 %v1647_v2, %v1646_v45  ;;  %v1676_v34 = vld [vmem:[%s10290_s3 + $0xf20] sm:$0xff]  ;;  %v1677_v46 = vld [vmem:[%s10290_s3 + $0xf28] sm:$0xff] }
 0x518   :  { %6592 = vmatpush3.bf16.msra.mxu1 %v6591_v41  ;;  %v1651_v41 = vld [vmem:[%s10290_s3 + $0xe58] sm:$0xff] }
 0x519   :  { %6593 = vmatprep.subr.bf16.mxu1 %v10361_v19  ;;  %v6684_v31 = vpack.c.bf16 %v1651_v41, %v1650_v11  ;;  %v3988_v41 = vld [vmem:[%s10292_s5 + $0x20] sm:$0xff] }
 0x51c   :  { %6595 = vmatpush3.bf16.msra.mxu1 %v6594_v30  ;;  %v1653_v30 = vld [vmem:[%s10290_s3 + $0xe68] sm:$0xff] }
 0x51d   :  { %6620 = vmatprep.subr.bf16.mxu1 %v10361_v19 }
 0x51f   :  { %5631 = vmatmul.mubr.f32.vlgmr.msra.gmra.mrb[40].mxu1 %v1184_v37  ;;  %v1654_v37 = vld [vmem:[%s10290_s3 + $0xe70] sm:$0xff] }
 0x520   :  { %6622 = vmatpush3.bf16.msra.mxu1 %v6621_v62  ;;  %5700 = vmatprep.mubr.msk.f32.mxu1 %vm6818_vm0, %v10367_v54  ;;  %v6687_v62 = vpack.c.bf16 %v1653_v30, %v1652_v58  ;;  %v6690_v59 = vpack.c.bf16 %v1655_v29, %v1654_v37  ;;  %v3991_v30 = vld [vmem:[%s10292_s5 + $0x38] sm:$0xff]  ;;  %v3994_v37 = vld [vmem:[%s10292_s5 + $0x50] sm:$0xff] }
 0x521   :  { %6623 = vmatprep.subr.bf16.mxu1 %v10361_v19  ;;  %v3995_v29 = vld [vmem:[%s10292_s5 + $0x58] sm:$0xff] }
 0x524   :  { %6625 = vmatpush3.bf16.msra.mxu1 %v6624_v38  ;;  %v1156_v38 = vadd.f32 %v9606_v23, %v8591_v26  ;;  %v1675_v26 = vld [vmem:[%s10290_s3 + $0xf18] sm:$0xff] }
 0x525   :  { %6626 = vmatprep.subr.bf16.mxu1 %v10361_v19 }
 0x526   :  { %v1188_v39 = vmax.f32 %v1156_v38, 0.0  ;;  %v3996_v38 = vld [vmem:[%s10292_s5 + $0x60] sm:$0xff] }
 0x528   :  { %6628 = vmatpush3.bf16.msra.mxu1 %v6627_v3  ;;  %v6717_v3 = vpack.c.bf16 %v1673_v5, %v1672_v56  ;;  %v3997_v56 = vld [vmem:[%s10292_s5 + $0x68] sm:$0xff] }
 0x529   :  { %6629 = vmatprep.subr.bf16.mxu1 %v10361_v19 }
 0x52c   :  { %6631 = vmatpush3.bf16.msra.mxu1 %v6630_v27  ;;  %v6720_v27 = vpack.c.bf16 %v1675_v26, %v1674_v53 }
 0x52d   :  { %6632 = vmatprep.subr.bf16.mxu1 %v10361_v19 }
 0x530   :  { %6634 = vmatpush3.bf16.msra.mxu1 %v6633_v18  ;;  %v6723_v18 = vpack.c.bf16 %v1677_v46, %v1676_v34  ;;  %v3999_v34 = vld [vmem:[%s10292_s5 + $0x78] sm:$0xff] }
 0x531   :  { %6635 = vmatprep.subr.bf16.mxu1 %v10361_v19 }
 0x532   :  { %v2750_v42 = vpop.f32.mrb[28].mxu1 }
 0x533   :  { %v3957_v10 = vadd.f32 %v3956_v25, %v2750_v42  ;;  %v5282_v44 = vpop.f32.mrb[29].mxu1  ;;  %v6681_v25 = vpack.c.bf16 %v1649_v20, %v1648_v32  ;;  %v6729_v42 = vpack.c.bf16 %v1681_v47, %v1680_v13  ;;  %v4082_v47 = vld [vmem:[%s10293_s7 + $0x20] sm:$0xff] }
 0x534   :  { %6637 = vmatpush3.bf16.msra.mxu1 %v6636_v8  ;;  %v6726_v8 = vpack.c.bf16 %v1679_v52, %v1678_v36  ;;  %v1683_v44 = vld [vmem:[%s10290_s3 + $0xf58] sm:$0xff]  ;;  %v4080_v36 = vld [vmem:[%s10293_s7 + $0x10] sm:$0xff] }
 0x535   :  { %6638 = vmatprep.subr.bf16.mxu1 %v10361_v19 }
 0x538   :  { %6640 = vmatpush3.bf16.msra.mxu1 %v6639_v63 }
 0x539   :  { %6641 = vmatprep.subr.bf16.mxu1 %v10361_v19 }
 0x53c   :  { %6643 = vmatpush3.bf16.msra.mxu1 %v6642_v57 }
 0x53d   :  { %6668 = vmatprep.subr.bf16.mxu1 %v10361_v19 }
 0x53f   :  { %5701 = vmatmul.mubr.f32.vlgmr.msra.gmra.mrb[42].mxu1 %v1186_v22  ;;  %v1687_v22 = vld [vmem:[%s10290_s3 + $0xf78] sm:$0xff] }
 0x540   :  { %6670 = vmatpush3.bf16.msra.mxu1 %v6669_v48  ;;  %5770 = vmatprep.mubr.msk.f32.mxu1 %vm6818_vm0, %v10367_v54  ;;  %v1686_v48 = vld [vmem:[%s10290_s3 + $0xf70] sm:$0xff] }
 0x541   :  { %6671 = vmatprep.subr.bf16.mxu1 %v10361_v19  ;;  %v6738_v24 = vpack.c.bf16 %v1687_v22, %v1686_v48  ;;  %v4090_v22 = vld [vmem:[%s10293_s7 + $0x60] sm:$0xff] }
 0x544   :  { %6673 = vmatpush3.bf16.msra.mxu1 %v6672_v21  ;;  %v1158_v21 = vadd.f32 %v9606_v23, %v8631_v1  ;;  %v3984_v1 = vld [vmem:[%s10292_s5] sm:$0xff]  ;;  %v3985_v23 = vld [vmem:[%s10292_s5 + $0x8] sm:$0xff] }
 0x545   :  { %6674 = vmatprep.subr.bf16.mxu1 %v10361_v19 }
 0x546   :  { %v1190_v12 = vmax.f32 %v1158_v21, 0.0 }
 0x548   :  { %6676 = vmatpush3.bf16.msra.mxu1 %v6675_v7 }
 0x549   :  { %6677 = vmatprep.subr.bf16.mxu1 %v10361_v19 }
 0x54c   :  { %6679 = vmatpush3.bf16.msra.mxu1 %v6678_v49 }
 0x54d   :  { %6680 = vmatprep.subr.bf16.mxu1 %v10361_v19 }
 0x550   :  { %6682 = vmatpush3.bf16.msra.mxu1 %v6681_v25  ;;  %v6765_v25 = vpack.c.bf16 %v3985_v23, %v3984_v1 }
 0x551   :  { %6683 = vmatprep.subr.bf16.mxu1 %v10361_v19 }
 0x552   :  { %v2820_v55 = vpop.f32.mrb[30].mxu1 }
 0x553   :  { %v3958_v33 = vadd.f32 %v3957_v10, %v2820_v55  ;;  %v5317_v50 = vpop.f32.mrb[31].mxu1  ;;  %v1682_v10 = vld [vmem:[%s10290_s3 + $0xf50] sm:$0xff] }
 0x554   :  { %6685 = vmatpush3.bf16.msra.mxu1 %v6684_v31  ;;  %v6732_v63 = vpack.c.bf16 %v1683_v44, %v1682_v10  ;;  %v3989_v31 = vld [vmem:[%s10292_s5 + $0x28] sm:$0xff]  ;;  %v4084_v44 = vld [vmem:[%s10293_s7 + $0x30] sm:$0xff] }
 0x555   :  { %6686 = vmatprep.subr.bf16.mxu1 %v10361_v19  ;;  %v6771_v58 = vpack.c.bf16 %v3989_v31, %v3988_v41  ;;  %v3993_v50 = vld [vmem:[%s10292_s5 + $0x48] sm:$0xff] }
 0x558   :  { %6688 = vmatpush3.bf16.msra.mxu1 %v6687_v62 }
 0x559   :  { %6689 = vmatprep.subr.bf16.mxu1 %v10361_v19 }
 0x55c   :  { %6691 = vmatpush3.bf16.msra.mxu1 %v6690_v59  ;;  %v6780_v59 = vpack.c.bf16 %v3995_v29, %v3994_v37 }
 0x55d   :  { %6716 = vmatprep.subr.bf16.mxu1 %v10361_v19 }
 0x55f   :  { %5771 = vmatmul.mubr.f32.vlgmr.msra.gmra.mrb[44].mxu1 %v1188_v39 }
 0x560   :  { %6718 = vmatpush3.bf16.msra.mxu1 %v6717_v3  ;;  %5840 = vmatprep.mubr.msk.f32.mxu1 %vm6818_vm0, %v10367_v54  ;;  %v6783_v3 = vpack.c.bf16 %v3997_v56, %v3996_v38 }
 0x561   :  { %6719 = vmatprep.subr.bf16.mxu1 %v10361_v19 }
 0x564   :  { %6721 = vmatpush3.bf16.msra.mxu1 %v6720_v27  ;;  %v3998_v27 = vld [vmem:[%s10292_s5 + $0x70] sm:$0xff] }
 0x565   :  { %6722 = vmatprep.subr.bf16.mxu1 %v10361_v19  ;;  %v6786_v46 = vpack.c.bf16 %v3999_v34, %v3998_v27 }
 0x568   :  { %6724 = vmatpush3.bf16.msra.mxu1 %v6723_v18  ;;  %v4078_v18 = vld [vmem:[%s10293_s7] sm:$0xff] }
 0x569   :  { %6725 = vmatprep.subr.bf16.mxu1 %v10361_v19 }
 0x56c   :  { %6727 = vmatpush3.bf16.msra.mxu1 %v6726_v8  ;;  %v4081_v8 = vld [vmem:[%s10293_s7 + $0x18] sm:$0xff] }
 0x56d   :  { %6728 = vmatprep.subr.bf16.mxu1 %v10361_v19  ;;  %v6792_v13 = vpack.c.bf16 %v4081_v8, %v4080_v36 }
 0x570   :  { %6730 = vmatpush3.bf16.msra.mxu1 %v6729_v42  ;;  %v4083_v42 = vld [vmem:[%s10293_s7 + $0x28] sm:$0xff] }
 0x571   :  { %6731 = vmatprep.subr.bf16.mxu1 %v10361_v19  ;;  %v6795_v10 = vpack.c.bf16 %v4083_v42, %v4082_v47 }
 0x572   :  { %v2890_v57 = vpop.f32.mrb[32].mxu1 }
 0x573   :  { %v3959_v60 = vadd.f32 %v3958_v33, %v2890_v57  ;;  %v5352_v15 = vpop.f32.mrb[33].mxu1  ;;  %v3992_v33 = vld [vmem:[%s10292_s5 + $0x40] sm:$0xff]  ;;  %v4087_v57 = vld [vmem:[%s10293_s7 + $0x48] sm:$0xff] }
 0x574   :  { %6733 = vmatpush3.bf16.msra.mxu1 %v6732_v63  ;;  %v6777_v62 = vpack.c.bf16 %v3993_v50, %v3992_v33  ;;  %v4085_v63 = vld [vmem:[%s10293_s7 + $0x38] sm:$0xff]  ;;  %v4088_v15 = vld [vmem:[%s10293_s7 + $0x50] sm:$0xff]  ;;  %v4179_v33 = vld [vmem:[%s10296_s8] ss:$0 sm:$0xff] }
 0x575   :  { %6734 = vmatprep.subr.bf16.mxu1 %v10361_v19  ;;  %v3960_v51 = vadd.f32 %v3959_v60, %v9277_v61  ;;  %v6798_v14 = vpack.c.bf16 %v4085_v63, %v4084_v44  ;;  %v6801_v60 = vpack.c.bf16 %v4087_v57, %v4086_v0 }
 0x578   :  { %6736 = vmatpush3.bf16.msra.mxu1 %v6735_v6  ;;  %v4089_v6 = vld [vmem:[%s10293_s7 + $0x58] sm:$0xff] }
 0x579   :  { %6737 = vmatprep.subr.bf16.mxu1 %v10361_v19  ;;  %v6804_v48 = vpack.c.bf16 %v4089_v6, %v4088_v15 }
 0x57c   :  { %6739 = vmatpush3.bf16.msra.mxu1 %v6738_v24 }
 0x57d   :  { %6764 = vmatprep.subr.bf16.mxu1 %v10361_v19 }
 0x57f   :  { %5841 = vmatmul.mubr.f32.vlgmr.msra.gmra.mrb[46].mxu1 %v1190_v12 }
 0x580   :  { %5910 = vmatprep.mubr.msk.f32.mxu1 %vm6818_vm0, %v10367_v54  ;;  %v3986_v54 = vld [vmem:[%s10292_s5 + $0x10] sm:$0xff]  ;;  %6766 = vmatpush3.bf16.msra.mxu1 %v6765_v25 }
 0x581   :  { %6767 = vmatprep.subr.bf16.mxu1 %v10361_v19 }
 0x592   :  { %v3030_v4 = vpop.f32.mrb[34].mxu1 }
 0x593   :  { %v3961_v7 = vadd.f32 %v3960_v51, %v3030_v4  ;;  %v5422_v45 = vpop.f32.mrb[35].mxu1  ;;  %v4091_v51 = vld [vmem:[%s10293_s7 + $0x68] sm:$0xff] }
 0x594   :  { %v6807_v4 = vpack.c.bf16 %v4091_v51, %v4090_v22 }
 0x595   :  { %v3962_v61 = vadd.f32 %v3961_v7, %v9353_v16  ;;  %v3987_v16 = vld [vmem:[%s10292_s5 + $0x18] sm:$0xff] }
 0x596   :  { %v6768_v11 = vpack.c.bf16 %v3987_v16, %v3986_v54 }
 0x598   :  { %6769 = vmatpush3.bf16.msra.mxu1 %v6768_v11 }
 0x599   :  { %6770 = vmatprep.subr.bf16.mxu1 %v10361_v19 }
 0x59c   :  { %6772 = vmatpush3.bf16.msra.mxu1 %v6771_v58  ;;  %v4178_v58 = vld [vmem:[%s10295_s6] ss:$0 sm:$0xff] }
 0x59d   :  { %6773 = vmatprep.subr.bf16.mxu1 %v10361_v19 }
 0x5b2   :  { %v3170_v2 = vpop.f32.mrb[36].mxu1 }
 0x5b3   :  { %v3963_v49 = vadd.f32 %v3962_v61, %v3170_v2  ;;  %v5492_v32 = vpop.f32.mrb[37].mxu1 }
 0x5b5   :  { %v3964_v20 = vadd.f32 %v3963_v49, %v9415_v9  ;;  %v3990_v9 = vld [vmem:[%s10292_s5 + $0x30] sm:$0xff] }
 0x5b6   :  { %v6774_v55 = vpack.c.bf16 %v3991_v30, %v3990_v9 }
 0x5b8   :  { %6775 = vmatpush3.bf16.msra.mxu1 %v6774_v55 }
 0x5b9   :  { %6776 = vmatprep.subr.bf16.mxu1 %v10361_v19 }
 0x5bc   :  { %6778 = vmatpush3.bf16.msra.mxu1 %v6777_v62 }
 0x5bd   :  { %6779 = vmatprep.subr.bf16.mxu1 %v10361_v19 }
 0x5c0   :  { %6781 = vmatpush3.bf16.msra.mxu1 %v6780_v59 }
 0x5c1   :  { %6782 = vmatprep.subr.bf16.mxu1 %v10361_v19 }
 0x5c4   :  { %6784 = vmatpush3.bf16.msra.mxu1 %v6783_v3 }
 0x5c5   :  { %6785 = vmatprep.subr.bf16.mxu1 %v10361_v19 }
 0x5c8   :  { %6787 = vmatpush3.bf16.msra.mxu1 %v6786_v46 }
 0x5d2   :  { %v3310_v5 = vpop.f32.mrb[38].mxu1 }
 0x5d3   :  { %v3965_v39 = vadd.f32 %v3964_v20, %v3310_v5  ;;  %v5562_v53 = vpop.f32.mrb[39].mxu1 }
 0x5d5   :  { %v3966_v26 = vadd.f32 %v3965_v39, %v9477_v43  ;;  %v4079_v43 = vld [vmem:[%s10293_s7 + $0x8] sm:$0xff] }
 0x5d6   :  { %v6789_v52 = vpack.c.bf16 %v4079_v43, %v4078_v18 }
 0x5d8   :  { %6790 = vmatpush3.bf16.msra.mxu0 %v6789_v52 }
 0x5d9   :  { %6791 = vmatprep.subr.bf16.mxu0 %v10361_v19 }
 0x5dc   :  { %6793 = vmatpush3.bf16.msra.mxu0 %v6792_v13 }
 0x5dd   :  { %6794 = vmatprep.subr.bf16.mxu0 %v10361_v19 }
 0x5e0   :  { %6796 = vmatpush3.bf16.msra.mxu0 %v6795_v10 }
 0x5e1   :  { %6797 = vmatprep.subr.bf16.mxu0 %v10361_v19 }
 0x5e4   :  { %6799 = vmatpush3.bf16.msra.mxu0 %v6798_v14 }
 0x5e5   :  { %6800 = vmatprep.subr.bf16.mxu0 %v10361_v19 }
 0x5e8   :  { %6802 = vmatpush3.bf16.msra.mxu0 %v6801_v60 }
 0x5e9   :  { %6803 = vmatprep.subr.bf16.mxu0 %v10361_v19 }
 0x5ec   :  { %6805 = vmatpush3.bf16.msra.mxu0 %v6804_v48 }
 0x5ed   :  { %6806 = vmatprep.subr.bf16.mxu0 %v10361_v19 }
 0x5f0   :  { %6808 = vmatpush3.bf16.msra.mxu0 %v6807_v4 }
 0x5f1   :  { %6809 = vmatprep.subr.bf16.mxu0 %v10361_v19 }
 0x5f2   :  { %v3450_v24 = vpop.f32.mrb[40].mxu1 }
 0x5f3   :  { %v3967_v21 = vadd.f32 %v3966_v26, %v3450_v24  ;;  %v5632_v12 = vpop.f32.mrb[41].mxu1 }
 0x5f5   :  { %v3968_v7 = vadd.f32 %v3967_v21, %v9539_v17  ;;  %v4177_v17 = vld [vmem:[%s10294_s4] ss:$0 sm:$0xff] }
 0x612   :  { %v3590_v45 = vpop.f32.mrb[42].mxu1 }
 0x613   :  { %v3969_v61 = vadd.f32 %v3968_v7, %v3590_v45  ;;  %v5702_v2 = vpop.f32.mrb[43].mxu1 }
 0x615   :  { %v3970_v49 = vadd.f32 %v3969_v61, %v9601_v40  ;;  %v4092_v40 = vld [vmem:[%s10293_s7 + $0x70] sm:$0xff] }
 0x632   :  { %v3730_v32 = vpop.f32.mrb[44].mxu1 }
 0x633   :  { %v3971_v1 = vadd.f32 %v3970_v49, %v3730_v32  ;;  %v5772_v23 = vpop.f32.mrb[45].mxu1 }
 0x635   :  { %v3972_v54 = vadd.f32 %v3971_v1, %v9668_v35  ;;  %v4093_v35 = vld [vmem:[%s10293_s7 + $0x78] sm:$0xff] }
 0x636   :  { %v6810_v31 = vpack.c.bf16 %v4093_v35, %v4092_v40 }
 0x638   :  { %6811 = vmatpush3.bf16.msra.mxu0 %v6810_v31 }
 0x652   :  { %v3870_v20 = vpop.f32.mrb[46].mxu1 }
 0x653   :  { %v3973_v25 = vadd.f32 %v3972_v54, %v3870_v20  ;;  %v5842_v16 = vpop.f32.mrb[47].mxu1 }
 0x655   :  { %v3974_v11 = vadd.f32 %v3973_v25, %v9730_v28 }
 0x657   :  { %v3982_v19 = vadd.f32 %v4177_v17, %v3974_v11 }
 0x659   :  { %v3983_v41 = vmax.f32 %v3982_v19, 0.0 }
 0x65b   :  { %5911 = vmatmul.mubr.f32.vlgmr.msra.gmra.mrb[48].mxu1 %v3983_v41 }
 0x72e   :  { %v4073_v9 = vpop.f32.mrb[48].mxu1 }
 0x72f   :  { %v4074_v30 = vadd.f32 %v4178_v58, %v4073_v9  ;;  %v5912_v28 = vpop.f32.mrb[49].mxu1 }
 0x731   :  { %v4077_v55 = vmax.f32 %v4074_v30, 0.0 }
 0x733   :  { %5946 = vmatmul.mubr.f32.vlgmr.msra.gmra.mrb[16].mxu0 %v4077_v55 }
 0x806   :  { %v4167_v50 = vpop.f32.mrb[16].mxu0 }
 0x807   :  { %v4168_v62 = vadd.f32 %v4179_v33, %v4167_v50  ;;  %v5947_v37 = vpop.f32.mrb[17].mxu0 }
 0x809   :  { %4171 = vst [vmem:[%s10297_s9] sm:$0xff] %v4168_v62 }

</bundles_post_ra>
